<compile_context>
chip_gen: v7x
topology: tpu7x:2x2x1
jax: 0.10.0
libtpu: 0.0.40
codegen_flags: <defaults>
</compile_context>

<pallas_src>
import functools

import jax
import jax.numpy as jnp
from jax import lax
from jax.experimental import pallas as pl
from jax.experimental.pallas import tpu as pltpu

FILTER_SIZE = 128                    # conv kernel_size == stride
OUT_CHANNELS = 32
K_FULL = FILTER_SIZE * FILTER_SIZE   # 16384 contraction length
TKH = 8                              # kh rows handled per grid step (1 sublane tile)
C_PAD = 128                          # output channels padded to a full lane tile
_X_BLOCK_BYTES = 8 * 1024 * 1024     # target size of one streamed x block (per buffer)
_NW_STATIC_MAX = 8                   # static unroll over patch columns up to this nw
_J_UNROLL = 4                        # fori_loop unroll factor for large nw


def _pick_row_tile(rows, width):
    """Row-band tile TR (number of 128-row patch bands per grid step).

    Constraints:
      * the streamed x block (TR, TKH, width) f32 stays under _X_BLOCK_BYTES
        per buffer (double-buffered by the pipeline),
      * TR % 8 == 0 or TR == rows  -> (8,128)-legal output block, unmasked
        lane/sublane-dense stores,
      * when rows >= 16, leave >= 2 steps on the parallel axis so both v7x
        TensorCores get work.
    An exact divisor of `rows` is preferred; otherwise the grid uses cdiv and
    Pallas masks the ragged last block.
    """
    if rows <= 8:
        return rows                                   # full dim -> always legal
    cap = max(8, _X_BLOCK_BYTES // (TKH * width * 4))
    limit = min(rows, cap)
    if rows >= 16:
        limit = min(limit, rows // 2)                 # >= 2 parallel grid steps
    limit = max(8, (limit // 8) * 8)                  # 8-aligned (sublane tile)
    for t in range(limit, 7, -8):                     # prefer an exact divisor
        if rows % t == 0:
            return t
    return limit                                      # ragged edge via cdiv grid


def _dct_kernel(x_ref, w_ref, o_ref):
    """One grid step: TR row-bands x TKH image rows, accumulated over kh blocks.

    x_ref: (TR, TKH, W)        f32 image rows, natural (row-major NCHW) layout
    w_ref: (128, 128, C_PAD)   bf16 DCT filter bank, VMEM-resident (1 buffer)
    o_ref: (nw, TR, C_PAD)     f32 output block, revisited across the kh axis
    """
    k = pl.program_id(1)
    nw = o_ref.shape[0]
    tkh = x_ref.shape[1]
    kh0 = k * tkh

    def col(j):
        """(TR, C_PAD) partial result of patch-column j for this kh block."""
        if isinstance(j, int):
            sl = slice(j * FILTER_SIZE, (j + 1) * FILTER_SIZE)
        else:
            sl = pl.ds(pl.multiple_of(j * FILTER_SIZE, FILTER_SIZE), FILTER_SIZE)
        # acc starts from the dk=0 dot (no zeros+add); f32 accumulate on MXU.
        lhs = x_ref[:, 0, sl].astype(jnp.bfloat16)
        acc = jnp.dot(lhs, w_ref[kh0], preferred_element_type=jnp.float32)
        for dk in range(1, tkh):
            lhs = x_ref[:, dk, sl].astype(jnp.bfloat16)
            acc += jnp.dot(lhs, w_ref[kh0 + dk],
                           preferred_element_type=jnp.float32)
        return acc

    if nw <= _NW_STATIC_MAX:
        # Few patch columns: static unroll, static lane slices (proven path).
        @pl.when(k == 0)
        def _():
            for j in range(nw):
                o_ref[j] = col(j)           # first kh block: overwrite, no init pass

        @pl.when(k != 0)
        def _():
            for j in range(nw):
                o_ref[j] += col(j)
    else:
        # Large images: bounded code size / vreg live ranges via fori_loop.
        @pl.when(k == 0)
        def _():
            def body0(j, c):
                o_ref[j] = col(j)
                return c
            lax.fori_loop(0, nw, body0, 0, unroll=_J_UNROLL)

        @pl.when(k != 0)
        def _():
            def body(j, c):
                o_ref[j] += col(j)
                return c
            lax.fori_loop(0, nw, body, 0, unroll=_J_UNROLL)


@functools.partial(jax.jit, static_argnames=("div_255",))
def dct128x128(x, weight, div_255=False):
    """Forward pass of DCT128x128.

    x:      (B, 1, H, W) float32, H and W multiples of 128   (NCHW, like PyTorch)
    weight: (32, 1, 128, 128) float32                        (Conv2d weight)
    returns (B, 32, H//128, W//128) float32
    """
    B, C, H, W = x.shape
    assert C == 1 and H % FILTER_SIZE == 0 and W % FILTER_SIZE == 0
    nh, nw = H // FILTER_SIZE, W // FILTER_SIZE
    rows = B * nh                             # number of 128-row patch bands

    x = x.astype(jnp.float32)
    w = weight.astype(jnp.float32)
    if div_255:
        w = w / 255.0

    # Conv2d weight (32, 1, 128, 128) -> (kh, kw, c), c padded to 128 lanes,
    # stored bf16 (MXU runs bf16 at DEFAULT precision anyway; accumulate is f32).
    wmat = jnp.transpose(w[:, 0], (1, 2, 0))                        # (128, 128, 32)
    wmat = jnp.pad(wmat, ((0, 0), (0, 0), (0, C_PAD - OUT_CHANNELS)))
    wmat = wmat.astype(jnp.bfloat16)

    # Free (order-preserving) view of the NCHW input; nothing is copied in HBM.
    x3 = x.reshape(rows, FILTER_SIZE, W)

    TR = _pick_row_tile(rows, W)
    grid_rows = pl.cdiv(rows, TR)

    out = pl.pallas_call(
        _dct_kernel,
        out_shape=jax.ShapeDtypeStruct((nw, rows, C_PAD), jnp.float32),
        grid_spec=pltpu.PrefetchScalarGridSpec(
            num_scalar_prefetch=0,
            grid=(grid_rows, FILTER_SIZE // TKH),
            in_specs=[
                # Streamed image rows: ~8 MiB per buffer, double-buffered.
                pl.BlockSpec((TR, TKH, W), lambda i, k: (i, k, 0)),
                # Full DCT bank: constant index_map -> DMA'd once; single
                # buffer so only 4 MiB of VMEM is spent on it.
                pl.BlockSpec((FILTER_SIZE, FILTER_SIZE, C_PAD),
                             lambda i, k: (0, 0, 0),
                             pipeline_mode=pl.Buffered(1)),
            ],
            out_specs=pl.BlockSpec((nw, TR, C_PAD), lambda i, k: (0, i, 0)),
        ),
        compiler_params=pltpu.CompilerParams(
            dimension_semantics=("parallel", "arbitrary"),
            vmem_limit_bytes=48 * 1024 * 1024,
        ),
        cost_estimate=pl.CostEstimate(
            flops=2 * rows * nw * K_FULL * C_PAD,   # padded channels actually run
            transcendentals=0,
            bytes_accessed=x3.size * 4 + wmat.size * 2 + nw * rows * C_PAD * 4,
        ),
    )(x3, wmat)

    out = out[:, :, :OUT_CHANNELS]                  # (nw, B*nh, 32)
    out = out.reshape(nw, B, nh, OUT_CHANNELS)
    return out.transpose(1, 3, 2, 0)                # NCHW: (B, 32, nh, nw)


def make_dct_filters(n_filters=OUT_CHANNELS, size=FILTER_SIZE):
    """Deterministic stand-in for np.load(filter_path): a 2-D DCT-II basis bank.

    Returns (n_filters, 1, size, size) float32, matching the Conv2d weight shape.
    """
    n = jnp.arange(size, dtype=jnp.float32)
    u = jnp.arange(size, dtype=jnp.float32)[:, None]
    basis = jnp.cos(jnp.pi * (2.0 * n[None, :] + 1.0) * u / (2.0 * size))
    alpha = jnp.where(u == 0, jnp.sqrt(1.0 / size), jnp.sqrt(2.0 / size))
    basis = alpha * basis                    # (size, size) 1-D DCT basis rows
    filters = []
    for idx in range(n_filters):
        uu, vv = idx // 8, idx % 8           # low-frequency 2-D (u, v) selection
        filters.append(jnp.outer(basis[uu], basis[vv]))
    return jnp.stack(filters)[:, None, :, :].astype(jnp.float32)


if __name__ == "__main__":
    key = jax.random.PRNGKey(0)
    # Kernel size 128 is intrinsic to the module, so the smallest nontrivial
    # input is spatial 256 -> a 2x2 grid of patches per image.
    B, H, W = 2, 256, 256
    x = jax.random.normal(key, (B, 1, H, W), dtype=jnp.float32)
    weight = make_dct_filters()              # (32, 1, 128, 128)

    y = dct128x128(x, weight)
    y = jax.block_until_ready(y)
    assert y.shape == (B, OUT_CHANNELS, H // 128, W // 128), y.shape

    # Reference: plain JAX patch-matmul of the same conv (same default MXU precision).
    nh, nw = H // 128, W // 128
    patches = (
        x.reshape(B, nh, 128, nw, 128).transpose(0, 1, 3, 2, 4).reshape(-1, K_FULL)
    )
    ref = patches @ weight.reshape(OUT_CHANNELS, K_FULL).T
    ref = ref.reshape(B, nh, nw, OUT_CHANNELS).transpose(0, 3, 1, 2)
    assert jnp.allclose(y, ref, atol=5e-3, rtol=5e-3), float(
        jnp.max(jnp.abs(y - ref))
    )

    print("KERNEL_OK")
</pallas_src>

<mosaic_0001>
module attributes {stable_mosaic.version = 11 : i64} {
  func.func @_dct_kernel(%arg0: i32, %arg1: i32, %arg2: memref<4x8x256xf32, #tpu.memory_space<vmem>>, %arg3: memref<128x128x128xbf16, #tpu.memory_space<vmem>>, %arg4: memref<2x4x128xf32, #tpu.memory_space<vmem>>) attributes {dimension_semantics = [#tpu.dimension_semantics<parallel>, #tpu.dimension_semantics<arbitrary>], iteration_bounds = array<i64: 1, 16>, scalar_prefetch = 0 : i64, scratch_operands = 0 : i64, tpu.core_type = #tpu.core_type<tc>, window_params = [{transform_indices = @transform_0, window_bounds = array<i64: 4, 8, 256>}, {pipeline_mode = #tpu.pipeline_mode<synchronous>, transform_indices = @transform_1, window_bounds = array<i64: 128, 128, 128>}, {transform_indices = @transform_2, window_bounds = array<i64: 2, 4, 128>}]} {
    %c8_i32 = arith.constant 8 : i32
    %0 = arith.muli %arg1, %c8_i32 : i32
    %c0_i32 = arith.constant 0 : i32
    %1 = arith.cmpi eq, %arg1, %c0_i32 : i32
    %2 = arith.extui %1 : i1 to i32
    %c0_i32_0 = arith.constant 0 : i32
    %3 = arith.cmpi ne, %2, %c0_i32_0 : i32
    scf.if %3 {
      %c0 = arith.constant 0 : index
      %c0_3 = arith.constant 0 : index
      %c0_4 = arith.constant 0 : index
      %7 = vector.load %arg2[%c0, %c0_3, %c0_4] : memref<4x8x256xf32, #tpu.memory_space<vmem>>, vector<4x1x128xf32>
      %8 = vector.shape_cast %7 : vector<4x1x128xf32> to vector<4x128xf32>
      %9 = arith.truncf %8 : vector<4x128xf32> to vector<4x128xbf16>
      %10 = arith.index_cast %0 : i32 to index
      %c0_5 = arith.constant 0 : index
      %c0_6 = arith.constant 0 : index
      %11 = vector.load %arg3[%10, %c0_5, %c0_6] : memref<128x128x128xbf16, #tpu.memory_space<vmem>>, vector<1x128x128xbf16>
      %12 = vector.shape_cast %11 : vector<1x128x128xbf16> to vector<128x128xbf16>
      %cst = arith.constant dense<0.000000e+00> : vector<4x128xf32>
      %13 = tpu.matmul %9, %12, %cst {dimension_numbers = #tpu.dot_dimension_numbers<[1], [0], [0], [1], [0, 0, 1, 1], [], []>} : vector<4x128xbf16>, vector<128x128xbf16>, vector<4x128xf32> -> vector<4x128xf32>
      %c0_7 = arith.constant 0 : index
      %c1 = arith.constant 1 : index
      %c0_8 = arith.constant 0 : index
      %14 = vector.load %arg2[%c0_7, %c1, %c0_8] : memref<4x8x256xf32, #tpu.memory_space<vmem>>, vector<4x1x128xf32>
      %15 = vector.shape_cast %14 : vector<4x1x128xf32> to vector<4x128xf32>
      %16 = arith.truncf %15 : vector<4x128xf32> to vector<4x128xbf16>
      %c1_i32 = arith.constant 1 : i32
      %17 = arith.addi %0, %c1_i32 : i32
      %18 = arith.index_cast %17 : i32 to index
      %c0_9 = arith.constant 0 : index
      %c0_10 = arith.constant 0 : index
      %19 = vector.load %arg3[%18, %c0_9, %c0_10] : memref<128x128x128xbf16, #tpu.memory_space<vmem>>, vector<1x128x128xbf16>
      %20 = vector.shape_cast %19 : vector<1x128x128xbf16> to vector<128x128xbf16>
      %cst_11 = arith.constant dense<0.000000e+00> : vector<4x128xf32>
      %21 = tpu.matmul %16, %20, %cst_11 {dimension_numbers = #tpu.dot_dimension_numbers<[1], [0], [0], [1], [0, 0, 1, 1], [], []>} : vector<4x128xbf16>, vector<128x128xbf16>, vector<4x128xf32> -> vector<4x128xf32>
      %22 = arith.addf %13, %21 : vector<4x128xf32>
      %c0_12 = arith.constant 0 : index
      %c2 = arith.constant 2 : index
      %c0_13 = arith.constant 0 : index
      %23 = vector.load %arg2[%c0_12, %c2, %c0_13] : memref<4x8x256xf32, #tpu.memory_space<vmem>>, vector<4x1x128xf32>
      %24 = vector.shape_cast %23 : vector<4x1x128xf32> to vector<4x128xf32>
      %25 = arith.truncf %24 : vector<4x128xf32> to vector<4x128xbf16>
      %c2_i32 = arith.constant 2 : i32
      %26 = arith.addi %0, %c2_i32 : i32
      %27 = arith.index_cast %26 : i32 to index
      %c0_14 = arith.constant 0 : index
      %c0_15 = arith.constant 0 : index
      %28 = vector.load %arg3[%27, %c0_14, %c0_15] : memref<128x128x128xbf16, #tpu.memory_space<vmem>>, vector<1x128x128xbf16>
      %29 = vector.shape_cast %28 : vector<1x128x128xbf16> to vector<128x128xbf16>
      %cst_16 = arith.constant dense<0.000000e+00> : vector<4x128xf32>
      %30 = tpu.matmul %25, %29, %cst_16 {dimension_numbers = #tpu.dot_dimension_numbers<[1], [0], [0], [1], [0, 0, 1, 1], [], []>} : vector<4x128xbf16>, vector<128x128xbf16>, vector<4x128xf32> -> vector<4x128xf32>
      %31 = arith.addf %22, %30 : vector<4x128xf32>
      %c0_17 = arith.constant 0 : index
      %c3 = arith.constant 3 : index
      %c0_18 = arith.constant 0 : index
      %32 = vector.load %arg2[%c0_17, %c3, %c0_18] : memref<4x8x256xf32, #tpu.memory_space<vmem>>, vector<4x1x128xf32>
      %33 = vector.shape_cast %32 : vector<4x1x128xf32> to vector<4x128xf32>
      %34 = arith.truncf %33 : vector<4x128xf32> to vector<4x128xbf16>
      %c3_i32 = arith.constant 3 : i32
      %35 = arith.addi %0, %c3_i32 : i32
      %36 = arith.index_cast %35 : i32 to index
      %c0_19 = arith.constant 0 : index
      %c0_20 = arith.constant 0 : index
      %37 = vector.load %arg3[%36, %c0_19, %c0_20] : memref<128x128x128xbf16, #tpu.memory_space<vmem>>, vector<1x128x128xbf16>
      %38 = vector.shape_cast %37 : vector<1x128x128xbf16> to vector<128x128xbf16>
      %cst_21 = arith.constant dense<0.000000e+00> : vector<4x128xf32>
      %39 = tpu.matmul %34, %38, %cst_21 {dimension_numbers = #tpu.dot_dimension_numbers<[1], [0], [0], [1], [0, 0, 1, 1], [], []>} : vector<4x128xbf16>, vector<128x128xbf16>, vector<4x128xf32> -> vector<4x128xf32>
      %40 = arith.addf %31, %39 : vector<4x128xf32>
      %c0_22 = arith.constant 0 : index
      %c4 = arith.constant 4 : index
      %c0_23 = arith.constant 0 : index
      %41 = vector.load %arg2[%c0_22, %c4, %c0_23] : memref<4x8x256xf32, #tpu.memory_space<vmem>>, vector<4x1x128xf32>
      %42 = vector.shape_cast %41 : vector<4x1x128xf32> to vector<4x128xf32>
      %43 = arith.truncf %42 : vector<4x128xf32> to vector<4x128xbf16>
      %c4_i32 = arith.constant 4 : i32
      %44 = arith.addi %0, %c4_i32 : i32
      %45 = arith.index_cast %44 : i32 to index
      %c0_24 = arith.constant 0 : index
      %c0_25 = arith.constant 0 : index
      %46 = vector.load %arg3[%45, %c0_24, %c0_25] : memref<128x128x128xbf16, #tpu.memory_space<vmem>>, vector<1x128x128xbf16>
      %47 = vector.shape_cast %46 : vector<1x128x128xbf16> to vector<128x128xbf16>
      %cst_26 = arith.constant dense<0.000000e+00> : vector<4x128xf32>
      %48 = tpu.matmul %43, %47, %cst_26 {dimension_numbers = #tpu.dot_dimension_numbers<[1], [0], [0], [1], [0, 0, 1, 1], [], []>} : vector<4x128xbf16>, vector<128x128xbf16>, vector<4x128xf32> -> vector<4x128xf32>
      %49 = arith.addf %40, %48 : vector<4x128xf32>
      %c0_27 = arith.constant 0 : index
      %c5 = arith.constant 5 : index
      %c0_28 = arith.constant 0 : index
      %50 = vector.load %arg2[%c0_27, %c5, %c0_28] : memref<4x8x256xf32, #tpu.memory_space<vmem>>, vector<4x1x128xf32>
      %51 = vector.shape_cast %50 : vector<4x1x128xf32> to vector<4x128xf32>
      %52 = arith.truncf %51 : vector<4x128xf32> to vector<4x128xbf16>
      %c5_i32 = arith.constant 5 : i32
      %53 = arith.addi %0, %c5_i32 : i32
      %54 = arith.index_cast %53 : i32 to index
      %c0_29 = arith.constant 0 : index
      %c0_30 = arith.constant 0 : index
      %55 = vector.load %arg3[%54, %c0_29, %c0_30] : memref<128x128x128xbf16, #tpu.memory_space<vmem>>, vector<1x128x128xbf16>
      %56 = vector.shape_cast %55 : vector<1x128x128xbf16> to vector<128x128xbf16>
      %cst_31 = arith.constant dense<0.000000e+00> : vector<4x128xf32>
      %57 = tpu.matmul %52, %56, %cst_31 {dimension_numbers = #tpu.dot_dimension_numbers<[1], [0], [0], [1], [0, 0, 1, 1], [], []>} : vector<4x128xbf16>, vector<128x128xbf16>, vector<4x128xf32> -> vector<4x128xf32>
      %58 = arith.addf %49, %57 : vector<4x128xf32>
      %c0_32 = arith.constant 0 : index
      %c6 = arith.constant 6 : index
      %c0_33 = arith.constant 0 : index
      %59 = vector.load %arg2[%c0_32, %c6, %c0_33] : memref<4x8x256xf32, #tpu.memory_space<vmem>>, vector<4x1x128xf32>
      %60 = vector.shape_cast %59 : vector<4x1x128xf32> to vector<4x128xf32>
      %61 = arith.truncf %60 : vector<4x128xf32> to vector<4x128xbf16>
      %c6_i32 = arith.constant 6 : i32
      %62 = arith.addi %0, %c6_i32 : i32
      %63 = arith.index_cast %62 : i32 to index
      %c0_34 = arith.constant 0 : index
      %c0_35 = arith.constant 0 : index
      %64 = vector.load %arg3[%63, %c0_34, %c0_35] : memref<128x128x128xbf16, #tpu.memory_space<vmem>>, vector<1x128x128xbf16>
      %65 = vector.shape_cast %64 : vector<1x128x128xbf16> to vector<128x128xbf16>
      %cst_36 = arith.constant dense<0.000000e+00> : vector<4x128xf32>
      %66 = tpu.matmul %61, %65, %cst_36 {dimension_numbers = #tpu.dot_dimension_numbers<[1], [0], [0], [1], [0, 0, 1, 1], [], []>} : vector<4x128xbf16>, vector<128x128xbf16>, vector<4x128xf32> -> vector<4x128xf32>
      %67 = arith.addf %58, %66 : vector<4x128xf32>
      %c0_37 = arith.constant 0 : index
      %c7 = arith.constant 7 : index
      %c0_38 = arith.constant 0 : index
      %68 = vector.load %arg2[%c0_37, %c7, %c0_38] : memref<4x8x256xf32, #tpu.memory_space<vmem>>, vector<4x1x128xf32>
      %69 = vector.shape_cast %68 : vector<4x1x128xf32> to vector<4x128xf32>
      %70 = arith.truncf %69 : vector<4x128xf32> to vector<4x128xbf16>
      %c7_i32 = arith.constant 7 : i32
      %71 = arith.addi %0, %c7_i32 : i32
      %72 = arith.index_cast %71 : i32 to index
      %c0_39 = arith.constant 0 : index
      %c0_40 = arith.constant 0 : index
      %73 = vector.load %arg3[%72, %c0_39, %c0_40] : memref<128x128x128xbf16, #tpu.memory_space<vmem>>, vector<1x128x128xbf16>
      %74 = vector.shape_cast %73 : vector<1x128x128xbf16> to vector<128x128xbf16>
      %cst_41 = arith.constant dense<0.000000e+00> : vector<4x128xf32>
      %75 = tpu.matmul %70, %74, %cst_41 {dimension_numbers = #tpu.dot_dimension_numbers<[1], [0], [0], [1], [0, 0, 1, 1], [], []>} : vector<4x128xbf16>, vector<128x128xbf16>, vector<4x128xf32> -> vector<4x128xf32>
      %76 = arith.addf %67, %75 : vector<4x128xf32>
      %c0_42 = arith.constant 0 : index
      %c0_43 = arith.constant 0 : index
      %c0_44 = arith.constant 0 : index
      %77 = vector.load %arg4[%c0_42, %c0_43, %c0_44] : memref<2x4x128xf32, #tpu.memory_space<vmem>>, vector<1x4x128xf32>
      %78 = vector.shape_cast %77 : vector<1x4x128xf32> to vector<4x128xf32>
      %79 = vector.shape_cast %76 : vector<4x128xf32> to vector<1x4x128xf32>
      tpu.vector_store %arg4[%c0_42, %c0_43, %c0_44], %79 {strides = array<i32>} : memref<2x4x128xf32, #tpu.memory_space<vmem>>, vector<1x4x128xf32>,
      %c0_45 = arith.constant 0 : index
      %c0_46 = arith.constant 0 : index
      %c128 = arith.constant 128 : index
      %80 = vector.load %arg2[%c0_45, %c0_46, %c128] : memref<4x8x256xf32, #tpu.memory_space<vmem>>, vector<4x1x128xf32>
      %81 = vector.shape_cast %80 : vector<4x1x128xf32> to vector<4x128xf32>
      %82 = arith.truncf %81 : vector<4x128xf32> to vector<4x128xbf16>
      %83 = arith.index_cast %0 : i32 to index
      %c0_47 = arith.constant 0 : index
      %c0_48 = arith.constant 0 : index
      %84 = vector.load %arg3[%83, %c0_47, %c0_48] : memref<128x128x128xbf16, #tpu.memory_space<vmem>>, vector<1x128x128xbf16>
      %85 = vector.shape_cast %84 : vector<1x128x128xbf16> to vector<128x128xbf16>
      %cst_49 = arith.constant dense<0.000000e+00> : vector<4x128xf32>
      %86 = tpu.matmul %82, %85, %cst_49 {dimension_numbers = #tpu.dot_dimension_numbers<[1], [0], [0], [1], [0, 0, 1, 1], [], []>} : vector<4x128xbf16>, vector<128x128xbf16>, vector<4x128xf32> -> vector<4x128xf32>
      %c0_50 = arith.constant 0 : index
      %c1_51 = arith.constant 1 : index
      %c128_52 = arith.constant 128 : index
      %87 = vector.load %arg2[%c0_50, %c1_51, %c128_52] : memref<4x8x256xf32, #tpu.memory_space<vmem>>, vector<4x1x128xf32>
      %88 = vector.shape_cast %87 : vector<4x1x128xf32> to vector<4x128xf32>
      %89 = arith.truncf %88 : vector<4x128xf32> to vector<4x128xbf16>
      %c1_i32_53 = arith.constant 1 : i32
      %90 = arith.addi %0, %c1_i32_53 : i32
      %91 = arith.index_cast %90 : i32 to index
      %c0_54 = arith.constant 0 : index
      %c0_55 = arith.constant 0 : index
      %92 = vector.load %arg3[%91, %c0_54, %c0_55] : memref<128x128x128xbf16, #tpu.memory_space<vmem>>, vector<1x128x128xbf16>
      %93 = vector.shape_cast %92 : vector<1x128x128xbf16> to vector<128x128xbf16>
      %cst_56 = arith.constant dense<0.000000e+00> : vector<4x128xf32>
      %94 = tpu.matmul %89, %93, %cst_56 {dimension_numbers = #tpu.dot_dimension_numbers<[1], [0], [0], [1], [0, 0, 1, 1], [], []>} : vector<4x128xbf16>, vector<128x128xbf16>, vector<4x128xf32> -> vector<4x128xf32>
      %95 = arith.addf %86, %94 : vector<4x128xf32>
      %c0_57 = arith.constant 0 : index
      %c2_58 = arith.constant 2 : index
      %c128_59 = arith.constant 128 : index
      %96 = vector.load %arg2[%c0_57, %c2_58, %c128_59] : memref<4x8x256xf32, #tpu.memory_space<vmem>>, vector<4x1x128xf32>
      %97 = vector.shape_cast %96 : vector<4x1x128xf32> to vector<4x128xf32>
      %98 = arith.truncf %97 : vector<4x128xf32> to vector<4x128xbf16>
      %c2_i32_60 = arith.constant 2 : i32
      %99 = arith.addi %0, %c2_i32_60 : i32
      %100 = arith.index_cast %99 : i32 to index
      %c0_61 = arith.constant 0 : index
      %c0_62 = arith.constant 0 : index
      %101 = vector.load %arg3[%100, %c0_61, %c0_62] : memref<128x128x128xbf16, #tpu.memory_space<vmem>>, vector<1x128x128xbf16>
      %102 = vector.shape_cast %101 : vector<1x128x128xbf16> to vector<128x128xbf16>
      %cst_63 = arith.constant dense<0.000000e+00> : vector<4x128xf32>
      %103 = tpu.matmul %98, %102, %cst_63 {dimension_numbers = #tpu.dot_dimension_numbers<[1], [0], [0], [1], [0, 0, 1, 1], [], []>} : vector<4x128xbf16>, vector<128x128xbf16>, vector<4x128xf32> -> vector<4x128xf32>
      %104 = arith.addf %95, %103 : vector<4x128xf32>
      %c0_64 = arith.constant 0 : index
      %c3_65 = arith.constant 3 : index
      %c128_66 = arith.constant 128 : index
      %105 = vector.load %arg2[%c0_64, %c3_65, %c128_66] : memref<4x8x256xf32, #tpu.memory_space<vmem>>, vector<4x1x128xf32>
      %106 = vector.shape_cast %105 : vector<4x1x128xf32> to vector<4x128xf32>
      %107 = arith.truncf %106 : vector<4x128xf32> to vector<4x128xbf16>
      %c3_i32_67 = arith.constant 3 : i32
      %108 = arith.addi %0, %c3_i32_67 : i32
      %109 = arith.index_cast %108 : i32 to index
      %c0_68 = arith.constant 0 : index
      %c0_69 = arith.constant 0 : index
      %110 = vector.load %arg3[%109, %c0_68, %c0_69] : memref<128x128x128xbf16, #tpu.memory_space<vmem>>, vector<1x128x128xbf16>
      %111 = vector.shape_cast %110 : vector<1x128x128xbf16> to vector<128x128xbf16>
      %cst_70 = arith.constant dense<0.000000e+00> : vector<4x128xf32>
      %112 = tpu.matmul %107, %111, %cst_70 {dimension_numbers = #tpu.dot_dimension_numbers<[1], [0], [0], [1], [0, 0, 1, 1], [], []>} : vector<4x128xbf16>, vector<128x128xbf16>, vector<4x128xf32> -> vector<4x128xf32>
      %113 = arith.addf %104, %112 : vector<4x128xf32>
      %c0_71 = arith.constant 0 : index
      %c4_72 = arith.constant 4 : index
      %c128_73 = arith.constant 128 : index
      %114 = vector.load %arg2[%c0_71, %c4_72, %c128_73] : memref<4x8x256xf32, #tpu.memory_space<vmem>>, vector<4x1x128xf32>
      %115 = vector.shape_cast %114 : vector<4x1x128xf32> to vector<4x128xf32>
      %116 = arith.truncf %115 : vector<4x128xf32> to vector<4x128xbf16>
      %c4_i32_74 = arith.constant 4 : i32
      %117 = arith.addi %0, %c4_i32_74 : i32
      %118 = arith.index_cast %117 : i32 to index
      %c0_75 = arith.constant 0 : index
      %c0_76 = arith.constant 0 : index
      %119 = vector.load %arg3[%118, %c0_75, %c0_76] : memref<128x128x128xbf16, #tpu.memory_space<vmem>>, vector<1x128x128xbf16>
      %120 = vector.shape_cast %119 : vector<1x128x128xbf16> to vector<128x128xbf16>
      %cst_77 = arith.constant dense<0.000000e+00> : vector<4x128xf32>
      %121 = tpu.matmul %116, %120, %cst_77 {dimension_numbers = #tpu.dot_dimension_numbers<[1], [0], [0], [1], [0, 0, 1, 1], [], []>} : vector<4x128xbf16>, vector<128x128xbf16>, vector<4x128xf32> -> vector<4x128xf32>
      %122 = arith.addf %113, %121 : vector<4x128xf32>
      %c0_78 = arith.constant 0 : index
      %c5_79 = arith.constant 5 : index
      %c128_80 = arith.constant 128 : index
      %123 = vector.load %arg2[%c0_78, %c5_79, %c128_80] : memref<4x8x256xf32, #tpu.memory_space<vmem>>, vector<4x1x128xf32>
      %124 = vector.shape_cast %123 : vector<4x1x128xf32> to vector<4x128xf32>
      %125 = arith.truncf %124 : vector<4x128xf32> to vector<4x128xbf16>
      %c5_i32_81 = arith.constant 5 : i32
      %126 = arith.addi %0, %c5_i32_81 : i32
      %127 = arith.index_cast %126 : i32 to index
      %c0_82 = arith.constant 0 : index
      %c0_83 = arith.constant 0 : index
      %128 = vector.load %arg3[%127, %c0_82, %c0_83] : memref<128x128x128xbf16, #tpu.memory_space<vmem>>, vector<1x128x128xbf16>
      %129 = vector.shape_cast %128 : vector<1x128x128xbf16> to vector<128x128xbf16>
      %cst_84 = arith.constant dense<0.000000e+00> : vector<4x128xf32>
      %130 = tpu.matmul %125, %129, %cst_84 {dimension_numbers = #tpu.dot_dimension_numbers<[1], [0], [0], [1], [0, 0, 1, 1], [], []>} : vector<4x128xbf16>, vector<128x128xbf16>, vector<4x128xf32> -> vector<4x128xf32>
      %131 = arith.addf %122, %130 : vector<4x128xf32>
      %c0_85 = arith.constant 0 : index
      %c6_86 = arith.constant 6 : index
      %c128_87 = arith.constant 128 : index
      %132 = vector.load %arg2[%c0_85, %c6_86, %c128_87] : memref<4x8x256xf32, #tpu.memory_space<vmem>>, vector<4x1x128xf32>
      %133 = vector.shape_cast %132 : vector<4x1x128xf32> to vector<4x128xf32>
      %134 = arith.truncf %133 : vector<4x128xf32> to vector<4x128xbf16>
      %c6_i32_88 = arith.constant 6 : i32
      %135 = arith.addi %0, %c6_i32_88 : i32
      %136 = arith.index_cast %135 : i32 to index
      %c0_89 = arith.constant 0 : index
      %c0_90 = arith.constant 0 : index
      %137 = vector.load %arg3[%136, %c0_89, %c0_90] : memref<128x128x128xbf16, #tpu.memory_space<vmem>>, vector<1x128x128xbf16>
      %138 = vector.shape_cast %137 : vector<1x128x128xbf16> to vector<128x128xbf16>
      %cst_91 = arith.constant dense<0.000000e+00> : vector<4x128xf32>
      %139 = tpu.matmul %134, %138, %cst_91 {dimension_numbers = #tpu.dot_dimension_numbers<[1], [0], [0], [1], [0, 0, 1, 1], [], []>} : vector<4x128xbf16>, vector<128x128xbf16>, vector<4x128xf32> -> vector<4x128xf32>
      %140 = arith.addf %131, %139 : vector<4x128xf32>
      %c0_92 = arith.constant 0 : index
      %c7_93 = arith.constant 7 : index
      %c128_94 = arith.constant 128 : index
      %141 = vector.load %arg2[%c0_92, %c7_93, %c128_94] : memref<4x8x256xf32, #tpu.memory_space<vmem>>, vector<4x1x128xf32>
      %142 = vector.shape_cast %141 : vector<4x1x128xf32> to vector<4x128xf32>
      %143 = arith.truncf %142 : vector<4x128xf32> to vector<4x128xbf16>
      %c7_i32_95 = arith.constant 7 : i32
      %144 = arith.addi %0, %c7_i32_95 : i32
      %145 = arith.index_cast %144 : i32 to index
      %c0_96 = arith.constant 0 : index
      %c0_97 = arith.constant 0 : index
      %146 = vector.load %arg3[%145, %c0_96, %c0_97] : memref<128x128x128xbf16, #tpu.memory_space<vmem>>, vector<1x128x128xbf16>
      %147 = vector.shape_cast %146 : vector<1x128x128xbf16> to vector<128x128xbf16>
      %cst_98 = arith.constant dense<0.000000e+00> : vector<4x128xf32>
      %148 = tpu.matmul %143, %147, %cst_98 {dimension_numbers = #tpu.dot_dimension_numbers<[1], [0], [0], [1], [0, 0, 1, 1], [], []>} : vector<4x128xbf16>, vector<128x128xbf16>, vector<4x128xf32> -> vector<4x128xf32>
      %149 = arith.addf %140, %148 : vector<4x128xf32>
      %c1_99 = arith.constant 1 : index
      %c0_100 = arith.constant 0 : index
      %c0_101 = arith.constant 0 : index
      %150 = vector.load %arg4[%c1_99, %c0_100, %c0_101] : memref<2x4x128xf32, #tpu.memory_space<vmem>>, vector<1x4x128xf32>
      %151 = vector.shape_cast %150 : vector<1x4x128xf32> to vector<4x128xf32>
      %152 = vector.shape_cast %149 : vector<4x128xf32> to vector<1x4x128xf32>
      tpu.vector_store %arg4[%c1_99, %c0_100, %c0_101], %152 {strides = array<i32>} : memref<2x4x128xf32, #tpu.memory_space<vmem>>, vector<1x4x128xf32>,
    } else {
    }
    %c0_i32_1 = arith.constant 0 : i32
    %4 = arith.cmpi ne, %arg1, %c0_i32_1 : i32
    %5 = arith.extui %4 : i1 to i32
    %c0_i32_2 = arith.constant 0 : i32
    %6 = arith.cmpi ne, %5, %c0_i32_2 : i32
    scf.if %6 {
      %c0 = arith.constant 0 : index
      %c0_3 = arith.constant 0 : index
      %c0_4 = arith.constant 0 : index
      %7 = vector.load %arg4[%c0, %c0_3, %c0_4] : memref<2x4x128xf32, #tpu.memory_space<vmem>>, vector<1x4x128xf32>
      %8 = vector.shape_cast %7 : vector<1x4x128xf32> to vector<4x128xf32>
      %c0_5 = arith.constant 0 : index
      %c0_6 = arith.constant 0 : index
      %c0_7 = arith.constant 0 : index
      %9 = vector.load %arg2[%c0_5, %c0_6, %c0_7] : memref<4x8x256xf32, #tpu.memory_space<vmem>>, vector<4x1x128xf32>
      %10 = vector.shape_cast %9 : vector<4x1x128xf32> to vector<4x128xf32>
      %11 = arith.truncf %10 : vector<4x128xf32> to vector<4x128xbf16>
      %12 = arith.index_cast %0 : i32 to index
      %c0_8 = arith.constant 0 : index
      %c0_9 = arith.constant 0 : index
      %13 = vector.load %arg3[%12, %c0_8, %c0_9] : memref<128x128x128xbf16, #tpu.memory_space<vmem>>, vector<1x128x128xbf16>
      %14 = vector.shape_cast %13 : vector<1x128x128xbf16> to vector<128x128xbf16>
      %cst = arith.constant dense<0.000000e+00> : vector<4x128xf32>
      %15 = tpu.matmul %11, %14, %cst {dimension_numbers = #tpu.dot_dimension_numbers<[1], [0], [0], [1], [0, 0, 1, 1], [], []>} : vector<4x128xbf16>, vector<128x128xbf16>, vector<4x128xf32> -> vector<4x128xf32>
      %c0_10 = arith.constant 0 : index
      %c1 = arith.constant 1 : index
      %c0_11 = arith.constant 0 : index
      %16 = vector.load %arg2[%c0_10, %c1, %c0_11] : memref<4x8x256xf32, #tpu.memory_space<vmem>>, vector<4x1x128xf32>
      %17 = vector.shape_cast %16 : vector<4x1x128xf32> to vector<4x128xf32>
      %18 = arith.truncf %17 : vector<4x128xf32> to vector<4x128xbf16>
      %c1_i32 = arith.constant 1 : i32
      %19 = arith.addi %0, %c1_i32 : i32
      %20 = arith.index_cast %19 : i32 to index
      %c0_12 = arith.constant 0 : index
      %c0_13 = arith.constant 0 : index
      %21 = vector.load %arg3[%20, %c0_12, %c0_13] : memref<128x128x128xbf16, #tpu.memory_space<vmem>>, vector<1x128x128xbf16>
      %22 = vector.shape_cast %21 : vector<1x128x128xbf16> to vector<128x128xbf16>
      %cst_14 = arith.constant dense<0.000000e+00> : vector<4x128xf32>
      %23 = tpu.matmul %18, %22, %cst_14 {dimension_numbers = #tpu.dot_dimension_numbers<[1], [0], [0], [1], [0, 0, 1, 1], [], []>} : vector<4x128xbf16>, vector<128x128xbf16>, vector<4x128xf32> -> vector<4x128xf32>
      %24 = arith.addf %15, %23 : vector<4x128xf32>
      %c0_15 = arith.constant 0 : index
      %c2 = arith.constant 2 : index
      %c0_16 = arith.constant 0 : index
      %25 = vector.load %arg2[%c0_15, %c2, %c0_16] : memref<4x8x256xf32, #tpu.memory_space<vmem>>, vector<4x1x128xf32>
      %26 = vector.shape_cast %25 : vector<4x1x128xf32> to vector<4x128xf32>
      %27 = arith.truncf %26 : vector<4x128xf32> to vector<4x128xbf16>
      %c2_i32 = arith.constant 2 : i32
      %28 = arith.addi %0, %c2_i32 : i32
      %29 = arith.index_cast %28 : i32 to index
      %c0_17 = arith.constant 0 : index
      %c0_18 = arith.constant 0 : index
      %30 = vector.load %arg3[%29, %c0_17, %c0_18] : memref<128x128x128xbf16, #tpu.memory_space<vmem>>, vector<1x128x128xbf16>
      %31 = vector.shape_cast %30 : vector<1x128x128xbf16> to vector<128x128xbf16>
      %cst_19 = arith.constant dense<0.000000e+00> : vector<4x128xf32>
      %32 = tpu.matmul %27, %31, %cst_19 {dimension_numbers = #tpu.dot_dimension_numbers<[1], [0], [0], [1], [0, 0, 1, 1], [], []>} : vector<4x128xbf16>, vector<128x128xbf16>, vector<4x128xf32> -> vector<4x128xf32>
      %33 = arith.addf %24, %32 : vector<4x128xf32>
      %c0_20 = arith.constant 0 : index
      %c3 = arith.constant 3 : index
      %c0_21 = arith.constant 0 : index
      %34 = vector.load %arg2[%c0_20, %c3, %c0_21] : memref<4x8x256xf32, #tpu.memory_space<vmem>>, vector<4x1x128xf32>
      %35 = vector.shape_cast %34 : vector<4x1x128xf32> to vector<4x128xf32>
      %36 = arith.truncf %35 : vector<4x128xf32> to vector<4x128xbf16>
      %c3_i32 = arith.constant 3 : i32
      %37 = arith.addi %0, %c3_i32 : i32
      %38 = arith.index_cast %37 : i32 to index
      %c0_22 = arith.constant 0 : index
      %c0_23 = arith.constant 0 : index
      %39 = vector.load %arg3[%38, %c0_22, %c0_23] : memref<128x128x128xbf16, #tpu.memory_space<vmem>>, vector<1x128x128xbf16>
      %40 = vector.shape_cast %39 : vector<1x128x128xbf16> to vector<128x128xbf16>
      %cst_24 = arith.constant dense<0.000000e+00> : vector<4x128xf32>
      %41 = tpu.matmul %36, %40, %cst_24 {dimension_numbers = #tpu.dot_dimension_numbers<[1], [0], [0], [1], [0, 0, 1, 1], [], []>} : vector<4x128xbf16>, vector<128x128xbf16>, vector<4x128xf32> -> vector<4x128xf32>
      %42 = arith.addf %33, %41 : vector<4x128xf32>
      %c0_25 = arith.constant 0 : index
      %c4 = arith.constant 4 : index
      %c0_26 = arith.constant 0 : index
      %43 = vector.load %arg2[%c0_25, %c4, %c0_26] : memref<4x8x256xf32, #tpu.memory_space<vmem>>, vector<4x1x128xf32>
      %44 = vector.shape_cast %43 : vector<4x1x128xf32> to vector<4x128xf32>
      %45 = arith.truncf %44 : vector<4x128xf32> to vector<4x128xbf16>
      %c4_i32 = arith.constant 4 : i32
      %46 = arith.addi %0, %c4_i32 : i32
      %47 = arith.index_cast %46 : i32 to index
      %c0_27 = arith.constant 0 : index
      %c0_28 = arith.constant 0 : index
      %48 = vector.load %arg3[%47, %c0_27, %c0_28] : memref<128x128x128xbf16, #tpu.memory_space<vmem>>, vector<1x128x128xbf16>
      %49 = vector.shape_cast %48 : vector<1x128x128xbf16> to vector<128x128xbf16>
      %cst_29 = arith.constant dense<0.000000e+00> : vector<4x128xf32>
      %50 = tpu.matmul %45, %49, %cst_29 {dimension_numbers = #tpu.dot_dimension_numbers<[1], [0], [0], [1], [0, 0, 1, 1], [], []>} : vector<4x128xbf16>, vector<128x128xbf16>, vector<4x128xf32> -> vector<4x128xf32>
      %51 = arith.addf %42, %50 : vector<4x128xf32>
      %c0_30 = arith.constant 0 : index
      %c5 = arith.constant 5 : index
      %c0_31 = arith.constant 0 : index
      %52 = vector.load %arg2[%c0_30, %c5, %c0_31] : memref<4x8x256xf32, #tpu.memory_space<vmem>>, vector<4x1x128xf32>
      %53 = vector.shape_cast %52 : vector<4x1x128xf32> to vector<4x128xf32>
      %54 = arith.truncf %53 : vector<4x128xf32> to vector<4x128xbf16>
      %c5_i32 = arith.constant 5 : i32
      %55 = arith.addi %0, %c5_i32 : i32
      %56 = arith.index_cast %55 : i32 to index
      %c0_32 = arith.constant 0 : index
      %c0_33 = arith.constant 0 : index
      %57 = vector.load %arg3[%56, %c0_32, %c0_33] : memref<128x128x128xbf16, #tpu.memory_space<vmem>>, vector<1x128x128xbf16>
      %58 = vector.shape_cast %57 : vector<1x128x128xbf16> to vector<128x128xbf16>
      %cst_34 = arith.constant dense<0.000000e+00> : vector<4x128xf32>
      %59 = tpu.matmul %54, %58, %cst_34 {dimension_numbers = #tpu.dot_dimension_numbers<[1], [0], [0], [1], [0, 0, 1, 1], [], []>} : vector<4x128xbf16>, vector<128x128xbf16>, vector<4x128xf32> -> vector<4x128xf32>
      %60 = arith.addf %51, %59 : vector<4x128xf32>
      %c0_35 = arith.constant 0 : index
      %c6 = arith.constant 6 : index
      %c0_36 = arith.constant 0 : index
      %61 = vector.load %arg2[%c0_35, %c6, %c0_36] : memref<4x8x256xf32, #tpu.memory_space<vmem>>, vector<4x1x128xf32>
      %62 = vector.shape_cast %61 : vector<4x1x128xf32> to vector<4x128xf32>
      %63 = arith.truncf %62 : vector<4x128xf32> to vector<4x128xbf16>
      %c6_i32 = arith.constant 6 : i32
      %64 = arith.addi %0, %c6_i32 : i32
      %65 = arith.index_cast %64 : i32 to index
      %c0_37 = arith.constant 0 : index
      %c0_38 = arith.constant 0 : index
      %66 = vector.load %arg3[%65, %c0_37, %c0_38] : memref<128x128x128xbf16, #tpu.memory_space<vmem>>, vector<1x128x128xbf16>
      %67 = vector.shape_cast %66 : vector<1x128x128xbf16> to vector<128x128xbf16>
      %cst_39 = arith.constant dense<0.000000e+00> : vector<4x128xf32>
      %68 = tpu.matmul %63, %67, %cst_39 {dimension_numbers = #tpu.dot_dimension_numbers<[1], [0], [0], [1], [0, 0, 1, 1], [], []>} : vector<4x128xbf16>, vector<128x128xbf16>, vector<4x128xf32> -> vector<4x128xf32>
      %69 = arith.addf %60, %68 : vector<4x128xf32>
      %c0_40 = arith.constant 0 : index
      %c7 = arith.constant 7 : index
      %c0_41 = arith.constant 0 : index
      %70 = vector.load %arg2[%c0_40, %c7, %c0_41] : memref<4x8x256xf32, #tpu.memory_space<vmem>>, vector<4x1x128xf32>
      %71 = vector.shape_cast %70 : vector<4x1x128xf32> to vector<4x128xf32>
      %72 = arith.truncf %71 : vector<4x128xf32> to vector<4x128xbf16>
      %c7_i32 = arith.constant 7 : i32
      %73 = arith.addi %0, %c7_i32 : i32
      %74 = arith.index_cast %73 : i32 to index
      %c0_42 = arith.constant 0 : index
      %c0_43 = arith.constant 0 : index
      %75 = vector.load %arg3[%74, %c0_42, %c0_43] : memref<128x128x128xbf16, #tpu.memory_space<vmem>>, vector<1x128x128xbf16>
      %76 = vector.shape_cast %75 : vector<1x128x128xbf16> to vector<128x128xbf16>
      %cst_44 = arith.constant dense<0.000000e+00> : vector<4x128xf32>
      %77 = tpu.matmul %72, %76, %cst_44 {dimension_numbers = #tpu.dot_dimension_numbers<[1], [0], [0], [1], [0, 0, 1, 1], [], []>} : vector<4x128xbf16>, vector<128x128xbf16>, vector<4x128xf32> -> vector<4x128xf32>
      %78 = arith.addf %69, %77 : vector<4x128xf32>
      %79 = arith.addf %8, %78 : vector<4x128xf32>
      %c0_45 = arith.constant 0 : index
      %c0_46 = arith.constant 0 : index
      %c0_47 = arith.constant 0 : index
      %80 = vector.load %arg4[%c0_45, %c0_46, %c0_47] : memref<2x4x128xf32, #tpu.memory_space<vmem>>, vector<1x4x128xf32>
      %81 = vector.shape_cast %80 : vector<1x4x128xf32> to vector<4x128xf32>
      %82 = vector.shape_cast %79 : vector<4x128xf32> to vector<1x4x128xf32>
      tpu.vector_store %arg4[%c0_45, %c0_46, %c0_47], %82 {strides = array<i32>} : memref<2x4x128xf32, #tpu.memory_space<vmem>>, vector<1x4x128xf32>,
      %c1_48 = arith.constant 1 : index
      %c0_49 = arith.constant 0 : index
      %c0_50 = arith.constant 0 : index
      %83 = vector.load %arg4[%c1_48, %c0_49, %c0_50] : memref<2x4x128xf32, #tpu.memory_space<vmem>>, vector<1x4x128xf32>
      %84 = vector.shape_cast %83 : vector<1x4x128xf32> to vector<4x128xf32>
      %c0_51 = arith.constant 0 : index
      %c0_52 = arith.constant 0 : index
      %c128 = arith.constant 128 : index
      %85 = vector.load %arg2[%c0_51, %c0_52, %c128] : memref<4x8x256xf32, #tpu.memory_space<vmem>>, vector<4x1x128xf32>
      %86 = vector.shape_cast %85 : vector<4x1x128xf32> to vector<4x128xf32>
      %87 = arith.truncf %86 : vector<4x128xf32> to vector<4x128xbf16>
      %88 = arith.index_cast %0 : i32 to index
      %c0_53 = arith.constant 0 : index
      %c0_54 = arith.constant 0 : index
      %89 = vector.load %arg3[%88, %c0_53, %c0_54] : memref<128x128x128xbf16, #tpu.memory_space<vmem>>, vector<1x128x128xbf16>
      %90 = vector.shape_cast %89 : vector<1x128x128xbf16> to vector<128x128xbf16>
      %cst_55 = arith.constant dense<0.000000e+00> : vector<4x128xf32>
      %91 = tpu.matmul %87, %90, %cst_55 {dimension_numbers = #tpu.dot_dimension_numbers<[1], [0], [0], [1], [0, 0, 1, 1], [], []>} : vector<4x128xbf16>, vector<128x128xbf16>, vector<4x128xf32> -> vector<4x128xf32>
      %c0_56 = arith.constant 0 : index
      %c1_57 = arith.constant 1 : index
      %c128_58 = arith.constant 128 : index
      %92 = vector.load %arg2[%c0_56, %c1_57, %c128_58] : memref<4x8x256xf32, #tpu.memory_space<vmem>>, vector<4x1x128xf32>
      %93 = vector.shape_cast %92 : vector<4x1x128xf32> to vector<4x128xf32>
      %94 = arith.truncf %93 : vector<4x128xf32> to vector<4x128xbf16>
      %c1_i32_59 = arith.constant 1 : i32
      %95 = arith.addi %0, %c1_i32_59 : i32
      %96 = arith.index_cast %95 : i32 to index
      %c0_60 = arith.constant 0 : index
      %c0_61 = arith.constant 0 : index
      %97 = vector.load %arg3[%96, %c0_60, %c0_61] : memref<128x128x128xbf16, #tpu.memory_space<vmem>>, vector<1x128x128xbf16>
      %98 = vector.shape_cast %97 : vector<1x128x128xbf16> to vector<128x128xbf16>
      %cst_62 = arith.constant dense<0.000000e+00> : vector<4x128xf32>
      %99 = tpu.matmul %94, %98, %cst_62 {dimension_numbers = #tpu.dot_dimension_numbers<[1], [0], [0], [1], [0, 0, 1, 1], [], []>} : vector<4x128xbf16>, vector<128x128xbf16>, vector<4x128xf32> -> vector<4x128xf32>
      %100 = arith.addf %91, %99 : vector<4x128xf32>
      %c0_63 = arith.constant 0 : index
      %c2_64 = arith.constant 2 : index
      %c128_65 = arith.constant 128 : index
      %101 = vector.load %arg2[%c0_63, %c2_64, %c128_65] : memref<4x8x256xf32, #tpu.memory_space<vmem>>, vector<4x1x128xf32>
      %102 = vector.shape_cast %101 : vector<4x1x128xf32> to vector<4x128xf32>
      %103 = arith.truncf %102 : vector<4x128xf32> to vector<4x128xbf16>
      %c2_i32_66 = arith.constant 2 : i32
      %104 = arith.addi %0, %c2_i32_66 : i32
      %105 = arith.index_cast %104 : i32 to index
      %c0_67 = arith.constant 0 : index
      %c0_68 = arith.constant 0 : index
      %106 = vector.load %arg3[%105, %c0_67, %c0_68] : memref<128x128x128xbf16, #tpu.memory_space<vmem>>, vector<1x128x128xbf16>
      %107 = vector.shape_cast %106 : vector<1x128x128xbf16> to vector<128x128xbf16>
      %cst_69 = arith.constant dense<0.000000e+00> : vector<4x128xf32>
      %108 = tpu.matmul %103, %107, %cst_69 {dimension_numbers = #tpu.dot_dimension_numbers<[1], [0], [0], [1], [0, 0, 1, 1], [], []>} : vector<4x128xbf16>, vector<128x128xbf16>, vector<4x128xf32> -> vector<4x128xf32>
      %109 = arith.addf %100, %108 : vector<4x128xf32>
      %c0_70 = arith.constant 0 : index
      %c3_71 = arith.constant 3 : index
      %c128_72 = arith.constant 128 : index
      %110 = vector.load %arg2[%c0_70, %c3_71, %c128_72] : memref<4x8x256xf32, #tpu.memory_space<vmem>>, vector<4x1x128xf32>
      %111 = vector.shape_cast %110 : vector<4x1x128xf32> to vector<4x128xf32>
      %112 = arith.truncf %111 : vector<4x128xf32> to vector<4x128xbf16>
      %c3_i32_73 = arith.constant 3 : i32
      %113 = arith.addi %0, %c3_i32_73 : i32
      %114 = arith.index_cast %113 : i32 to index
      %c0_74 = arith.constant 0 : index
      %c0_75 = arith.constant 0 : index
      %115 = vector.load %arg3[%114, %c0_74, %c0_75] : memref<128x128x128xbf16, #tpu.memory_space<vmem>>, vector<1x128x128xbf16>
      %116 = vector.shape_cast %115 : vector<1x128x128xbf16> to vector<128x128xbf16>
      %cst_76 = arith.constant dense<0.000000e+00> : vector<4x128xf32>
      %117 = tpu.matmul %112, %116, %cst_76 {dimension_numbers = #tpu.dot_dimension_numbers<[1], [0], [0], [1], [0, 0, 1, 1], [], []>} : vector<4x128xbf16>, vector<128x128xbf16>, vector<4x128xf32> -> vector<4x128xf32>
      %118 = arith.addf %109, %117 : vector<4x128xf32>
      %c0_77 = arith.constant 0 : index
      %c4_78 = arith.constant 4 : index
      %c128_79 = arith.constant 128 : index
      %119 = vector.load %arg2[%c0_77, %c4_78, %c128_79] : memref<4x8x256xf32, #tpu.memory_space<vmem>>, vector<4x1x128xf32>
      %120 = vector.shape_cast %119 : vector<4x1x128xf32> to vector<4x128xf32>
      %121 = arith.truncf %120 : vector<4x128xf32> to vector<4x128xbf16>
      %c4_i32_80 = arith.constant 4 : i32
      %122 = arith.addi %0, %c4_i32_80 : i32
      %123 = arith.index_cast %122 : i32 to index
      %c0_81 = arith.constant 0 : index
      %c0_82 = arith.constant 0 : index
      %124 = vector.load %arg3[%123, %c0_81, %c0_82] : memref<128x128x128xbf16, #tpu.memory_space<vmem>>, vector<1x128x128xbf16>
      %125 = vector.shape_cast %124 : vector<1x128x128xbf16> to vector<128x128xbf16>
      %cst_83 = arith.constant dense<0.000000e+00> : vector<4x128xf32>
      %126 = tpu.matmul %121, %125, %cst_83 {dimension_numbers = #tpu.dot_dimension_numbers<[1], [0], [0], [1], [0, 0, 1, 1], [], []>} : vector<4x128xbf16>, vector<128x128xbf16>, vector<4x128xf32> -> vector<4x128xf32>
      %127 = arith.addf %118, %126 : vector<4x128xf32>
      %c0_84 = arith.constant 0 : index
      %c5_85 = arith.constant 5 : index
      %c128_86 = arith.constant 128 : index
      %128 = vector.load %arg2[%c0_84, %c5_85, %c128_86] : memref<4x8x256xf32, #tpu.memory_space<vmem>>, vector<4x1x128xf32>
      %129 = vector.shape_cast %128 : vector<4x1x128xf32> to vector<4x128xf32>
      %130 = arith.truncf %129 : vector<4x128xf32> to vector<4x128xbf16>
      %c5_i32_87 = arith.constant 5 : i32
      %131 = arith.addi %0, %c5_i32_87 : i32
      %132 = arith.index_cast %131 : i32 to index
      %c0_88 = arith.constant 0 : index
      %c0_89 = arith.constant 0 : index
      %133 = vector.load %arg3[%132, %c0_88, %c0_89] : memref<128x128x128xbf16, #tpu.memory_space<vmem>>, vector<1x128x128xbf16>
      %134 = vector.shape_cast %133 : vector<1x128x128xbf16> to vector<128x128xbf16>
      %cst_90 = arith.constant dense<0.000000e+00> : vector<4x128xf32>
      %135 = tpu.matmul %130, %134, %cst_90 {dimension_numbers = #tpu.dot_dimension_numbers<[1], [0], [0], [1], [0, 0, 1, 1], [], []>} : vector<4x128xbf16>, vector<128x128xbf16>, vector<4x128xf32> -> vector<4x128xf32>
      %136 = arith.addf %127, %135 : vector<4x128xf32>
      %c0_91 = arith.constant 0 : index
      %c6_92 = arith.constant 6 : index
      %c128_93 = arith.constant 128 : index
      %137 = vector.load %arg2[%c0_91, %c6_92, %c128_93] : memref<4x8x256xf32, #tpu.memory_space<vmem>>, vector<4x1x128xf32>
      %138 = vector.shape_cast %137 : vector<4x1x128xf32> to vector<4x128xf32>
      %139 = arith.truncf %138 : vector<4x128xf32> to vector<4x128xbf16>
      %c6_i32_94 = arith.constant 6 : i32
      %140 = arith.addi %0, %c6_i32_94 : i32
      %141 = arith.index_cast %140 : i32 to index
      %c0_95 = arith.constant 0 : index
      %c0_96 = arith.constant 0 : index
      %142 = vector.load %arg3[%141, %c0_95, %c0_96] : memref<128x128x128xbf16, #tpu.memory_space<vmem>>, vector<1x128x128xbf16>
      %143 = vector.shape_cast %142 : vector<1x128x128xbf16> to vector<128x128xbf16>
      %cst_97 = arith.constant dense<0.000000e+00> : vector<4x128xf32>
      %144 = tpu.matmul %139, %143, %cst_97 {dimension_numbers = #tpu.dot_dimension_numbers<[1], [0], [0], [1], [0, 0, 1, 1], [], []>} : vector<4x128xbf16>, vector<128x128xbf16>, vector<4x128xf32> -> vector<4x128xf32>
      %145 = arith.addf %136, %144 : vector<4x128xf32>
      %c0_98 = arith.constant 0 : index
      %c7_99 = arith.constant 7 : index
      %c128_100 = arith.constant 128 : index
      %146 = vector.load %arg2[%c0_98, %c7_99, %c128_100] : memref<4x8x256xf32, #tpu.memory_space<vmem>>, vector<4x1x128xf32>
      %147 = vector.shape_cast %146 : vector<4x1x128xf32> to vector<4x128xf32>
      %148 = arith.truncf %147 : vector<4x128xf32> to vector<4x128xbf16>
      %c7_i32_101 = arith.constant 7 : i32
      %149 = arith.addi %0, %c7_i32_101 : i32
      %150 = arith.index_cast %149 : i32 to index
      %c0_102 = arith.constant 0 : index
      %c0_103 = arith.constant 0 : index
      %151 = vector.load %arg3[%150, %c0_102, %c0_103] : memref<128x128x128xbf16, #tpu.memory_space<vmem>>, vector<1x128x128xbf16>
      %152 = vector.shape_cast %151 : vector<1x128x128xbf16> to vector<128x128xbf16>
      %cst_104 = arith.constant dense<0.000000e+00> : vector<4x128xf32>
      %153 = tpu.matmul %148, %152, %cst_104 {dimension_numbers = #tpu.dot_dimension_numbers<[1], [0], [0], [1], [0, 0, 1, 1], [], []>} : vector<4x128xbf16>, vector<128x128xbf16>, vector<4x128xf32> -> vector<4x128xf32>
      %154 = arith.addf %145, %153 : vector<4x128xf32>
      %155 = arith.addf %84, %154 : vector<4x128xf32>
      %c1_105 = arith.constant 1 : index
      %c0_106 = arith.constant 0 : index
      %c0_107 = arith.constant 0 : index
      %156 = vector.load %arg4[%c1_105, %c0_106, %c0_107] : memref<2x4x128xf32, #tpu.memory_space<vmem>>, vector<1x4x128xf32>
      %157 = vector.shape_cast %156 : vector<1x4x128xf32> to vector<4x128xf32>
      %158 = vector.shape_cast %155 : vector<4x128xf32> to vector<1x4x128xf32>
      tpu.vector_store %arg4[%c1_105, %c0_106, %c0_107], %158 {strides = array<i32>} : memref<2x4x128xf32, #tpu.memory_space<vmem>>, vector<1x4x128xf32>,
    } else {
    }
    return
  }
  func.func @transform_0(%arg0: i32, %arg1: i32) -> (i32, i32, i32) {
    %c0_i32 = arith.constant 0 : i32
    %c0_i32_0 = arith.constant 0 : i32
    return %arg0, %arg1, %c0_i32 : i32, i32, i32
  }
  func.func @transform_1(%arg0: i32, %arg1: i32) -> (i32, i32, i32) {
    %c0_i32 = arith.constant 0 : i32
    %c0_i32_0 = arith.constant 0 : i32
    %c0_i32_1 = arith.constant 0 : i32
    %c0_i32_2 = arith.constant 0 : i32
    return %c0_i32, %c0_i32_0, %c0_i32_1 : i32, i32, i32
  }
  func.func @transform_2(%arg0: i32, %arg1: i32) -> (i32, i32, i32) {
    %c0_i32 = arith.constant 0 : i32
    %c0_i32_0 = arith.constant 0 : i32
    %c0_i32_1 = arith.constant 0 : i32
    return %c0_i32, %arg0, %c0_i32_0 : i32, i32, i32
  }
}

</mosaic_0001>

<bundles_post_ra>
// kernel: dct128x128.1
= control target key start
LH: loop header
LB: loop body
LE: loop exit
PB: predicated region body
PF: predicated region fallthrough
CT: control target
= control target key end

     0   :  { %s6549_s9 = smov 0   ;;  %s6551_s10 = smov 0   ;;  %s7444_s0 = inlined_call_operand.vmem [shape: f32[4,128,256], index: 0, kind: input, shape index: {}]   ;;  %s7445_s1 = inlined_call_operand.vmem [shape: bf16[128,128,128], index: 1, kind: input, shape index: {}]   ;;  %s7446_s2 = inlined_call_operand.vmem [shape: f32[2,4,128], index: 2, kind: output, shape index: {}]  }
   0x1   :  { %s6553_s11 = smov 0   ;;  %s6555_s12 = smov 0  }
   0x2   :  { %s6557_s13 = smov 0  }
   0x3 LB: > { %s21_s14 = sadd.s32 1, %s6524_s12  ;;  %p40_p1 = scmp.ne.s32.totalorder %s6516_s10, %s6512_s9  ;;  %s6528_s13 = sphi %s6557_s13, %s12_s13   ;;  %s6524_s12 = sphi %s6555_s12, %s7450_s12   ;;  %s6520_s11 = sphi %s6553_s11, %s7449_s11   ;;  %s6516_s10 = sphi %s6551_s10, %s7448_s10   ;;  %s6512_s9 = sphi %s6549_s9, %s7447_s9  }
   0x4   : > { %p22_p0 = scmp.ge.s32.totalorder %s21_s14, 16  ;;  %p41_p2 = scmp.eq.s32.totalorder %s6528_s13, 0 }
   0x5   : > { %s33_s16 = sadd.s32 1, %s6516_s10  ;;  %p4436_p5 = scmp.ge.s32.totalorder %s6528_s13, 16 }
   0x6   : > { %s7452_s14 = smov (%p22_p0, %s21_s14), 0  ;;  %p42_p3 = por %p41_p2, %p40_p1 }
   0x7   : > { %s29_s15 = ssub.s32 %s6524_s12, %s7452_s14  ;;  %116 = sbr.rel (%p4436_p5) target bundleno = 22 (0x16), region = 20 }
   0x8   : > { %p31_p4 = scmp.eq.s32.totalorder %s29_s15, 0 }
   0xa   : > { %s6584_s17 = scalar_select %p31_p4, %s6516_s10, %s33_s16  }
   0xe   : > { %119 = sbr.rel (!%p42_p3) target bundleno = 22 (0x16), region = 24  ;;  %s121_s18 = sand.u32 (%p42_p3), 1, %s6516_s10  }
   0xf   : > { %s5187_s19 = sshll.u32 (%p42_p3), %s6524_s12, 4  ;;  %s4437_s20 = sshll.u32 (%p42_p3), %s121_s18, 6 }
  0x10   : > { %s129_s23 = scalar_lea.vmem (%p42_p3), %s7444_s0, %s5187_s19  ;;  %s123_s24 = scalar_lea.vmem (%p42_p3), [#allocation2], %s4437_s20 }
  0x11   : > { %v142_v0 = vld [vmem:[%s129_s23] sm:$0xff] (%p42_p3)  ;;  %v144_v1 = vld [vmem:[%s129_s23 + $0x8] sm:$0xff] (%p42_p3) }
  0x12   : > { %v146_v2 = vld [vmem:[%s129_s23 + $0x100] sm:$0xff] (%p42_p3)  ;;  %143 = vst [vmem:[%s123_s24] sm:$0xff] (%p42_p3), %v142_v0  ;;  %145 = vst [vmem:[%s123_s24 + $0x8] sm:$0xff] (%p42_p3), %v144_v1  ;;  %v148_v3 = vld [vmem:[%s129_s23 + $0x108] sm:$0xff] (%p42_p3) }
  0x13   : > { %147 = vst [vmem:[%s123_s24 + $0x10] sm:$0xff] (%p42_p3), %v146_v2  ;;  %v150_v4 = vld [vmem:[%s129_s23 + $0x200] sm:$0xff] (%p42_p3)  ;;  %v152_v5 = vld [vmem:[%s129_s23 + $0x208] sm:$0xff] (%p42_p3)  ;;  %149 = vst [vmem:[%s123_s24 + $0x18] sm:$0xff] (%p42_p3), %v148_v3 }
  0x14   : > { %151 = vst [vmem:[%s123_s24 + $0x20] sm:$0xff] (%p42_p3), %v150_v4  ;;  %153 = vst [vmem:[%s123_s24 + $0x28] sm:$0xff] (%p42_p3), %v152_v5  ;;  %v154_v6 = vld [vmem:[%s129_s23 + $0x300] sm:$0xff] (%p42_p3)  ;;  %v156_v7 = vld [vmem:[%s129_s23 + $0x308] sm:$0xff] (%p42_p3) }
  0x15   : > { %155 = vst [vmem:[%s123_s24 + $0x30] sm:$0xff] %v154_v6  ;;  %157 = vst [vmem:[%s123_s24 + $0x38] sm:$0xff] %v156_v7 }
  0x16 PF: > { %p4440_p6 = scmp.ge.s32.totalorder %s6528_s13, 1  ;;  %p162_p7 = scmp.lt.s32.totalorder %s6528_s13, 17 }
  0x18   : > { %p163_p8 = pnand %p4440_p6, %p162_p7 }
  0x19   : > { %s169_s25 = sand.u32 (!%p163_p8), 1, %s6512_s9   ;;  %p4443_p9 = scmp.ne.s32.totalorder (!%p163_p8), %s6520_s11, 0 }
  0x1a   : > { %166 = sbr.rel (%p163_p8) target bundleno = 985 (0x3d9), region = 47  ;;  %s4441_s26 = sshll.u32 (!%p163_p8), %s169_s25, 6 }
  0x1b   : > { %s6595_s27 = scalar_lea.vmem (!%p163_p8), [#allocation2], %s4441_s26 }
  0x21   : > { %199 = sbr.rel (%p4443_p9) target bundleno = 507 (0x1fb), region = 55  ;;  %s5189_s28 = sshll.u32 (!%p4443_p9), %s6520_s11, 9  ;;  %v6530_v8 = vmov (!%p4443_p9), 0.0   ;;  %vm6531_vm0 = vmmov (!%p4443_p9), 0   ;;  %v227_v15 = vld [vmem:[%s6595_s27 + $0x1] ss:$0 sm:$0xff] (!%p4443_p9) }
  0x22   : > { %5494 = vmatprep.subr.bf16.mxu0 (!%p4443_p9), %v6530_v8  ;;  %5654 = vmatprep.subr.bf16.mxu1 (!%p4443_p9), %v6530_v8  ;;  %s6604_s3 = scalar_lea.vmem (!%p4443_p9), %s7445_s1, %s5189_s28  ;;  %v228_v16 = vld [vmem:[%s6595_s27 + $0x11] ss:$0 sm:$0xff] (!%p4443_p9)  ;;  %v229_v19 = vld [vmem:[%s6595_s27 + $0x21] ss:$0 sm:$0xff] (!%p4443_p9)  ;;  %v231_v20 = vpack.c.bf16 (!%p4443_p9), %v227_v15, %v227_v15  ;;  %vm263_vm1 = vcmask (!%p4443_p9), 1041409   ;;  %vm265_vm2 = vcmask (!%p4443_p9), 1042434  }
  0x23   : > { %v6234_v9 = vld [vmem:[%s6604_s3 + $0x40] sm:$0xff] (!%p4443_p9)   ;;  %5510 = vmatprep.mubr.msk.bf16.mxu0 (!%p4443_p9), %vm6531_vm0, %v6530_v8  ;;  %5670 = vmatprep.mubr.msk.bf16.mxu1 (!%p4443_p9), %vm6531_vm0, %v6530_v8  ;;  %v6236_v11 = vld [vmem:[%s6604_s3 + $0x48] sm:$0xff] (!%p4443_p9)   ;;  %v6238_v13 = vld [vmem:[%s6604_s3 + $0x50] sm:$0xff] (!%p4443_p9)   ;;  %v232_v21 = vpack.c.bf16 (!%p4443_p9), %v228_v16, %v228_v16  ;;  %v233_v25 = vpack.c.bf16 (!%p4443_p9), %v229_v19, %v229_v19  ;;  %vm267_vm3 = vcmask (!%p4443_p9), 1043459  }
  0x24   : > { %v6235_v10 = vld [vmem:[%s6604_s3 + $0x40] sm:$0xff] (!%p4443_p9)   ;;  %5495 = vmatpush3.bf16.msra.mxu0 (!%p4443_p9), %v6234_v9  ;;  %v6237_v12 = vld [vmem:[%s6604_s3 + $0x48] sm:$0xff] (!%p4443_p9)   ;;  %v6239_v14 = vld [vmem:[%s6604_s3 + $0x50] sm:$0xff] (!%p4443_p9)   ;;  %v259_v27 = vunpack.c.l.b16 (!%p4443_p9), %v231_v20 }
  0x25   : > { %5655 = vmatpush3.bf16.msra.mxu1 (!%p4443_p9), %v6235_v10  ;;  %5496 = vmatprep.subr.bf16.mxu0 (!%p4443_p9), %v6530_v8  ;;  %v6240_v17 = vld [vmem:[%s6604_s3 + $0x58] sm:$0xff] (!%p4443_p9)   ;;  %v230_v22 = vld [vmem:[%s6595_s27 + $0x31] ss:$0 sm:$0xff] (!%p4443_p9)  ;;  %v6242_v23 = vld [vmem:[%s6604_s3 + $0x60] sm:$0xff] (!%p4443_p9)   ;;  %v260_v28 = vunpack.c.l.b16 (!%p4443_p9), %v232_v21  ;;  %v261_v38 = vunpack.c.l.b16 (!%p4443_p9), %v233_v25 }
  0x26   : > { %5656 = vmatprep.subr.bf16.mxu1 (!%p4443_p9), %v6530_v8  ;;  %v6241_v18 = vld [vmem:[%s6604_s3 + $0x58] sm:$0xff] (!%p4443_p9)   ;;  %v6243_v24 = vld [vmem:[%s6604_s3 + $0x60] sm:$0xff] (!%p4443_p9)   ;;  %v6244_v26 = vld [vmem:[%s6604_s3 + $0x68] sm:$0xff] (!%p4443_p9)   ;;  %v234_v32 = vpack.c.bf16 (!%p4443_p9), %v230_v22, %v230_v22 }
  0x27   : > { %v1265_v29 = vld [vmem:[%s6595_s27 + $0x9] ss:$0 sm:$0xff] (!%p4443_p9)  ;;  %v1266_v30 = vld [vmem:[%s6595_s27 + $0x19] ss:$0 sm:$0xff] (!%p4443_p9)  ;;  %v264_v40 = vsel (!%p4443_p9), %vm263_vm1, %v260_v28, %v259_v27  ;;  %v6246_v44 = vld [vmem:[%s6604_s3 + $0x70] sm:$0xff] (!%p4443_p9)  }
  0x28   : > { %5497 = vmatpush3.bf16.msra.mxu0 %v6236_v11  ;;  %v1267_v31 = vld [vmem:[%s6595_s27 + $0x29] ss:$0 sm:$0xff]  ;;  %v1268_v33 = vld [vmem:[%s6595_s27 + $0x39] ss:$0 sm:$0xff]  ;;  %v1269_v34 = vpack.c.bf16 %v1265_v29, %v1265_v29  ;;  %v1270_v35 = vpack.c.bf16 %v1266_v30, %v1266_v30  ;;  %v262_v45 = vunpack.c.l.b16 %v234_v32  ;;  %v6247_v47 = vld [vmem:[%s6604_s3 + $0x70] sm:$0xff]   ;;  %v266_v48 = vsel %vm265_vm2, %v261_v38, %v264_v40 }
  0x29   : > { %5657 = vmatpush3.bf16.msra.mxu1 %v6237_v12  ;;  %5498 = vmatprep.subr.bf16.mxu0 %v6530_v8  ;;  %v1271_v36 = vpack.c.bf16 %v1267_v31, %v1267_v31  ;;  %v6245_v37 = vld [vmem:[%s6604_s3 + $0x68] sm:$0xff]   ;;  %v1272_v39 = vpack.c.bf16 %v1268_v33, %v1268_v33  ;;  %v6248_v51 = vld [vmem:[%s6604_s3 + $0x78] sm:$0xff]   ;;  %v6250_v56 = vld [vmem:[%s6604_s3] sm:$0xff]  }
  0x2a   : > { %5658 = vmatprep.subr.bf16.mxu1 %v6530_v8  ;;  %v1293_v41 = vunpack.c.l.b16 %v1269_v34  ;;  %v1294_v42 = vunpack.c.l.b16 %v1270_v35  ;;  %v268_v52 = vsel %vm267_vm3, %v262_v45, %v266_v48  ;;  %v6249_v53 = vld [vmem:[%s6604_s3 + $0x78] sm:$0xff]   ;;  %v6251_v58 = vld [vmem:[%s6604_s3] sm:$0xff]   ;;  %v6252_v59 = vld [vmem:[%s6604_s3 + $0x8] sm:$0xff]  }
  0x2b   : > { %v1295_v43 = vunpack.c.l.b16 %v1271_v36  ;;  %v1296_v49 = vunpack.c.l.b16 %v1272_v39  ;;  %v269_v55 = vpack.c.b16 %v268_v52, %v268_v52  ;;  %v6253_v60 = vld [vmem:[%s6604_s3 + $0x8] sm:$0xff]   ;;  %v6254_v61 = vld [vmem:[%s6604_s3 + $0x10] sm:$0xff]   ;;  %v200_v63 = vld [vmem:[%s6595_s27] ss:$0 sm:$0xff] }
  0x2c   : > { %5499 = vmatpush3.bf16.msra.mxu0 %v6238_v13  ;;  %v1297_v46 = vsel %vm263_vm1, %v1294_v42, %v1293_v41  ;;  %v6255_v62 = vld [vmem:[%s6604_s3 + $0x10] sm:$0xff]   ;;  %v6256_v0 = vld [vmem:[%s6604_s3 + $0x18] sm:$0xff]   ;;  %v1241_v2 = vld [vmem:[%s6595_s27 + $0x8] ss:$0 sm:$0xff]  ;;  %v204_v7 = vpack.c.bf16 %v200_v63, %v200_v63 }
  0x2d   : > { %5659 = vmatpush3.bf16.msra.mxu1 %v6239_v14  ;;  %5500 = vmatprep.subr.bf16.mxu0 %v6530_v8  ;;  %v1298_v50 = vsel %vm265_vm2, %v1295_v43, %v1297_v46  ;;  %v201_v1 = vld [vmem:[%s6595_s27 + $0x10] ss:$0 sm:$0xff]  ;;  %v1242_v3 = vld [vmem:[%s6595_s27 + $0x18] ss:$0 sm:$0xff]  ;;  %v6258_v5 = vld [vmem:[%s6604_s3 + $0x20] sm:$0xff]   ;;  %v1245_v11 = vpack.c.bf16 %v1241_v2, %v1241_v2 }
  0x2e   : > { %5660 = vmatprep.subr.bf16.mxu1 %v6530_v8  ;;  %v1299_v54 = vsel %vm267_vm3, %v1296_v49, %v1298_v50  ;;  %v6257_v4 = vld [vmem:[%s6604_s3 + $0x18] sm:$0xff]   ;;  %v202_v6 = vld [vmem:[%s6595_s27 + $0x20] ss:$0 sm:$0xff]  ;;  %v205_v9 = vpack.c.bf16 %v201_v1, %v201_v1  ;;  %v1243_v10 = vld [vmem:[%s6595_s27 + $0x28] ss:$0 sm:$0xff]  ;;  %v1246_v12 = vpack.c.bf16 %v1242_v3, %v1242_v3  ;;  %v363_v16 = vunpack.c.l.b16 %v204_v7 }
  0x2f   : > { %v1300_v57 = vpack.c.b16 %v1299_v54, %v1299_v54  ;;  %v6259_v13 = vld [vmem:[%s6604_s3 + $0x20] sm:$0xff]   ;;  %v203_v14 = vld [vmem:[%s6595_s27 + $0x30] ss:$0 sm:$0xff]  ;;  %v206_v15 = vpack.c.bf16 %v202_v6, %v202_v6  ;;  %v1247_v19 = vpack.c.bf16 %v1243_v10, %v1243_v10  ;;  %v1394_v20 = vunpack.c.l.b16 %v1245_v11  ;;  %v6260_v22 = vld [vmem:[%s6604_s3 + $0x28] sm:$0xff]  }
  0x30   : > { %5501 = vmatpush3.bf16.msra.mxu0 %v6240_v17  ;;  %v364_v17 = vunpack.c.l.b16 %v205_v9  ;;  %v1395_v21 = vunpack.c.l.b16 %v1246_v12  ;;  %v6262_v30 = vld [vmem:[%s6604_s3 + $0x30] sm:$0xff]   ;;  %v6264_v36 = vld [vmem:[%s6604_s3 + $0x38] sm:$0xff]   ;;  %v6266_v41 = vld [vmem:[%s6604_s3 + $0x80] sm:$0xff]  }
  0x31   : > { %5661 = vmatpush3.bf16.msra.mxu1 %v6241_v18  ;;  %5502 = vmatprep.subr.bf16.mxu0 %v6530_v8  ;;  %v1244_v18 = vld [vmem:[%s6595_s27 + $0x38] ss:$0 sm:$0xff]  ;;  %v365_v25 = vunpack.c.l.b16 %v206_v15  ;;  %v1396_v28 = vunpack.c.l.b16 %v1247_v19  ;;  %v6263_v32 = vld [vmem:[%s6604_s3 + $0x30] sm:$0xff]   ;;  %v6267_v43 = vld [vmem:[%s6604_s3 + $0x80] sm:$0xff]  }
  0x32   : > { %5662 = vmatprep.subr.bf16.mxu1 %v6530_v8  ;;  %v367_v27 = vsel %vm263_vm1, %v364_v17, %v363_v16  ;;  %v1398_v29 = vsel %vm263_vm1, %v1395_v21, %v1394_v20  ;;  %v6265_v38 = vld [vmem:[%s6604_s3 + $0x38] sm:$0xff]   ;;  %v6269_v45 = vld [vmem:[%s6604_s3 + $0x88] sm:$0xff]   ;;  %v6270_v46 = vld [vmem:[%s6604_s3 + $0x90] sm:$0xff]  }
  0x33   : > { %v368_v33 = vsel %vm265_vm2, %v365_v25, %v367_v27  ;;  %v1399_v35 = vsel %vm265_vm2, %v1396_v28, %v1398_v29  ;;  %v6272_v48 = vld [vmem:[%s6604_s3 + $0x98] sm:$0xff]   ;;  %v460_v49 = vld [vmem:[%s6595_s27 + $0x2] ss:$0 sm:$0xff]  ;;  %v461_v50 = vld [vmem:[%s6595_s27 + $0x12] ss:$0 sm:$0xff] }
  0x34   : > { %5503 = vmatpush3.bf16.msra.mxu0 %v6242_v23  ;;  %v207_v23 = vpack.c.bf16 %v203_v14, %v203_v14  ;;  %v1492_v52 = vld [vmem:[%s6595_s27 + $0x1a] ss:$0 sm:$0xff]  ;;  %v6274_v54 = vld [vmem:[%s6604_s3 + $0xa0] sm:$0xff]   ;;  %v6276_v6 = vld [vmem:[%s6604_s3 + $0xa8] sm:$0xff]  }
  0x35   : > { %5663 = vmatpush3.bf16.msra.mxu1 %v6243_v24  ;;  %5504 = vmatprep.subr.bf16.mxu0 %v6530_v8  ;;  %v6261_v24 = vld [vmem:[%s6604_s3 + $0x28] sm:$0xff]   ;;  %v1494_v2 = vld [vmem:[%s6595_s27 + $0x3a] ss:$0 sm:$0xff]  ;;  %v6278_v15 = vld [vmem:[%s6604_s3 + $0xb0] sm:$0xff]  }
  0x36   : > { %5664 = vmatprep.subr.bf16.mxu1 %v6530_v8  ;;  %v366_v31 = vunpack.c.l.b16 %v207_v23  ;;  %v6277_v9 = vld [vmem:[%s6604_s3 + $0xa8] sm:$0xff]   ;;  %v1498_v11 = vpack.c.bf16 %v1494_v2, %v1494_v2  ;;  %v6279_v17 = vld [vmem:[%s6604_s3 + $0xb0] sm:$0xff]   ;;  %v6280_v21 = vld [vmem:[%s6604_s3 + $0xb8] sm:$0xff]  }
  0x37   : > { %v6281_v23 = vld [vmem:[%s6604_s3 + $0xb8] sm:$0xff]   ;;  %v6283_v28 = vld [vmem:[%s6604_s3 + $0xc0] sm:$0xff]   ;;  %v6284_v29 = vld [vmem:[%s6604_s3 + $0xc8] sm:$0xff]  }
  0x38   : > { %5505 = vmatpush3.bf16.msra.mxu0 %v6244_v26  ;;  %v1248_v26 = vpack.c.bf16 %v1244_v18, %v1244_v18  ;;  %v1522_v19 = vunpack.c.l.b16 %v1498_v11  ;;  %v6298_v11 = vld [vmem:[%s6604_s3 + $0x100] sm:$0xff]  }
  0x39   : > { %5665 = vmatpush3.bf16.msra.mxu1 %v6245_v37  ;;  %5506 = vmatprep.subr.bf16.mxu0 %v6530_v8  ;;  %v369_v37 = vsel %vm267_vm3, %v366_v31, %v368_v33  ;;  %v6286_v31 = vld [vmem:[%s6604_s3 + $0xd0] sm:$0xff]   ;;  %v590_v33 = vld [vmem:[%s6595_s27 + $0x3] ss:$0 sm:$0xff] }
  0x3a   : > { %5666 = vmatprep.subr.bf16.mxu1 %v6530_v8  ;;  %v1397_v34 = vunpack.c.l.b16 %v1248_v26  ;;  %v370_v40 = vpack.c.b16 %v369_v37, %v369_v37  ;;  %v6282_v26 = vld [vmem:[%s6604_s3 + $0xc0] sm:$0xff]   ;;  %v1618_v37 = vld [vmem:[%s6595_s27 + $0x1b] ss:$0 sm:$0xff] }
  0x3c   : > { %5507 = vmatpush3.bf16.msra.mxu0 %v6246_v44  ;;  %v1400_v39 = vsel %vm267_vm3, %v1397_v34, %v1399_v35  ;;  %v6268_v44 = vld [vmem:[%s6604_s3 + $0x88] sm:$0xff]   ;;  %v6288_v34 = vld [vmem:[%s6604_s3 + $0xd8] sm:$0xff]   ;;  %v591_v35 = vld [vmem:[%s6595_s27 + $0x13] ss:$0 sm:$0xff] }
  0x3d   : > { %5667 = vmatpush3.bf16.msra.mxu1 %v6247_v47  ;;  %5508 = vmatprep.subr.bf16.mxu0 %v6530_v8  ;;  %v1401_v42 = vpack.c.b16 %v1400_v39, %v1400_v39  ;;  %v6271_v47 = vld [vmem:[%s6604_s3 + $0x90] sm:$0xff]   ;;  %v592_v39 = vld [vmem:[%s6595_s27 + $0x23] ss:$0 sm:$0xff] }
  0x3e   : > { %5668 = vmatprep.subr.bf16.mxu1 %v6530_v8 }
  0x40   : > { %5509 = vmatpush3.bf16.msra.mxu0 %v6248_v51  ;;  %v1491_v51 = vld [vmem:[%s6595_s27 + $0xa] ss:$0 sm:$0xff] }
  0x41   : > { %5669 = vmatpush3.bf16.msra.mxu1 %v6249_v53  ;;  %5514 = vmatprep.subr.bf16.mxu0 %v6530_v8  ;;  %v6273_v53 = vld [vmem:[%s6604_s3 + $0x98] sm:$0xff]  }
  0x42   : > { %5674 = vmatprep.subr.bf16.mxu1 %v6530_v8 }
  0x43   : > { %5511 = vmatmul.mubr.bf16.vlgmr.msra.gmra.mrb[0].mxu0 %v269_v55  ;;  %v462_v55 = vld [vmem:[%s6595_s27 + $0x22] ss:$0 sm:$0xff] }
  0x44   : > { %5515 = vmatpush3.bf16.msra.mxu0 %v6250_v56  ;;  %5671 = vmatmul.mubr.bf16.vlgmr.msra.gmra.mrb[0].mxu1 %v1300_v57  ;;  %v464_v56 = vpack.c.bf16 %v460_v49, %v460_v49  ;;  %v465_v57 = vpack.c.bf16 %v461_v50, %v461_v50  ;;  %v466_v63 = vpack.c.bf16 %v462_v55, %v462_v55  ;;  %v6292_v55 = vld [vmem:[%s6604_s3 + $0xe8] sm:$0xff]  }
  0x45   : > { %5675 = vmatpush3.bf16.msra.mxu1 %v6251_v58  ;;  %5516 = vmatprep.subr.bf16.mxu0 %v6530_v8  ;;  %v1493_v58 = vld [vmem:[%s6595_s27 + $0x2a] ss:$0 sm:$0xff] }
  0x46   : > { %5676 = vmatprep.subr.bf16.mxu1 %v6530_v8  ;;  %5530 = vmatprep.mubr.msk.bf16.mxu0 %vm6531_vm0, %v6530_v8  ;;  %v493_v1 = vunpack.c.l.b16 %v465_v57  ;;  %v1497_v3 = vpack.c.bf16 %v1493_v58, %v1493_v58  ;;  %v494_v10 = vunpack.c.l.b16 %v466_v63  ;;  %v6293_v57 = vld [vmem:[%s6604_s3 + $0xe8] sm:$0xff]   ;;  %v6294_v63 = vld [vmem:[%s6604_s3 + $0xf0] sm:$0xff]  }
  0x47   : > { %5690 = vmatprep.mubr.msk.bf16.mxu1 %vm6531_vm0, %v6530_v8 }
  0x48   : > { %5517 = vmatpush3.bf16.msra.mxu0 %v6252_v59  ;;  %v1495_v59 = vpack.c.bf16 %v1491_v51, %v1491_v51  ;;  %v1620_v51 = vld [vmem:[%s6595_s27 + $0x3b] ss:$0 sm:$0xff] }
  0x49   : > { %5677 = vmatpush3.bf16.msra.mxu1 %v6253_v60  ;;  %5518 = vmatprep.subr.bf16.mxu0 %v6530_v8  ;;  %v1496_v60 = vpack.c.bf16 %v1492_v52, %v1492_v52 }
  0x4a   : > { %5678 = vmatprep.subr.bf16.mxu1 %v6530_v8 }
  0x4c   : > { %5519 = vmatpush3.bf16.msra.mxu0 %v6254_v61  ;;  %v6275_v61 = vld [vmem:[%s6604_s3 + $0xa0] sm:$0xff]  }
  0x4d   : > { %5679 = vmatpush3.bf16.msra.mxu1 %v6255_v62  ;;  %5520 = vmatprep.subr.bf16.mxu0 %v6530_v8  ;;  %v463_v62 = vld [vmem:[%s6595_s27 + $0x32] ss:$0 sm:$0xff] }
  0x4e   : > { %5680 = vmatprep.subr.bf16.mxu1 %v6530_v8  ;;  %v467_v7 = vpack.c.bf16 %v463_v62, %v463_v62 }
  0x50   : > { %5521 = vmatpush3.bf16.msra.mxu0 %v6256_v0  ;;  %v492_v0 = vunpack.c.l.b16 %v464_v56  ;;  %v495_v16 = vunpack.c.l.b16 %v467_v7  ;;  %v6297_v7 = vld [vmem:[%s6604_s3 + $0xf8] sm:$0xff]  }
  0x51   : > { %5681 = vmatpush3.bf16.msra.mxu1 %v6257_v4  ;;  %5522 = vmatprep.subr.bf16.mxu0 %v6530_v8  ;;  %v1519_v4 = vunpack.c.l.b16 %v1495_v59  ;;  %v1624_v59 = vpack.c.bf16 %v1620_v51, %v1620_v51 }
  0x52   : > { %5682 = vmatprep.subr.bf16.mxu1 %v6530_v8  ;;  %v496_v12 = vsel %vm263_vm1, %v493_v1, %v492_v0  ;;  %v6295_v1 = vld [vmem:[%s6604_s3 + $0xf0] sm:$0xff]  }
  0x53   : > { %v497_v18 = vsel %vm265_vm2, %v494_v10, %v496_v12 }
  0x54   : > { %5523 = vmatpush3.bf16.msra.mxu0 %v6258_v5  ;;  %v1520_v5 = vunpack.c.l.b16 %v1496_v60 }
  0x55   : > { %5683 = vmatpush3.bf16.msra.mxu1 %v6259_v13  ;;  %5524 = vmatprep.subr.bf16.mxu0 %v6530_v8  ;;  %v1521_v13 = vunpack.c.l.b16 %v1497_v3  ;;  %v1648_v3 = vunpack.c.l.b16 %v1624_v59  ;;  %v6314_v59 = vld [vmem:[%s6604_s3 + $0x140] sm:$0xff]  }
  0x56   : > { %5684 = vmatprep.subr.bf16.mxu1 %v6530_v8  ;;  %v1523_v14 = vsel %vm263_vm1, %v1520_v5, %v1519_v4  ;;  %v6296_v5 = vld [vmem:[%s6604_s3 + $0xf8] sm:$0xff]  }
  0x57   : > { %v1524_v20 = vsel %vm265_vm2, %v1521_v13, %v1523_v14  ;;  %v6299_v13 = vld [vmem:[%s6604_s3 + $0x100] sm:$0xff]   ;;  %v6300_v14 = vld [vmem:[%s6604_s3 + $0x108] sm:$0xff]  }
  0x58   : > { %5525 = vmatpush3.bf16.msra.mxu0 %v6260_v22  ;;  %v498_v22 = vsel %vm267_vm3, %v495_v16, %v497_v18  ;;  %v6302_v16 = vld [vmem:[%s6604_s3 + $0x110] sm:$0xff]   ;;  %v720_v18 = vld [vmem:[%s6595_s27 + $0x4] ss:$0 sm:$0xff] }
  0x59   : > { %5685 = vmatpush3.bf16.msra.mxu1 %v6261_v24  ;;  %5526 = vmatprep.subr.bf16.mxu0 %v6530_v8  ;;  %v1525_v24 = vsel %vm267_vm3, %v1522_v19, %v1524_v20  ;;  %v499_v25 = vpack.c.b16 %v498_v22, %v498_v22  ;;  %v6304_v19 = vld [vmem:[%s6604_s3 + $0x118] sm:$0xff]   ;;  %v721_v20 = vld [vmem:[%s6595_s27 + $0x14] ss:$0 sm:$0xff] }
  0x5a   : > { %5686 = vmatprep.subr.bf16.mxu1 %v6530_v8  ;;  %v1526_v27 = vpack.c.b16 %v1525_v24, %v1525_v24  ;;  %v1744_v22 = vld [vmem:[%s6595_s27 + $0x1c] ss:$0 sm:$0xff]  ;;  %v6306_v24 = vld [vmem:[%s6604_s3 + $0x120] sm:$0xff]  }
  0x5c   : > { %5527 = vmatpush3.bf16.msra.mxu0 %v6262_v30  ;;  %v6285_v30 = vld [vmem:[%s6604_s3 + $0xc8] sm:$0xff]  }
  0x5d   : > { %5687 = vmatpush3.bf16.msra.mxu1 %v6263_v32  ;;  %5528 = vmatprep.subr.bf16.mxu0 %v6530_v8  ;;  %v6287_v32 = vld [vmem:[%s6604_s3 + $0xd0] sm:$0xff]  }
  0x5e   : > { %5688 = vmatprep.subr.bf16.mxu1 %v6530_v8 }
  0x60   : > { %5529 = vmatpush3.bf16.msra.mxu0 %v6264_v36  ;;  %v1617_v36 = vld [vmem:[%s6595_s27 + $0xb] ss:$0 sm:$0xff] }
  0x61   : > { %5689 = vmatpush3.bf16.msra.mxu1 %v6265_v38  ;;  %5534 = vmatprep.subr.bf16.mxu0 %v6530_v8  ;;  %v6289_v38 = vld [vmem:[%s6604_s3 + $0xd8] sm:$0xff]  }
  0x62   : > { %5694 = vmatprep.subr.bf16.mxu1 %v6530_v8 }
  0x63   : > { %5531 = vmatmul.mubr.bf16.vlgmr.msra.gmra.mrb[0].mxu0 %v370_v40  ;;  %v594_v40 = vpack.c.bf16 %v590_v33, %v590_v33 }
  0x64   : > { %5535 = vmatpush3.bf16.msra.mxu0 %v6266_v41  ;;  %5691 = vmatmul.mubr.bf16.vlgmr.msra.gmra.mrb[0].mxu1 %v1401_v42  ;;  %v595_v41 = vpack.c.bf16 %v591_v35, %v591_v35  ;;  %v1619_v42 = vld [vmem:[%s6595_s27 + $0x2b] ss:$0 sm:$0xff] }
  0x65   : > { %5695 = vmatpush3.bf16.msra.mxu1 %v6267_v43  ;;  %5536 = vmatprep.subr.bf16.mxu0 %v6530_v8  ;;  %v1621_v43 = vpack.c.bf16 %v1617_v36, %v1617_v36  ;;  %v622_v49 = vunpack.c.l.b16 %v594_v40  ;;  %v1623_v52 = vpack.c.bf16 %v1619_v42, %v1619_v42  ;;  %v1746_v36 = vld [vmem:[%s6595_s27 + $0x3c] ss:$0 sm:$0xff]  ;;  %v6308_v40 = vld [vmem:[%s6604_s3 + $0x128] sm:$0xff]  }
  0x66   : > { %5696 = vmatprep.subr.bf16.mxu1 %v6530_v8  ;;  %5550 = vmatprep.mubr.msk.bf16.mxu0 %vm6531_vm0, %v6530_v8  ;;  %v623_v50 = vunpack.c.l.b16 %v595_v41  ;;  %v6309_v42 = vld [vmem:[%s6604_s3 + $0x128] sm:$0xff]  }
  0x67   : > { %5710 = vmatprep.mubr.msk.bf16.mxu1 %vm6531_vm0, %v6530_v8 }
  0x68   : > { %5537 = vmatpush3.bf16.msra.mxu0 %v6268_v44  ;;  %v1622_v44 = vpack.c.bf16 %v1618_v37, %v1618_v37  ;;  %v626_v60 = vsel %vm263_vm1, %v623_v50, %v622_v49  ;;  %v6311_v50 = vld [vmem:[%s6604_s3 + $0x130] sm:$0xff]  }
  0x69   : > { %5697 = vmatpush3.bf16.msra.mxu1 %v6269_v45  ;;  %5538 = vmatprep.subr.bf16.mxu0 %v6530_v8  ;;  %v6290_v45 = vld [vmem:[%s6604_s3 + $0xe0] sm:$0xff]  }
  0x6a   : > { %5698 = vmatprep.subr.bf16.mxu1 %v6530_v8 }
  0x6c   : > { %5539 = vmatpush3.bf16.msra.mxu0 %v6270_v46  ;;  %v6291_v46 = vld [vmem:[%s6604_s3 + $0xe0] sm:$0xff]  }
  0x6d   : > { %5699 = vmatpush3.bf16.msra.mxu1 %v6271_v47  ;;  %5540 = vmatprep.subr.bf16.mxu0 %v6530_v8  ;;  %v593_v47 = vld [vmem:[%s6595_s27 + $0x33] ss:$0 sm:$0xff] }
  0x6e   : > { %5700 = vmatprep.subr.bf16.mxu1 %v6530_v8  ;;  %v597_v56 = vpack.c.bf16 %v593_v47, %v593_v47 }
  0x70   : > { %5541 = vmatpush3.bf16.msra.mxu0 %v6272_v48  ;;  %v596_v48 = vpack.c.bf16 %v592_v39, %v592_v39  ;;  %v625_v0 = vunpack.c.l.b16 %v597_v56  ;;  %v6313_v56 = vld [vmem:[%s6604_s3 + $0x138] sm:$0xff]  }
  0x71   : > { %5701 = vmatpush3.bf16.msra.mxu1 %v6273_v53  ;;  %5542 = vmatprep.subr.bf16.mxu0 %v6530_v8  ;;  %v1645_v53 = vunpack.c.l.b16 %v1621_v43 }
  0x72   : > { %5702 = vmatprep.subr.bf16.mxu1 %v6530_v8  ;;  %v624_v58 = vunpack.c.l.b16 %v596_v48  ;;  %v6310_v48 = vld [vmem:[%s6604_s3 + $0x130] sm:$0xff]  }
  0x74   : > { %5543 = vmatpush3.bf16.msra.mxu0 %v6274_v54  ;;  %v1646_v54 = vunpack.c.l.b16 %v1622_v44  ;;  %v627_v2 = vsel %vm265_vm2, %v624_v58, %v626_v60  ;;  %v1750_v44 = vpack.c.bf16 %v1746_v36, %v1746_v36 }
  0x75   : > { %5703 = vmatpush3.bf16.msra.mxu1 %v6275_v61  ;;  %5544 = vmatprep.subr.bf16.mxu0 %v6530_v8  ;;  %v1647_v61 = vunpack.c.l.b16 %v1623_v52 }
  0x76   : > { %5704 = vmatprep.subr.bf16.mxu1 %v6530_v8  ;;  %v1649_v62 = vsel %vm263_vm1, %v1646_v54, %v1645_v53  ;;  %v1774_v52 = vunpack.c.l.b16 %v1750_v44  ;;  %v6312_v54 = vld [vmem:[%s6604_s3 + $0x138] sm:$0xff]   ;;  %v6330_v44 = vld [vmem:[%s6604_s3 + $0x180] sm:$0xff]  }
  0x77   : > { %v1650_v4 = vsel %vm265_vm2, %v1647_v61, %v1649_v62  ;;  %v6315_v61 = vld [vmem:[%s6604_s3 + $0x140] sm:$0xff]   ;;  %v6316_v62 = vld [vmem:[%s6604_s3 + $0x148] sm:$0xff]  }
  0x78   : > { %5545 = vmatpush3.bf16.msra.mxu0 %v6276_v6  ;;  %v628_v6 = vsel %vm267_vm3, %v625_v0, %v627_v2  ;;  %v6318_v0 = vld [vmem:[%s6604_s3 + $0x150] sm:$0xff]   ;;  %v850_v2 = vld [vmem:[%s6595_s27 + $0x5] ss:$0 sm:$0xff] }
  0x79   : > { %5705 = vmatpush3.bf16.msra.mxu1 %v6277_v9  ;;  %5546 = vmatprep.subr.bf16.mxu0 %v6530_v8  ;;  %v1651_v9 = vsel %vm267_vm3, %v1648_v3, %v1650_v4  ;;  %v629_v10 = vpack.c.b16 %v628_v6, %v628_v6  ;;  %v851_v3 = vld [vmem:[%s6595_s27 + $0x15] ss:$0 sm:$0xff]  ;;  %v6320_v4 = vld [vmem:[%s6604_s3 + $0x158] sm:$0xff]  }
  0x7a   : > { %5706 = vmatprep.subr.bf16.mxu1 %v6530_v8  ;;  %v1652_v12 = vpack.c.b16 %v1651_v9, %v1651_v9  ;;  %v1870_v6 = vld [vmem:[%s6595_s27 + $0x1d] ss:$0 sm:$0xff]  ;;  %v852_v9 = vld [vmem:[%s6595_s27 + $0x25] ss:$0 sm:$0xff] }
  0x7c   : > { %5547 = vmatpush3.bf16.msra.mxu0 %v6278_v15  ;;  %v6301_v15 = vld [vmem:[%s6604_s3 + $0x108] sm:$0xff]  }
  0x7d   : > { %5707 = vmatpush3.bf16.msra.mxu1 %v6279_v17  ;;  %5548 = vmatprep.subr.bf16.mxu0 %v6530_v8  ;;  %v6303_v17 = vld [vmem:[%s6604_s3 + $0x110] sm:$0xff]  }
  0x7e   : > { %5708 = vmatprep.subr.bf16.mxu1 %v6530_v8 }
  0x80   : > { %5549 = vmatpush3.bf16.msra.mxu0 %v6280_v21  ;;  %v1743_v21 = vld [vmem:[%s6595_s27 + $0xc] ss:$0 sm:$0xff] }
  0x81   : > { %5709 = vmatpush3.bf16.msra.mxu1 %v6281_v23  ;;  %5554 = vmatprep.subr.bf16.mxu0 %v6530_v8  ;;  %v6305_v23 = vld [vmem:[%s6604_s3 + $0x118] sm:$0xff]  }
  0x82   : > { %5714 = vmatprep.subr.bf16.mxu1 %v6530_v8 }
  0x83   : > { %5551 = vmatmul.mubr.bf16.vlgmr.msra.gmra.mrb[0].mxu0 %v499_v25  ;;  %v722_v25 = vld [vmem:[%s6595_s27 + $0x24] ss:$0 sm:$0xff] }
  0x84   : > { %5555 = vmatpush3.bf16.msra.mxu0 %v6282_v26  ;;  %5711 = vmatmul.mubr.bf16.vlgmr.msra.gmra.mrb[0].mxu1 %v1526_v27  ;;  %v724_v26 = vpack.c.bf16 %v720_v18, %v720_v18  ;;  %v725_v27 = vpack.c.bf16 %v721_v20, %v721_v20  ;;  %v726_v33 = vpack.c.bf16 %v722_v25, %v722_v25  ;;  %v6324_v25 = vld [vmem:[%s6604_s3 + $0x168] sm:$0xff]  }
  0x85   : > { %5715 = vmatpush3.bf16.msra.mxu1 %v6283_v28  ;;  %5556 = vmatprep.subr.bf16.mxu0 %v6530_v8  ;;  %v1745_v28 = vld [vmem:[%s6595_s27 + $0x2c] ss:$0 sm:$0xff]  ;;  %v856_v18 = vpack.c.bf16 %v852_v9, %v852_v9 }
  0x86   : > { %5716 = vmatprep.subr.bf16.mxu1 %v6530_v8  ;;  %5570 = vmatprep.mubr.msk.bf16.mxu0 %vm6531_vm0, %v6530_v8  ;;  %v753_v35 = vunpack.c.l.b16 %v725_v27  ;;  %v1749_v37 = vpack.c.bf16 %v1745_v28, %v1745_v28  ;;  %v754_v43 = vunpack.c.l.b16 %v726_v33  ;;  %v6325_v27 = vld [vmem:[%s6604_s3 + $0x168] sm:$0xff]   ;;  %v6326_v33 = vld [vmem:[%s6604_s3 + $0x170] sm:$0xff]  }
  0x87   : > { %5730 = vmatprep.mubr.msk.bf16.mxu1 %vm6531_vm0, %v6530_v8  ;;  %v884_v28 = vunpack.c.l.b16 %v856_v18  ;;  %v6342_v18 = vld [vmem:[%s6604_s3 + $0x1b0] sm:$0xff]  }
  0x88   : > { %5557 = vmatpush3.bf16.msra.mxu0 %v6284_v29  ;;  %v1747_v29 = vpack.c.bf16 %v1743_v21, %v1743_v21  ;;  %v1872_v21 = vld [vmem:[%s6595_s27 + $0x3d] ss:$0 sm:$0xff] }
  0x89   : > { %5717 = vmatpush3.bf16.msra.mxu1 %v6285_v30  ;;  %5558 = vmatprep.subr.bf16.mxu0 %v6530_v8  ;;  %v1748_v30 = vpack.c.bf16 %v1744_v22, %v1744_v22 }
  0x8a   : > { %5718 = vmatprep.subr.bf16.mxu1 %v6530_v8 }
  0x8b   : > { %v1772_v39 = vunpack.c.l.b16 %v1748_v30 }
  0x8c   : > { %5559 = vmatpush3.bf16.msra.mxu0 %v6286_v31  ;;  %v6307_v31 = vld [vmem:[%s6604_s3 + $0x120] sm:$0xff]  }
  0x8d   : > { %5719 = vmatpush3.bf16.msra.mxu1 %v6287_v32  ;;  %5560 = vmatprep.subr.bf16.mxu0 %v6530_v8  ;;  %v723_v32 = vld [vmem:[%s6595_s27 + $0x34] ss:$0 sm:$0xff] }
  0x8e   : > { %5720 = vmatprep.subr.bf16.mxu1 %v6530_v8  ;;  %v727_v41 = vpack.c.bf16 %v723_v32, %v723_v32 }
  0x90   : > { %5561 = vmatpush3.bf16.msra.mxu0 %v6288_v34  ;;  %v752_v34 = vunpack.c.l.b16 %v724_v26  ;;  %v755_v49 = vunpack.c.l.b16 %v727_v41  ;;  %v6329_v41 = vld [vmem:[%s6604_s3 + $0x178] sm:$0xff]  }
  0x91   : > { %5721 = vmatpush3.bf16.msra.mxu1 %v6289_v38  ;;  %5562 = vmatprep.subr.bf16.mxu0 %v6530_v8  ;;  %v1771_v38 = vunpack.c.l.b16 %v1747_v29  ;;  %v1876_v29 = vpack.c.bf16 %v1872_v21, %v1872_v21 }
  0x92   : > { %5722 = vmatprep.subr.bf16.mxu1 %v6530_v8 }
  0x93   : > { %v1775_v47 = vsel %vm263_vm1, %v1772_v39, %v1771_v38  ;;  %v6328_v39 = vld [vmem:[%s6604_s3 + $0x178] sm:$0xff]  }
  0x94   : > { %5563 = vmatpush3.bf16.msra.mxu0 %v6290_v45  ;;  %v756_v45 = vsel %vm263_vm1, %v753_v35, %v752_v34  ;;  %v6327_v35 = vld [vmem:[%s6604_s3 + $0x170] sm:$0xff]  }
  0x95   : > { %5723 = vmatpush3.bf16.msra.mxu1 %v6291_v46  ;;  %5564 = vmatprep.subr.bf16.mxu0 %v6530_v8  ;;  %v1773_v46 = vunpack.c.l.b16 %v1749_v37  ;;  %v757_v51 = vsel %vm265_vm2, %v754_v43, %v756_v45  ;;  %v1900_v37 = vunpack.c.l.b16 %v1876_v29  ;;  %v6346_v29 = vld [vmem:[%s6604_s3 + $0x1c0] sm:$0xff]  }
  0x96   : > { %5724 = vmatprep.subr.bf16.mxu1 %v6530_v8 }
  0x97   : > { %v1776_v53 = vsel %vm265_vm2, %v1773_v46, %v1775_v47  ;;  %v6331_v46 = vld [vmem:[%s6604_s3 + $0x180] sm:$0xff]   ;;  %v6332_v47 = vld [vmem:[%s6604_s3 + $0x188] sm:$0xff]  }
  0x98   : > { %5565 = vmatpush3.bf16.msra.mxu0 %v6292_v55  ;;  %v758_v55 = vsel %vm267_vm3, %v755_v49, %v757_v51  ;;  %v6334_v49 = vld [vmem:[%s6604_s3 + $0x190] sm:$0xff]   ;;  %v980_v51 = vld [vmem:[%s6595_s27 + $0x6] ss:$0 sm:$0xff] }
  0x99   : > { %5725 = vmatpush3.bf16.msra.mxu1 %v6293_v57  ;;  %5566 = vmatprep.subr.bf16.mxu0 %v6530_v8  ;;  %v1777_v57 = vsel %vm267_vm3, %v1774_v52, %v1776_v53  ;;  %v759_v58 = vpack.c.b16 %v758_v55, %v758_v55  ;;  %v981_v52 = vld [vmem:[%s6595_s27 + $0x16] ss:$0 sm:$0xff]  ;;  %v6336_v53 = vld [vmem:[%s6604_s3 + $0x198] sm:$0xff]  }
  0x9a   : > { %5726 = vmatprep.subr.bf16.mxu1 %v6530_v8  ;;  %v1778_v60 = vpack.c.b16 %v1777_v57, %v1777_v57  ;;  %v1996_v55 = vld [vmem:[%s6595_s27 + $0x1e] ss:$0 sm:$0xff]  ;;  %v982_v57 = vld [vmem:[%s6595_s27 + $0x26] ss:$0 sm:$0xff] }
  0x9c   : > { %5567 = vmatpush3.bf16.msra.mxu0 %v6294_v63  ;;  %v6317_v63 = vld [vmem:[%s6604_s3 + $0x148] sm:$0xff]  }
  0x9d   : > { %5727 = vmatpush3.bf16.msra.mxu1 %v6295_v1  ;;  %5568 = vmatprep.subr.bf16.mxu0 %v6530_v8  ;;  %v6319_v1 = vld [vmem:[%s6604_s3 + $0x150] sm:$0xff]  }
  0x9e   : > { %5728 = vmatprep.subr.bf16.mxu1 %v6530_v8 }
  0xa0   : > { %5569 = vmatpush3.bf16.msra.mxu0 %v6296_v5  ;;  %v1869_v5 = vld [vmem:[%s6595_s27 + $0xd] ss:$0 sm:$0xff] }
  0xa1   : > { %5729 = vmatpush3.bf16.msra.mxu1 %v6297_v7  ;;  %5574 = vmatprep.subr.bf16.mxu0 %v6530_v8  ;;  %v6321_v7 = vld [vmem:[%s6604_s3 + $0x158] sm:$0xff]  }
  0xa2   : > { %5734 = vmatprep.subr.bf16.mxu1 %v6530_v8 }
  0xa3   : > { %5571 = vmatmul.mubr.bf16.vlgmr.msra.gmra.mrb[0].mxu0 %v629_v10  ;;  %v854_v10 = vpack.c.bf16 %v850_v2, %v850_v2  ;;  %v986_v2 = vpack.c.bf16 %v982_v57, %v982_v57 }
  0xa4   : > { %5575 = vmatpush3.bf16.msra.mxu0 %v6298_v11  ;;  %5731 = vmatmul.mubr.bf16.vlgmr.msra.gmra.mrb[0].mxu1 %v1652_v12  ;;  %v855_v11 = vpack.c.bf16 %v851_v3, %v851_v3  ;;  %v1871_v12 = vld [vmem:[%s6595_s27 + $0x2d] ss:$0 sm:$0xff] }
  0xa5   : > { %5735 = vmatpush3.bf16.msra.mxu1 %v6299_v13  ;;  %5576 = vmatprep.subr.bf16.mxu0 %v6530_v8  ;;  %v1873_v13 = vpack.c.bf16 %v1869_v5, %v1869_v5  ;;  %v1875_v22 = vpack.c.bf16 %v1871_v12, %v1871_v12  ;;  %v1998_v5 = vld [vmem:[%s6595_s27 + $0x3e] ss:$0 sm:$0xff]  ;;  %v6341_v12 = vld [vmem:[%s6604_s3 + $0x1a8] sm:$0xff]  }
  0xa6   : > { %5736 = vmatprep.subr.bf16.mxu1 %v6530_v8  ;;  %5590 = vmatprep.mubr.msk.bf16.mxu0 %vm6531_vm0, %v6530_v8  ;;  %v883_v20 = vunpack.c.l.b16 %v855_v11 }
  0xa7   : > { %5750 = vmatprep.mubr.msk.bf16.mxu1 %vm6531_vm0, %v6530_v8 }
  0xa8   : > { %5577 = vmatpush3.bf16.msra.mxu0 %v6300_v14  ;;  %v1874_v14 = vpack.c.bf16 %v1870_v6, %v1870_v6 }
  0xa9   : > { %5737 = vmatpush3.bf16.msra.mxu1 %v6301_v15  ;;  %5578 = vmatprep.subr.bf16.mxu0 %v6530_v8  ;;  %v6322_v15 = vld [vmem:[%s6604_s3 + $0x160] sm:$0xff]  }
  0xaa   : > { %5738 = vmatprep.subr.bf16.mxu1 %v6530_v8 }
  0xac   : > { %5579 = vmatpush3.bf16.msra.mxu0 %v6302_v16  ;;  %v6323_v16 = vld [vmem:[%s6604_s3 + $0x160] sm:$0xff]  }
  0xad   : > { %5739 = vmatpush3.bf16.msra.mxu1 %v6303_v17  ;;  %5580 = vmatprep.subr.bf16.mxu0 %v6530_v8  ;;  %v853_v17 = vld [vmem:[%s6595_s27 + $0x35] ss:$0 sm:$0xff] }
  0xae   : > { %5740 = vmatprep.subr.bf16.mxu1 %v6530_v8  ;;  %v857_v26 = vpack.c.bf16 %v853_v17, %v853_v17 }
  0xb0   : > { %5581 = vmatpush3.bf16.msra.mxu0 %v6304_v19  ;;  %v882_v19 = vunpack.c.l.b16 %v854_v10  ;;  %v885_v34 = vunpack.c.l.b16 %v857_v26  ;;  %v6340_v10 = vld [vmem:[%s6604_s3 + $0x1a8] sm:$0xff]   ;;  %v6345_v26 = vld [vmem:[%s6604_s3 + $0x1b8] sm:$0xff]  }
  0xb1   : > { %5741 = vmatpush3.bf16.msra.mxu1 %v6305_v23  ;;  %5582 = vmatprep.subr.bf16.mxu0 %v6530_v8  ;;  %v1897_v23 = vunpack.c.l.b16 %v1873_v13  ;;  %v1014_v13 = vunpack.c.l.b16 %v986_v2  ;;  %v6358_v2 = vld [vmem:[%s6604_s3 + $0x1f0] sm:$0xff]  }
  0xb2   : > { %5742 = vmatprep.subr.bf16.mxu1 %v6530_v8  ;;  %v886_v30 = vsel %vm263_vm1, %v883_v20, %v882_v19  ;;  %v6343_v20 = vld [vmem:[%s6604_s3 + $0x1b0] sm:$0xff]  }
  0xb3   : > { %v887_v36 = vsel %vm265_vm2, %v884_v28, %v886_v30 }
  0xb4   : > { %5583 = vmatpush3.bf16.msra.mxu0 %v6306_v24  ;;  %v1898_v24 = vunpack.c.l.b16 %v1874_v14  ;;  %v2002_v14 = vpack.c.bf16 %v1998_v5, %v1998_v5 }
  0xb5   : > { %5743 = vmatpush3.bf16.msra.mxu1 %v6307_v31  ;;  %5584 = vmatprep.subr.bf16.mxu0 %v6530_v8  ;;  %v1899_v31 = vunpack.c.l.b16 %v1875_v22 }
  0xb6   : > { %5744 = vmatprep.subr.bf16.mxu1 %v6530_v8  ;;  %v1901_v32 = vsel %vm263_vm1, %v1898_v24, %v1897_v23  ;;  %v2026_v22 = vunpack.c.l.b16 %v2002_v14  ;;  %v6344_v24 = vld [vmem:[%s6604_s3 + $0x1b8] sm:$0xff]  }
  0xb7   : > { %v1902_v38 = vsel %vm265_vm2, %v1899_v31, %v1901_v32  ;;  %v6347_v31 = vld [vmem:[%s6604_s3 + $0x1c0] sm:$0xff]   ;;  %v6348_v32 = vld [vmem:[%s6604_s3 + $0x1c8] sm:$0xff]  }
  0xb8   : > { %5585 = vmatpush3.bf16.msra.mxu0 %v6308_v40  ;;  %v888_v40 = vsel %vm267_vm3, %v885_v34, %v887_v36  ;;  %v6350_v34 = vld [vmem:[%s6604_s3 + $0x1d0] sm:$0xff]   ;;  %v1110_v36 = vld [vmem:[%s6595_s27 + $0x7] ss:$0 sm:$0xff] }
  0xb9   : > { %5745 = vmatpush3.bf16.msra.mxu1 %v6309_v42  ;;  %5586 = vmatprep.subr.bf16.mxu0 %v6530_v8  ;;  %v1903_v42 = vsel %vm267_vm3, %v1900_v37, %v1902_v38  ;;  %v889_v43 = vpack.c.b16 %v888_v40, %v888_v40  ;;  %v1111_v37 = vld [vmem:[%s6595_s27 + $0x17] ss:$0 sm:$0xff]  ;;  %v6352_v38 = vld [vmem:[%s6604_s3 + $0x1d8] sm:$0xff]  }
  0xba   : > { %5746 = vmatprep.subr.bf16.mxu1 %v6530_v8  ;;  %v1904_v45 = vpack.c.b16 %v1903_v42, %v1903_v42  ;;  %v2122_v40 = vld [vmem:[%s6595_s27 + $0x1f] ss:$0 sm:$0xff]  ;;  %v1112_v42 = vld [vmem:[%s6595_s27 + $0x27] ss:$0 sm:$0xff] }
  0xbc   : > { %5587 = vmatpush3.bf16.msra.mxu0 %v6310_v48  ;;  %v6333_v48 = vld [vmem:[%s6604_s3 + $0x188] sm:$0xff]  }
  0xbd   : > { %5747 = vmatpush3.bf16.msra.mxu1 %v6311_v50  ;;  %5588 = vmatprep.subr.bf16.mxu0 %v6530_v8  ;;  %v6335_v50 = vld [vmem:[%s6604_s3 + $0x190] sm:$0xff]  }
  0xbe   : > { %5748 = vmatprep.subr.bf16.mxu1 %v6530_v8 }
  0xc0   : > { %5589 = vmatpush3.bf16.msra.mxu0 %v6312_v54  ;;  %v1995_v54 = vld [vmem:[%s6595_s27 + $0xe] ss:$0 sm:$0xff] }
  0xc1   : > { %5749 = vmatpush3.bf16.msra.mxu1 %v6313_v56  ;;  %5594 = vmatprep.subr.bf16.mxu0 %v6530_v8  ;;  %v6337_v56 = vld [vmem:[%s6604_s3 + $0x198] sm:$0xff]  }
  0xc2   : > { %5754 = vmatprep.subr.bf16.mxu1 %v6530_v8 }
  0xc3   : > { %5591 = vmatmul.mubr.bf16.vlgmr.msra.gmra.mrb[0].mxu0 %v759_v58  ;;  %v984_v58 = vpack.c.bf16 %v980_v51, %v980_v51  ;;  %v1116_v51 = vpack.c.bf16 %v1112_v42, %v1112_v42 }
  0xc4   : > { %5595 = vmatpush3.bf16.msra.mxu0 %v6314_v59  ;;  %5751 = vmatmul.mubr.bf16.vlgmr.msra.gmra.mrb[0].mxu1 %v1778_v60  ;;  %v985_v59 = vpack.c.bf16 %v981_v52, %v981_v52  ;;  %v1997_v60 = vld [vmem:[%s6595_s27 + $0x2e] ss:$0 sm:$0xff] }
  0xc5   : > { %5755 = vmatpush3.bf16.msra.mxu1 %v6315_v61  ;;  %5596 = vmatprep.subr.bf16.mxu0 %v6530_v8  ;;  %v1999_v61 = vpack.c.bf16 %v1995_v54, %v1995_v54  ;;  %v1012_v3 = vunpack.c.l.b16 %v984_v58  ;;  %v2001_v6 = vpack.c.bf16 %v1997_v60, %v1997_v60  ;;  %v2124_v54 = vld [vmem:[%s6595_s27 + $0x3f] ss:$0 sm:$0xff]  ;;  %v6356_v58 = vld [vmem:[%s6604_s3 + $0x1e8] sm:$0xff]  }
  0xc6   : > { %5756 = vmatprep.subr.bf16.mxu1 %v6530_v8  ;;  %5610 = vmatprep.mubr.msk.bf16.mxu0 %vm6531_vm0, %v6530_v8  ;;  %v6357_v60 = vld [vmem:[%s6604_s3 + $0x1e8] sm:$0xff]  }
  0xc7   : > { %5770 = vmatprep.mubr.msk.bf16.mxu1 %vm6531_vm0, %v6530_v8 }
  0xc8   : > { %5597 = vmatpush3.bf16.msra.mxu0 %v6316_v62  ;;  %v2000_v62 = vpack.c.bf16 %v1996_v55, %v1996_v55 }
  0xc9   : > { %5757 = vmatpush3.bf16.msra.mxu1 %v6317_v63  ;;  %5598 = vmatprep.subr.bf16.mxu0 %v6530_v8  ;;  %v6338_v63 = vld [vmem:[%s6604_s3 + $0x1a0] sm:$0xff]  }
  0xca   : > { %5758 = vmatprep.subr.bf16.mxu1 %v6530_v8  ;;  %v2024_v9 = vunpack.c.l.b16 %v2000_v62  ;;  %v2128_v62 = vpack.c.bf16 %v2124_v54, %v2124_v54 }
  0xcc   : > { %5599 = vmatpush3.bf16.msra.mxu0 %v6318_v0  ;;  %v6339_v0 = vld [vmem:[%s6604_s3 + $0x1a0] sm:$0xff]  }
  0xcd   : > { %5759 = vmatpush3.bf16.msra.mxu1 %v6319_v1  ;;  %5600 = vmatprep.subr.bf16.mxu0 %v6530_v8  ;;  %v983_v1 = vld [vmem:[%s6595_s27 + $0x36] ss:$0 sm:$0xff] }
  0xce   : > { %5760 = vmatprep.subr.bf16.mxu1 %v6530_v8  ;;  %v987_v11 = vpack.c.bf16 %v983_v1, %v983_v1 }
  0xd0   : > { %5601 = vmatpush3.bf16.msra.mxu0 %v6320_v4  ;;  %v1013_v4 = vunpack.c.l.b16 %v985_v59  ;;  %v1015_v19 = vunpack.c.l.b16 %v987_v11  ;;  %v6361_v11 = vld [vmem:[%s6604_s3 + $0x1f8] sm:$0xff]  }
  0xd1   : > { %5761 = vmatpush3.bf16.msra.mxu1 %v6321_v7  ;;  %5602 = vmatprep.subr.bf16.mxu0 %v6530_v8  ;;  %v2023_v7 = vunpack.c.l.b16 %v1999_v61  ;;  %v1144_v61 = vunpack.c.l.b16 %v1116_v51 }
  0xd2   : > { %5762 = vmatprep.subr.bf16.mxu1 %v6530_v8 }
  0xd3   : > { %v2027_v17 = vsel %vm263_vm1, %v2024_v9, %v2023_v7  ;;  %v6360_v9 = vld [vmem:[%s6604_s3 + $0x1f8] sm:$0xff]  }
  0xd4   : > { %5603 = vmatpush3.bf16.msra.mxu0 %v6322_v15  ;;  %v1016_v15 = vsel %vm263_vm1, %v1013_v4, %v1012_v3  ;;  %v6359_v4 = vld [vmem:[%s6604_s3 + $0x1f0] sm:$0xff]  }
  0xd5   : > { %5763 = vmatpush3.bf16.msra.mxu1 %v6323_v16  ;;  %5604 = vmatprep.subr.bf16.mxu0 %v6530_v8  ;;  %v2025_v16 = vunpack.c.l.b16 %v2001_v6  ;;  %v1017_v21 = vsel %vm265_vm2, %v1014_v13, %v1016_v15  ;;  %v2152_v6 = vunpack.c.l.b16 %v2128_v62 }
  0xd6   : > { %5764 = vmatprep.subr.bf16.mxu1 %v6530_v8 }
  0xd7   : > { %v2028_v23 = vsel %vm265_vm2, %v2025_v16, %v2027_v17 }
  0xd8   : > { %5605 = vmatpush3.bf16.msra.mxu0 %v6324_v25  ;;  %v1018_v25 = vsel %vm267_vm3, %v1015_v19, %v1017_v21 }
  0xd9   : > { %5765 = vmatpush3.bf16.msra.mxu1 %v6325_v27  ;;  %5606 = vmatprep.subr.bf16.mxu0 %v6530_v8  ;;  %v2029_v27 = vsel %vm267_vm3, %v2026_v22, %v2028_v23  ;;  %v1019_v28 = vpack.c.b16 %v1018_v25, %v1018_v25 }
  0xda   : > { %5766 = vmatprep.subr.bf16.mxu1 %v6530_v8  ;;  %v2030_v30 = vpack.c.b16 %v2029_v27, %v2029_v27 }
  0xdc   : > { %5607 = vmatpush3.bf16.msra.mxu0 %v6326_v33  ;;  %v6349_v33 = vld [vmem:[%s6604_s3 + $0x1c8] sm:$0xff]  }
  0xdd   : > { %5767 = vmatpush3.bf16.msra.mxu1 %v6327_v35  ;;  %5608 = vmatprep.subr.bf16.mxu0 %v6530_v8  ;;  %v6351_v35 = vld [vmem:[%s6604_s3 + $0x1d0] sm:$0xff]  }
  0xde   : > { %5768 = vmatprep.subr.bf16.mxu1 %v6530_v8 }
  0xe0   : > { %5609 = vmatpush3.bf16.msra.mxu0 %v6328_v39  ;;  %v2121_v39 = vld [vmem:[%s6595_s27 + $0xf] ss:$0 sm:$0xff] }
  0xe1   : > { %5769 = vmatpush3.bf16.msra.mxu1 %v6329_v41  ;;  %5614 = vmatprep.subr.bf16.mxu0 %v6530_v8  ;;  %v6353_v41 = vld [vmem:[%s6604_s3 + $0x1d8] sm:$0xff]  }
  0xe2   : > { %5774 = vmatprep.subr.bf16.mxu1 %v6530_v8 }
  0xe3   : > { %5611 = vmatmul.mubr.bf16.vlgmr.msra.gmra.mrb[0].mxu0 %v889_v43  ;;  %v1114_v43 = vpack.c.bf16 %v1110_v36, %v1110_v36 }
  0xe4   : > { %5615 = vmatpush3.bf16.msra.mxu0 %v6330_v44  ;;  %5771 = vmatmul.mubr.bf16.vlgmr.msra.gmra.mrb[0].mxu1 %v1904_v45  ;;  %v1115_v44 = vpack.c.bf16 %v1111_v37, %v1111_v37  ;;  %v2123_v45 = vld [vmem:[%s6595_s27 + $0x2f] ss:$0 sm:$0xff] }
  0xe5   : > { %5775 = vmatpush3.bf16.msra.mxu1 %v6331_v46  ;;  %5616 = vmatprep.subr.bf16.mxu0 %v6530_v8  ;;  %v2125_v46 = vpack.c.bf16 %v2121_v39, %v2121_v39  ;;  %v1142_v52 = vunpack.c.l.b16 %v1114_v43  ;;  %v2127_v55 = vpack.c.bf16 %v2123_v45, %v2123_v45 }
  0xe6   : > { %5776 = vmatprep.subr.bf16.mxu1 %v6530_v8  ;;  %5630 = vmatprep.mubr.msk.bf16.mxu0 %vm6531_vm0, %v6530_v8 }
  0xe7   : > { %5790 = vmatprep.mubr.msk.bf16.mxu1 %vm6531_vm0, %v6530_v8 }
  0xe8   : > { %5617 = vmatpush3.bf16.msra.mxu0 %v6332_v47  ;;  %v2126_v47 = vpack.c.bf16 %v2122_v40, %v2122_v40 }
  0xe9   : > { %5777 = vmatpush3.bf16.msra.mxu1 %v6333_v48  ;;  %5618 = vmatprep.subr.bf16.mxu0 %v6530_v8  ;;  %v6354_v48 = vld [vmem:[%s6604_s3 + $0x1e0] sm:$0xff]  }
  0xea   : > { %5778 = vmatprep.subr.bf16.mxu1 %v6530_v8  ;;  %v2150_v57 = vunpack.c.l.b16 %v2126_v47 }
  0xec   : > { %5619 = vmatpush3.bf16.msra.mxu0 %v6334_v49  ;;  %v6355_v49 = vld [vmem:[%s6604_s3 + $0x1e0] sm:$0xff]  }
  0xed   : > { %5779 = vmatpush3.bf16.msra.mxu1 %v6335_v50  ;;  %5620 = vmatprep.subr.bf16.mxu0 %v6530_v8  ;;  %v1113_v50 = vld [vmem:[%s6595_s27 + $0x37] ss:$0 sm:$0xff] }
  0xee   : > { %5780 = vmatprep.subr.bf16.mxu1 %v6530_v8  ;;  %v1117_v59 = vpack.c.bf16 %v1113_v50, %v1113_v50 }
  0xf0   : > { %5621 = vmatpush3.bf16.msra.mxu0 %v6336_v53  ;;  %v1143_v53 = vunpack.c.l.b16 %v1115_v44  ;;  %v1145_v3 = vunpack.c.l.b16 %v1117_v59 }
  0xf1   : > { %5781 = vmatpush3.bf16.msra.mxu1 %v6337_v56  ;;  %5622 = vmatprep.subr.bf16.mxu0 %v6530_v8  ;;  %v2149_v56 = vunpack.c.l.b16 %v2125_v46 }
  0xf2   : > { %5782 = vmatprep.subr.bf16.mxu1 %v6530_v8 }
  0xf3   : > { %v2153_v1 = vsel %vm263_vm1, %v2150_v57, %v2149_v56 }
  0xf4   : > { %5623 = vmatpush3.bf16.msra.mxu0 %v6338_v63  ;;  %v1146_v63 = vsel %vm263_vm1, %v1143_v53, %v1142_v52 }
  0xf5   : > { %5783 = vmatpush3.bf16.msra.mxu1 %v6339_v0  ;;  %5624 = vmatprep.subr.bf16.mxu0 %v6530_v8  ;;  %v2151_v0 = vunpack.c.l.b16 %v2127_v55  ;;  %v1147_v5 = vsel %vm265_vm2, %v1144_v61, %v1146_v63 }
  0xf6   : > { %5784 = vmatprep.subr.bf16.mxu1 %v6530_v8 }
  0xf7   : > { %v2154_v7 = vsel %vm265_vm2, %v2151_v0, %v2153_v1 }
  0xf8   : > { %5625 = vmatpush3.bf16.msra.mxu0 %v6340_v10  ;;  %v1148_v10 = vsel %vm267_vm3, %v1145_v3, %v1147_v5 }
  0xf9   : > { %5785 = vmatpush3.bf16.msra.mxu1 %v6341_v12  ;;  %5626 = vmatprep.subr.bf16.mxu0 %v6530_v8  ;;  %v2155_v12 = vsel %vm267_vm3, %v2152_v6, %v2154_v7  ;;  %v1149_v13 = vpack.c.b16 %v1148_v10, %v1148_v10 }
  0xfa   : > { %5786 = vmatprep.subr.bf16.mxu1 %v6530_v8  ;;  %v2156_v14 = vpack.c.b16 %v2155_v12, %v2155_v12 }
  0xfc   : > { %5627 = vmatpush3.bf16.msra.mxu0 %v6342_v18 }
  0xfd   : > { %5787 = vmatpush3.bf16.msra.mxu1 %v6343_v20  ;;  %5628 = vmatprep.subr.bf16.mxu0 %v6530_v8 }
  0xfe   : > { %5788 = vmatprep.subr.bf16.mxu1 %v6530_v8 }
 0x100   : > { %5629 = vmatpush3.bf16.msra.mxu0 %v6344_v24 }
 0x101   : > { %5789 = vmatpush3.bf16.msra.mxu1 %v6345_v26  ;;  %5634 = vmatprep.subr.bf16.mxu0 %v6530_v8 }
 0x102   : > { %5794 = vmatprep.subr.bf16.mxu1 %v6530_v8 }
 0x103   : > { %5631 = vmatmul.mubr.bf16.vlgmr.msra.gmra.mrb[0].mxu0 %v1019_v28 }
 0x104   : > { %5635 = vmatpush3.bf16.msra.mxu0 %v6346_v29  ;;  %5791 = vmatmul.mubr.bf16.vlgmr.msra.gmra.mrb[0].mxu1 %v2030_v30 }
 0x105   : > { %5795 = vmatpush3.bf16.msra.mxu1 %v6347_v31  ;;  %5636 = vmatprep.subr.bf16.mxu0 %v6530_v8 }
 0x106   : > { %5796 = vmatprep.subr.bf16.mxu1 %v6530_v8  ;;  %5650 = vmatprep.mubr.msk.bf16.mxu0 %vm6531_vm0, %v6530_v8 }
 0x107   : > { %5810 = vmatprep.mubr.msk.bf16.mxu1 %vm6531_vm0, %v6530_v8 }
 0x108   : > { %5637 = vmatpush3.bf16.msra.mxu0 %v6348_v32 }
 0x109   : > { %5797 = vmatpush3.bf16.msra.mxu1 %v6349_v33  ;;  %5638 = vmatprep.subr.bf16.mxu0 %v6530_v8 }
 0x10a   : > { %5798 = vmatprep.subr.bf16.mxu1 %v6530_v8 }
 0x10c   : > { %5639 = vmatpush3.bf16.msra.mxu0 %v6350_v34 }
 0x10d   : > { %5799 = vmatpush3.bf16.msra.mxu1 %v6351_v35  ;;  %5640 = vmatprep.subr.bf16.mxu0 %v6530_v8 }
 0x10e   : > { %5800 = vmatprep.subr.bf16.mxu1 %v6530_v8 }
 0x110   : > { %5641 = vmatpush3.bf16.msra.mxu0 %v6352_v38 }
 0x111   : > { %5801 = vmatpush3.bf16.msra.mxu1 %v6353_v41  ;;  %5642 = vmatprep.subr.bf16.mxu0 %v6530_v8 }
 0x112   : > { %5802 = vmatprep.subr.bf16.mxu1 %v6530_v8 }
 0x114   : > { %5643 = vmatpush3.bf16.msra.mxu0 %v6354_v48 }
 0x115   : > { %5803 = vmatpush3.bf16.msra.mxu1 %v6355_v49  ;;  %5644 = vmatprep.subr.bf16.mxu0 %v6530_v8 }
 0x116   : > { %5804 = vmatprep.subr.bf16.mxu1 %v6530_v8 }
 0x118   : > { %5645 = vmatpush3.bf16.msra.mxu0 %v6356_v58 }
 0x119   : > { %5805 = vmatpush3.bf16.msra.mxu1 %v6357_v60  ;;  %5646 = vmatprep.subr.bf16.mxu0 %v6530_v8 }
 0x11a   : > { %5806 = vmatprep.subr.bf16.mxu1 %v6530_v8 }
 0x11c   : > { %5647 = vmatpush3.bf16.msra.mxu0 %v6358_v2 }
 0x11d   : > { %5807 = vmatpush3.bf16.msra.mxu1 %v6359_v4  ;;  %5648 = vmatprep.subr.bf16.mxu0 %v6530_v8 }
 0x11e   : > { %5808 = vmatprep.subr.bf16.mxu1 %v6530_v8 }
 0x120   : > { %5649 = vmatpush3.bf16.msra.mxu0 %v6360_v9 }
 0x121   : > { %5809 = vmatpush3.bf16.msra.mxu1 %v6361_v11 }
 0x123   : > { %5651 = vmatmul.mubr.bf16.vlgmr.msra.gmra.mrb[0].mxu0 %v1149_v13 }
 0x124   : > { %5811 = vmatmul.mubr.bf16.vlgmr.msra.gmra.mrb[0].mxu1 %v2156_v14 }
 0x1f6   : > { %v1233_v15 = vpop.f32.mrb[0].mxu0 }
 0x1f7   : > { %1240 = vst [vmem:[%s7446_s2] sm:$0xf] %v1233_v15  ;;  %v2240_v16 = vpop.f32.mrb[0].mxu1  ;;  %v5652_v17 = vpop.f32.mrb[1].mxu0 }
 0x1f8   : > { %4812 = vst [vmem:[%s7446_s2 + $0x4] sm:$0xf] %v2240_v16  ;;  %v5812_v18 = vpop.f32.mrb[1].mxu1  ;;  %v1236_v19 = vpop.f32.mrb[2].mxu0 }
 0x1f9   : > { %v2243_v8 = vpop.f32.mrb[2].mxu1  ;;  %v5653_v20 = vpop.f32.mrb[3].mxu0 }
 0x1fa   : > { %v5813_v21 = vpop.f32.mrb[3].mxu1 }
 0x1fb PF: > { %p4813_p10 = scmp.eq.s32.totalorder %s6520_s11, 0 }
 0x1fc   : > { %s5198_s8 = sshll.u32 (!%p4813_p10), %s6520_s11, 9  ;;  %v6532_v22 = vmov (!%p4813_p10), 0.0   ;;  %vm6533_vm4 = vmmov (!%p4813_p10), 0   ;;  %v2281_v29 = vld [vmem:[%s6595_s27 + $0x1] ss:$0 sm:$0xff] (!%p4813_p10)  ;;  %vm2317_vm5 = vcmask (!%p4813_p10), 1041409  }
 0x1fd   : > { %2252 = sbr.rel (%p4813_p10) target bundleno = 985 (0x3d9), region = 59  ;;  %5814 = vmatprep.subr.bf16.mxu0 (!%p4813_p10), %v6532_v22  ;;  %5834 = vmatprep.subr.bf16.mxu1 (!%p4813_p10), %v6532_v22  ;;  %s7017_s16 = scalar_lea.vmem (!%p4813_p10), %s7445_s1, %s5198_s8  ;;  %v2282_v30 = vld [vmem:[%s6595_s27 + $0x11] ss:$0 sm:$0xff] (!%p4813_p10)  ;;  %v2283_v33 = vld [vmem:[%s6595_s27 + $0x21] ss:$0 sm:$0xff] (!%p4813_p10)  ;;  %v2285_v34 = vpack.c.bf16 (!%p4813_p10), %v2281_v29, %v2281_v29  ;;  %vm2319_vm6 = vcmask (!%p4813_p10), 1042434  }
 0x1fe   : > { %v6362_v23 = vld [vmem:[%s7017_s16 + $0x40] sm:$0xff] (!%p4813_p10)   ;;  %5830 = vmatprep.mubr.msk.bf16.mxu0 (!%p4813_p10), %vm6533_vm4, %v6532_v22  ;;  %5850 = vmatprep.mubr.msk.bf16.mxu1 (!%p4813_p10), %vm6533_vm4, %v6532_v22  ;;  %v6364_v25 = vld [vmem:[%s7017_s16 + $0x48] sm:$0xff] (!%p4813_p10)   ;;  %v6366_v27 = vld [vmem:[%s7017_s16 + $0x50] sm:$0xff] (!%p4813_p10)   ;;  %v2286_v35 = vpack.c.bf16 (!%p4813_p10), %v2282_v30, %v2282_v30  ;;  %v2287_v39 = vpack.c.bf16 (!%p4813_p10), %v2283_v33, %v2283_v33  ;;  %vm2321_vm7 = vcmask (!%p4813_p10), 1043459  }
 0x1ff   : > { %v6363_v24 = vld [vmem:[%s7017_s16] sm:$0xff] (!%p4813_p10)   ;;  %5815 = vmatpush3.bf16.msra.mxu0 (!%p4813_p10), %v6362_v23  ;;  %v6365_v26 = vld [vmem:[%s7017_s16 + $0x8] sm:$0xff] (!%p4813_p10)   ;;  %v6367_v28 = vld [vmem:[%s7017_s16 + $0x10] sm:$0xff] (!%p4813_p10)   ;;  %v2313_v40 = vunpack.c.l.b16 (!%p4813_p10), %v2285_v34 }
 0x200   : > { %5835 = vmatpush3.bf16.msra.mxu1 (!%p4813_p10), %v6363_v24  ;;  %5816 = vmatprep.subr.bf16.mxu0 (!%p4813_p10), %v6532_v22  ;;  %v6368_v31 = vld [vmem:[%s7017_s16 + $0x58] sm:$0xff] (!%p4813_p10)   ;;  %v2284_v36 = vld [vmem:[%s6595_s27 + $0x31] ss:$0 sm:$0xff] (!%p4813_p10)  ;;  %v6370_v37 = vld [vmem:[%s7017_s16 + $0x60] sm:$0xff] (!%p4813_p10)   ;;  %v2314_v41 = vunpack.c.l.b16 (!%p4813_p10), %v2286_v35  ;;  %v2315_v52 = vunpack.c.l.b16 (!%p4813_p10), %v2287_v39 }
 0x201   : > { %5836 = vmatprep.subr.bf16.mxu1 (!%p4813_p10), %v6532_v22  ;;  %v6369_v32 = vld [vmem:[%s7017_s16 + $0x18] sm:$0xff] (!%p4813_p10)   ;;  %v6371_v38 = vld [vmem:[%s7017_s16 + $0x20] sm:$0xff] (!%p4813_p10)   ;;  %v2255_v43 = vld [vmem:[%s6595_s27 + $0x10] ss:$0 sm:$0xff] (!%p4813_p10)  ;;  %v2288_v50 = vpack.c.bf16 (!%p4813_p10), %v2284_v36, %v2284_v36 }
 0x202   : > { %v2254_v42 = vld [vmem:[%s6595_s27] ss:$0 sm:$0xff] (!%p4813_p10)  ;;  %v2257_v45 = vld [vmem:[%s6595_s27 + $0x30] ss:$0 sm:$0xff] (!%p4813_p10)  ;;  %v2259_v47 = vpack.c.bf16 (!%p4813_p10), %v2255_v43, %v2255_v43  ;;  %v6372_v49 = vld [vmem:[%s7017_s16 + $0x68] sm:$0xff] (!%p4813_p10)   ;;  %v2318_v56 = vsel (!%p4813_p10), %vm2317_vm5, %v2314_v41, %v2313_v40 }
 0x203   : > { %5817 = vmatpush3.bf16.msra.mxu0 (!%p4813_p10), %v6364_v25  ;;  %v2256_v44 = vld [vmem:[%s6595_s27 + $0x20] ss:$0 sm:$0xff] (!%p4813_p10)  ;;  %v2258_v46 = vpack.c.bf16 (!%p4813_p10), %v2254_v42, %v2254_v42  ;;  %v6373_v51 = vld [vmem:[%s7017_s16 + $0x28] sm:$0xff] (!%p4813_p10)   ;;  %v2261_v53 = vpack.c.bf16 (!%p4813_p10), %v2257_v45, %v2257_v45  ;;  %v6374_v59 = vld [vmem:[%s7017_s16 + $0x70] sm:$0xff] (!%p4813_p10)   ;;  %v2316_v60 = vunpack.c.l.b16 (!%p4813_p10), %v2288_v50  ;;  %v2320_v62 = vsel (!%p4813_p10), %vm2319_vm6, %v2315_v52, %v2318_v56 }
 0x204   : > { %5837 = vmatpush3.bf16.msra.mxu1 %v6365_v26  ;;  %5818 = vmatprep.subr.bf16.mxu0 %v6532_v22  ;;  %v2260_v48 = vpack.c.bf16 %v2256_v44, %v2256_v44  ;;  %v2418_v55 = vunpack.c.l.b16 %v2259_v47  ;;  %v6375_v61 = vld [vmem:[%s7017_s16 + $0x30] sm:$0xff]   ;;  %v6376_v1 = vld [vmem:[%s7017_s16 + $0x78] sm:$0xff]   ;;  %v6378_v7 = vld [vmem:[%s7017_s16 + $0x80] sm:$0xff]  }
 0x205   : > { %5838 = vmatprep.subr.bf16.mxu1 %v6532_v22  ;;  %v2417_v54 = vunpack.c.l.b16 %v2258_v46  ;;  %v2420_v63 = vunpack.c.l.b16 %v2261_v53  ;;  %v2322_v2 = vsel %vm2321_vm7, %v2316_v60, %v2320_v62  ;;  %v6377_v3 = vld [vmem:[%s7017_s16 + $0x38] sm:$0xff]   ;;  %v6379_v9 = vld [vmem:[%s7017_s16 + $0xc0] sm:$0xff]   ;;  %v6380_v10 = vld [vmem:[%s7017_s16 + $0x88] sm:$0xff]  }
 0x206   : > { %v2419_v57 = vunpack.c.l.b16 %v2260_v48  ;;  %v2323_v5 = vpack.c.b16 %v2322_v2, %v2322_v2  ;;  %v6381_v11 = vld [vmem:[%s7017_s16 + $0xc8] sm:$0xff]   ;;  %v6382_v12 = vld [vmem:[%s7017_s16 + $0x90] sm:$0xff]   ;;  %v2514_v14 = vld [vmem:[%s6595_s27 + $0x2] ss:$0 sm:$0xff] }
 0x207   : > { %5819 = vmatpush3.bf16.msra.mxu0 %v6366_v27  ;;  %v2421_v58 = vsel %vm2317_vm5, %v2418_v55, %v2417_v54  ;;  %v6383_v13 = vld [vmem:[%s7017_s16 + $0xd0] sm:$0xff]   ;;  %v6384_v15 = vld [vmem:[%s7017_s16 + $0x98] sm:$0xff]   ;;  %v2644_v17 = vld [vmem:[%s6595_s27 + $0x3] ss:$0 sm:$0xff]  ;;  %v2518_v21 = vpack.c.bf16 %v2514_v14, %v2514_v14 }
 0x208   : > { %5839 = vmatpush3.bf16.msra.mxu1 %v6367_v28  ;;  %5820 = vmatprep.subr.bf16.mxu0 %v6532_v22  ;;  %v2422_v0 = vsel %vm2319_vm6, %v2419_v57, %v2421_v58  ;;  %v2515_v16 = vld [vmem:[%s6595_s27 + $0x12] ss:$0 sm:$0xff]  ;;  %v2645_v18 = vld [vmem:[%s6595_s27 + $0x13] ss:$0 sm:$0xff]  ;;  %v6385_v19 = vld [vmem:[%s7017_s16 + $0xd8] sm:$0xff]   ;;  %v2648_v25 = vpack.c.bf16 %v2644_v17, %v2644_v17 }
 0x209   : > { %5840 = vmatprep.subr.bf16.mxu1 %v6532_v22  ;;  %v2423_v4 = vsel %vm2321_vm7, %v2420_v63, %v2422_v0  ;;  %v6386_v8 = vld [vmem:[%s7017_s16 + $0xa0] sm:$0xff]   ;;  %v2519_v23 = vpack.c.bf16 %v2515_v16, %v2515_v16  ;;  %v2649_v26 = vpack.c.bf16 %v2645_v18, %v2645_v18  ;;  %v2517_v28 = vld [vmem:[%s6595_s27 + $0x32] ss:$0 sm:$0xff]  ;;  %v2546_v30 = vunpack.c.l.b16 %v2518_v21  ;;  %v6388_v36 = vld [vmem:[%s7017_s16 + $0xa8] sm:$0xff]  }
 0x20a   : > { %v2424_v6 = vpack.c.b16 %v2423_v4, %v2423_v4  ;;  %v2516_v20 = vld [vmem:[%s6595_s27 + $0x22] ss:$0 sm:$0xff]  ;;  %v2646_v24 = vld [vmem:[%s6595_s27 + $0x23] ss:$0 sm:$0xff]  ;;  %v2676_v34 = vunpack.c.l.b16 %v2648_v25  ;;  %v6390_v44 = vld [vmem:[%s7017_s16 + $0xb0] sm:$0xff]  }
 0x20b   : > { %5821 = vmatpush3.bf16.msra.mxu0 %v6368_v31  ;;  %v6387_v27 = vld [vmem:[%s7017_s16 + $0xe0] sm:$0xff]   ;;  %v2520_v29 = vpack.c.bf16 %v2516_v20, %v2516_v20  ;;  %v2547_v31 = vunpack.c.l.b16 %v2519_v23  ;;  %v2650_v33 = vpack.c.bf16 %v2646_v24, %v2646_v24  ;;  %v2677_v35 = vunpack.c.l.b16 %v2649_v26  ;;  %v6391_v46 = vld [vmem:[%s7017_s16 + $0xf0] sm:$0xff]   ;;  %v6392_v50 = vld [vmem:[%s7017_s16 + $0xb8] sm:$0xff]  }
 0x20c   : > { %5841 = vmatpush3.bf16.msra.mxu1 %v6369_v32  ;;  %5822 = vmatprep.subr.bf16.mxu0 %v6532_v22  ;;  %v2647_v32 = vld [vmem:[%s6595_s27 + $0x33] ss:$0 sm:$0xff]  ;;  %v6393_v52 = vld [vmem:[%s7017_s16 + $0xf8] sm:$0xff]   ;;  %v6394_v56 = vld [vmem:[%s7017_s16 + $0x100] sm:$0xff]  }
 0x20d   : > { %5842 = vmatprep.subr.bf16.mxu1 %v6532_v22  ;;  %v2548_v39 = vunpack.c.l.b16 %v2520_v29  ;;  %v2651_v40 = vpack.c.bf16 %v2647_v32, %v2647_v32  ;;  %v2550_v41 = vsel %vm2317_vm5, %v2547_v31, %v2546_v30  ;;  %v2678_v42 = vunpack.c.l.b16 %v2650_v33  ;;  %v6395_v57 = vld [vmem:[%s7017_s16 + $0x140] sm:$0xff]   ;;  %v6396_v58 = vld [vmem:[%s7017_s16 + $0x108] sm:$0xff]   ;;  %v6398_v60 = vld [vmem:[%s7017_s16 + $0x110] sm:$0xff]  }
 0x20e   : > { %v2680_v43 = vsel %vm2317_vm5, %v2677_v35, %v2676_v34  ;;  %v6400_v62 = vld [vmem:[%s7017_s16 + $0x118] sm:$0xff]   ;;  %v2774_v63 = vld [vmem:[%s6595_s27 + $0x4] ss:$0 sm:$0xff]  ;;  %v2775_v0 = vld [vmem:[%s6595_s27 + $0x14] ss:$0 sm:$0xff] }
 0x20f   : > { %5823 = vmatpush3.bf16.msra.mxu0 %v6370_v37  ;;  %v2521_v37 = vpack.c.bf16 %v2517_v28, %v2517_v28  ;;  %v2551_v47 = vsel %vm2319_vm6, %v2548_v39, %v2550_v41  ;;  %v2679_v48 = vunpack.c.l.b16 %v2651_v40  ;;  %v2905_v2 = vld [vmem:[%s6595_s27 + $0x15] ss:$0 sm:$0xff]  ;;  %v6402_v4 = vld [vmem:[%s7017_s16 + $0x120] sm:$0xff]   ;;  %v6404_v20 = vld [vmem:[%s7017_s16 + $0x128] sm:$0xff]  }
 0x210   : > { %5843 = vmatpush3.bf16.msra.mxu1 %v6371_v38  ;;  %5824 = vmatprep.subr.bf16.mxu0 %v6532_v22  ;;  %v6389_v38 = vld [vmem:[%s7017_s16 + $0xe8] sm:$0xff]   ;;  %v2907_v17 = vld [vmem:[%s6595_s27 + $0x35] ss:$0 sm:$0xff]  ;;  %v6408_v35 = vld [vmem:[%s7017_s16 + $0x138] sm:$0xff]  }
 0x211   : > { %5844 = vmatprep.subr.bf16.mxu1 %v6532_v22  ;;  %v2549_v45 = vunpack.c.l.b16 %v2521_v37  ;;  %v6405_v23 = vld [vmem:[%s7017_s16 + $0x168] sm:$0xff]   ;;  %v2911_v25 = vpack.c.bf16 %v2907_v17, %v2907_v17  ;;  %v6406_v29 = vld [vmem:[%s7017_s16 + $0x130] sm:$0xff]   ;;  %v6409_v37 = vld [vmem:[%s7017_s16 + $0x178] sm:$0xff]  }
 0x212   : > { %v6407_v31 = vld [vmem:[%s7017_s16 + $0x170] sm:$0xff]   ;;  %v6410_v41 = vld [vmem:[%s7017_s16 + $0x180] sm:$0xff]  }
 0x213   : > { %5825 = vmatpush3.bf16.msra.mxu0 %v6372_v49  ;;  %v2681_v49 = vsel %vm2319_vm6, %v2678_v42, %v2680_v43  ;;  %v2939_v33 = vunpack.c.l.b16 %v2911_v25  ;;  %v6411_v42 = vld [vmem:[%s7017_s16 + $0x1c0] sm:$0xff]   ;;  %v6412_v43 = vld [vmem:[%s7017_s16 + $0x188] sm:$0xff]  }
 0x214   : > { %5845 = vmatpush3.bf16.msra.mxu1 %v6373_v51  ;;  %5826 = vmatprep.subr.bf16.mxu0 %v6532_v22  ;;  %v2552_v51 = vsel %vm2321_vm7, %v2549_v45, %v2551_v47  ;;  %v2682_v53 = vsel %vm2321_vm7, %v2679_v48, %v2681_v49  ;;  %v6414_v45 = vld [vmem:[%s7017_s16 + $0x190] sm:$0xff]   ;;  %v3034_v47 = vld [vmem:[%s6595_s27 + $0x6] ss:$0 sm:$0xff]  ;;  %v6416_v48 = vld [vmem:[%s7017_s16 + $0x198] sm:$0xff]  }
 0x215   : > { %5846 = vmatprep.subr.bf16.mxu1 %v6532_v22  ;;  %v2553_v54 = vpack.c.b16 %v2552_v51, %v2552_v51  ;;  %v2683_v55 = vpack.c.b16 %v2682_v53, %v2682_v53  ;;  %v3035_v49 = vld [vmem:[%s6595_s27 + $0x16] ss:$0 sm:$0xff]  ;;  %v3165_v51 = vld [vmem:[%s6595_s27 + $0x17] ss:$0 sm:$0xff]  ;;  %v3036_v53 = vld [vmem:[%s6595_s27 + $0x26] ss:$0 sm:$0xff] }
 0x217   : > { %5827 = vmatpush3.bf16.msra.mxu0 %v6374_v59  ;;  %v6397_v59 = vld [vmem:[%s7017_s16 + $0x148] sm:$0xff]  }
 0x218   : > { %5847 = vmatpush3.bf16.msra.mxu1 %v6375_v61  ;;  %5828 = vmatprep.subr.bf16.mxu0 %v6532_v22  ;;  %v6399_v61 = vld [vmem:[%s7017_s16 + $0x150] sm:$0xff]  }
 0x219   : > { %5848 = vmatprep.subr.bf16.mxu1 %v6532_v22 }
 0x21b   : > { %5829 = vmatpush3.bf16.msra.mxu0 %v6376_v1  ;;  %v2904_v1 = vld [vmem:[%s6595_s27 + $0x5] ss:$0 sm:$0xff] }
 0x21c   : > { %5849 = vmatpush3.bf16.msra.mxu1 %v6377_v3  ;;  %5854 = vmatprep.subr.bf16.mxu0 %v6532_v22  ;;  %v6401_v3 = vld [vmem:[%s7017_s16 + $0x158] sm:$0xff]  }
 0x21d   : > { %5874 = vmatprep.subr.bf16.mxu1 %v6532_v22 }
 0x21e   : > { %5831 = vmatmul.mubr.bf16.vlgmr.msra.gmra.mrb[0].mxu0 %v2323_v5  ;;  %v2776_v5 = vld [vmem:[%s6595_s27 + $0x24] ss:$0 sm:$0xff] }
 0x21f   : > { %5851 = vmatmul.mubr.bf16.vlgmr.msra.gmra.mrb[0].mxu1 %v2424_v6  ;;  %5855 = vmatpush3.bf16.msra.mxu0 %v6378_v7  ;;  %v2778_v6 = vpack.c.bf16 %v2774_v63, %v2774_v63  ;;  %v2779_v7 = vpack.c.bf16 %v2775_v0, %v2775_v0  ;;  %v2780_v14 = vpack.c.bf16 %v2776_v5, %v2776_v5  ;;  %v6420_v5 = vld [vmem:[%s7017_s16 + $0x1a8] sm:$0xff]  }
 0x220   : > { %5875 = vmatpush3.bf16.msra.mxu1 %v6379_v9  ;;  %5856 = vmatprep.subr.bf16.mxu0 %v6532_v22  ;;  %v2906_v9 = vld [vmem:[%s6595_s27 + $0x25] ss:$0 sm:$0xff] }
 0x221   : > { %5876 = vmatprep.subr.bf16.mxu1 %v6532_v22  ;;  %5870 = vmatprep.mubr.msk.bf16.mxu0 %vm6533_vm4, %v6532_v22  ;;  %v2807_v16 = vunpack.c.l.b16 %v2779_v7  ;;  %v2910_v18 = vpack.c.bf16 %v2906_v9, %v2906_v9  ;;  %v2808_v24 = vunpack.c.l.b16 %v2780_v14  ;;  %v6421_v7 = vld [vmem:[%s7017_s16 + $0x1e8] sm:$0xff]   ;;  %v6422_v14 = vld [vmem:[%s7017_s16 + $0x1b0] sm:$0xff]  }
 0x222   : > { %5890 = vmatprep.mubr.msk.bf16.mxu1 %vm6533_vm4, %v6532_v22 }
 0x223   : > { %5857 = vmatpush3.bf16.msra.mxu0 %v6380_v10  ;;  %v2908_v10 = vpack.c.bf16 %v2904_v1, %v2904_v1  ;;  %v3167_v1 = vld [vmem:[%s6595_s27 + $0x37] ss:$0 sm:$0xff] }
 0x224   : > { %5877 = vmatpush3.bf16.msra.mxu1 %v6381_v11  ;;  %5858 = vmatprep.subr.bf16.mxu0 %v6532_v22  ;;  %v2909_v11 = vpack.c.bf16 %v2905_v2, %v2905_v2 }
 0x225   : > { %5878 = vmatprep.subr.bf16.mxu1 %v6532_v22 }
 0x227   : > { %5859 = vmatpush3.bf16.msra.mxu0 %v6382_v12  ;;  %v6403_v12 = vld [vmem:[%s7017_s16 + $0x160] sm:$0xff]  }
 0x228   : > { %5879 = vmatpush3.bf16.msra.mxu1 %v6383_v13  ;;  %5860 = vmatprep.subr.bf16.mxu0 %v6532_v22  ;;  %v2777_v13 = vld [vmem:[%s6595_s27 + $0x34] ss:$0 sm:$0xff] }
 0x229   : > { %5880 = vmatprep.subr.bf16.mxu1 %v6532_v22  ;;  %v2781_v21 = vpack.c.bf16 %v2777_v13, %v2777_v13 }
 0x22b   : > { %5861 = vmatpush3.bf16.msra.mxu0 %v6384_v15  ;;  %v2806_v15 = vunpack.c.l.b16 %v2778_v6  ;;  %v2809_v30 = vunpack.c.l.b16 %v2781_v21  ;;  %v6425_v21 = vld [vmem:[%s7017_s16 + $0x1f8] sm:$0xff]  }
 0x22c   : > { %5881 = vmatpush3.bf16.msra.mxu1 %v6385_v19  ;;  %5862 = vmatprep.subr.bf16.mxu0 %v6532_v22  ;;  %v2936_v19 = vunpack.c.l.b16 %v2908_v10  ;;  %v3171_v10 = vpack.c.bf16 %v3167_v1, %v3167_v1 }
 0x22d   : > { %5882 = vmatprep.subr.bf16.mxu1 %v6532_v22  ;;  %v2810_v26 = vsel %vm2317_vm5, %v2807_v16, %v2806_v15  ;;  %v6423_v16 = vld [vmem:[%s7017_s16 + $0x1f0] sm:$0xff]  }
 0x22e   : > { %v2811_v32 = vsel %vm2319_vm6, %v2808_v24, %v2810_v26  ;;  %v6426_v26 = vld [vmem:[%s7017_s16 + $0x40] sm:$0xff]  }
 0x22f   : > { %5863 = vmatpush3.bf16.msra.mxu0 %v6386_v8  ;;  %v2937_v8 = vunpack.c.l.b16 %v2909_v11 }
 0x230   : > { %5883 = vmatpush3.bf16.msra.mxu1 %v6387_v27  ;;  %5864 = vmatprep.subr.bf16.mxu0 %v6532_v22  ;;  %v2938_v27 = vunpack.c.l.b16 %v2910_v18  ;;  %v3199_v18 = vunpack.c.l.b16 %v3171_v10 }
 0x231   : > { %5884 = vmatprep.subr.bf16.mxu1 %v6532_v22  ;;  %v2940_v28 = vsel %vm2317_vm5, %v2937_v8, %v2936_v19  ;;  %v6424_v8 = vld [vmem:[%s7017_s16 + $0x1b8] sm:$0xff]  }
 0x232   : > { %v2941_v34 = vsel %vm2319_vm6, %v2938_v27, %v2940_v28  ;;  %v6427_v27 = vld [vmem:[%s7017_s16] sm:$0xff]   ;;  %v6428_v28 = vld [vmem:[%s7017_s16 + $0x48] sm:$0xff]  }
 0x233   : > { %5865 = vmatpush3.bf16.msra.mxu0 %v6388_v36  ;;  %v2812_v36 = vsel %vm2321_vm7, %v2809_v30, %v2811_v32  ;;  %v6430_v30 = vld [vmem:[%s7017_s16 + $0x50] sm:$0xff]   ;;  %v3322_v32 = vld [vmem:[%s6595_s27 + $0x9] ss:$0 sm:$0xff] }
 0x234   : > { %5885 = vmatpush3.bf16.msra.mxu1 %v6389_v38  ;;  %5866 = vmatprep.subr.bf16.mxu0 %v6532_v22  ;;  %v2942_v38 = vsel %vm2321_vm7, %v2939_v33, %v2941_v34  ;;  %v2813_v39 = vpack.c.b16 %v2812_v36, %v2812_v36  ;;  %v6432_v33 = vld [vmem:[%s7017_s16 + $0x58] sm:$0xff]  }
 0x235   : > { %5886 = vmatprep.subr.bf16.mxu1 %v6532_v22  ;;  %v2943_v40 = vpack.c.b16 %v2942_v38, %v2942_v38  ;;  %v3323_v34 = vld [vmem:[%s6595_s27 + $0x19] ss:$0 sm:$0xff]  ;;  %v3299_v36 = vld [vmem:[%s6595_s27 + $0x18] ss:$0 sm:$0xff]  ;;  %v6434_v38 = vld [vmem:[%s7017_s16 + $0x60] sm:$0xff]  }
 0x237   : > { %5867 = vmatpush3.bf16.msra.mxu0 %v6390_v44  ;;  %v6413_v44 = vld [vmem:[%s7017_s16 + $0x1c8] sm:$0xff]  }
 0x238   : > { %5887 = vmatpush3.bf16.msra.mxu1 %v6391_v46  ;;  %5868 = vmatprep.subr.bf16.mxu0 %v6532_v22  ;;  %v6415_v46 = vld [vmem:[%s7017_s16 + $0x1d0] sm:$0xff]  }
 0x239   : > { %5888 = vmatprep.subr.bf16.mxu1 %v6532_v22 }
 0x23b   : > { %5869 = vmatpush3.bf16.msra.mxu0 %v6392_v50  ;;  %v3164_v50 = vld [vmem:[%s6595_s27 + $0x7] ss:$0 sm:$0xff] }
 0x23c   : > { %5889 = vmatpush3.bf16.msra.mxu1 %v6393_v52  ;;  %5894 = vmatprep.subr.bf16.mxu0 %v6532_v22  ;;  %v6417_v52 = vld [vmem:[%s7017_s16 + $0x1d8] sm:$0xff]  }
 0x23d   : > { %5914 = vmatprep.subr.bf16.mxu1 %v6532_v22 }
 0x23e   : > { %5871 = vmatmul.mubr.bf16.vlgmr.msra.gmra.mrb[4].mxu0 %v2553_v54  ;;  %v3038_v54 = vpack.c.bf16 %v3034_v47, %v3034_v47 }
 0x23f   : > { %5891 = vmatmul.mubr.bf16.vlgmr.msra.gmra.mrb[4].mxu1 %v2683_v55  ;;  %5895 = vmatpush3.bf16.msra.mxu0 %v6394_v56  ;;  %v3039_v55 = vpack.c.bf16 %v3035_v49, %v3035_v49  ;;  %v3166_v56 = vld [vmem:[%s6595_s27 + $0x27] ss:$0 sm:$0xff] }
 0x240   : > { %5915 = vmatpush3.bf16.msra.mxu1 %v6395_v57  ;;  %5896 = vmatprep.subr.bf16.mxu0 %v6532_v22  ;;  %v3168_v57 = vpack.c.bf16 %v3164_v50, %v3164_v50  ;;  %v3066_v63 = vunpack.c.l.b16 %v3038_v54  ;;  %v3170_v2 = vpack.c.bf16 %v3166_v56, %v3166_v56  ;;  %v3301_v50 = vld [vmem:[%s6595_s27 + $0x38] ss:$0 sm:$0xff]  ;;  %v6436_v54 = vld [vmem:[%s7017_s16 + $0x68] sm:$0xff]  }
 0x241   : > { %5916 = vmatprep.subr.bf16.mxu1 %v6532_v22  ;;  %5910 = vmatprep.mubr.msk.bf16.mxu0 %vm6533_vm4, %v6532_v22  ;;  %v3067_v0 = vunpack.c.l.b16 %v3039_v55  ;;  %v6437_v56 = vld [vmem:[%s7017_s16 + $0x28] sm:$0xff]  }
 0x242   : > { %5930 = vmatprep.mubr.msk.bf16.mxu1 %vm6533_vm4, %v6532_v22 }
 0x243   : > { %5897 = vmatpush3.bf16.msra.mxu0 %v6396_v58  ;;  %v3169_v58 = vpack.c.bf16 %v3165_v51, %v3165_v51  ;;  %v3070_v11 = vsel %vm2317_vm5, %v3067_v0, %v3066_v63  ;;  %v6439_v0 = vld [vmem:[%s7017_s16 + $0x30] sm:$0xff]  }
 0x244   : > { %5917 = vmatpush3.bf16.msra.mxu1 %v6397_v59  ;;  %5898 = vmatprep.subr.bf16.mxu0 %v6532_v22  ;;  %v6418_v59 = vld [vmem:[%s7017_s16 + $0x1a0] sm:$0xff]  }
 0x245   : > { %5918 = vmatprep.subr.bf16.mxu1 %v6532_v22 }
 0x247   : > { %5899 = vmatpush3.bf16.msra.mxu0 %v6398_v60  ;;  %v6419_v60 = vld [vmem:[%s7017_s16 + $0x1e0] sm:$0xff]  }
 0x248   : > { %5919 = vmatpush3.bf16.msra.mxu1 %v6399_v61  ;;  %5900 = vmatprep.subr.bf16.mxu0 %v6532_v22  ;;  %v3037_v61 = vld [vmem:[%s6595_s27 + $0x36] ss:$0 sm:$0xff] }
 0x249   : > { %5920 = vmatprep.subr.bf16.mxu1 %v6532_v22  ;;  %v3041_v6 = vpack.c.bf16 %v3037_v61, %v3037_v61 }
 0x24b   : > { %5901 = vmatpush3.bf16.msra.mxu0 %v6400_v62  ;;  %v3040_v62 = vpack.c.bf16 %v3036_v53, %v3036_v53  ;;  %v3069_v15 = vunpack.c.l.b16 %v3041_v6  ;;  %v6441_v6 = vld [vmem:[%s7017_s16 + $0x38] sm:$0xff]  }
 0x24c   : > { %5921 = vmatpush3.bf16.msra.mxu1 %v6401_v3  ;;  %5902 = vmatprep.subr.bf16.mxu0 %v6532_v22  ;;  %v3196_v3 = vunpack.c.l.b16 %v3168_v57 }
 0x24d   : > { %5922 = vmatprep.subr.bf16.mxu1 %v6532_v22  ;;  %v3068_v9 = vunpack.c.l.b16 %v3040_v62  ;;  %v6438_v62 = vld [vmem:[%s7017_s16 + $0x70] sm:$0xff]  }
 0x24f   : > { %5903 = vmatpush3.bf16.msra.mxu0 %v6402_v4  ;;  %v3197_v4 = vunpack.c.l.b16 %v3169_v58  ;;  %v3071_v17 = vsel %vm2319_vm6, %v3068_v9, %v3070_v11  ;;  %v3305_v58 = vpack.c.bf16 %v3301_v50, %v3301_v50  ;;  %v6442_v11 = vld [vmem:[%s7017_s16 + $0x80] sm:$0xff]  }
 0x250   : > { %5923 = vmatpush3.bf16.msra.mxu1 %v6403_v12  ;;  %5904 = vmatprep.subr.bf16.mxu0 %v6532_v22  ;;  %v3198_v12 = vunpack.c.l.b16 %v3170_v2 }
 0x251   : > { %5924 = vmatprep.subr.bf16.mxu1 %v6532_v22  ;;  %v3200_v13 = vsel %vm2317_vm5, %v3197_v4, %v3196_v3  ;;  %v3454_v2 = vunpack.c.l.b16 %v3305_v58  ;;  %v6440_v4 = vld [vmem:[%s7017_s16 + $0x78] sm:$0xff]  }
 0x252   : > { %v3201_v19 = vsel %vm2319_vm6, %v3198_v12, %v3200_v13  ;;  %v6443_v12 = vld [vmem:[%s7017_s16 + $0xc0] sm:$0xff]   ;;  %v6444_v13 = vld [vmem:[%s7017_s16 + $0x88] sm:$0xff]  }
 0x253   : > { %5905 = vmatpush3.bf16.msra.mxu0 %v6404_v20  ;;  %v3072_v20 = vsel %vm2321_vm7, %v3069_v15, %v3071_v17  ;;  %v6446_v15 = vld [vmem:[%s7017_s16 + $0x90] sm:$0xff]   ;;  %v3548_v17 = vld [vmem:[%s6595_s27 + $0xa] ss:$0 sm:$0xff] }
 0x254   : > { %5925 = vmatpush3.bf16.msra.mxu1 %v6405_v23  ;;  %5906 = vmatprep.subr.bf16.mxu0 %v6532_v22  ;;  %v3202_v23 = vsel %vm2321_vm7, %v3199_v18, %v3201_v19  ;;  %v3073_v24 = vpack.c.b16 %v3072_v20, %v3072_v20  ;;  %v3549_v18 = vld [vmem:[%s6595_s27 + $0x1a] ss:$0 sm:$0xff]  ;;  %v3675_v20 = vld [vmem:[%s6595_s27 + $0x1b] ss:$0 sm:$0xff] }
 0x255   : > { %5926 = vmatprep.subr.bf16.mxu1 %v6532_v22  ;;  %v3203_v25 = vpack.c.b16 %v3202_v23, %v3202_v23  ;;  %v6448_v19 = vld [vmem:[%s7017_s16 + $0x98] sm:$0xff]   ;;  %v3550_v23 = vld [vmem:[%s6595_s27 + $0x2a] ss:$0 sm:$0xff] }
 0x257   : > { %5907 = vmatpush3.bf16.msra.mxu0 %v6406_v29  ;;  %v6429_v29 = vld [vmem:[%s7017_s16 + $0x8] sm:$0xff]  }
 0x258   : > { %5927 = vmatpush3.bf16.msra.mxu1 %v6407_v31  ;;  %5908 = vmatprep.subr.bf16.mxu0 %v6532_v22  ;;  %v6431_v31 = vld [vmem:[%s7017_s16 + $0x10] sm:$0xff]  }
 0x259   : > { %5928 = vmatprep.subr.bf16.mxu1 %v6532_v22 }
 0x25b   : > { %5909 = vmatpush3.bf16.msra.mxu0 %v6408_v35  ;;  %v3298_v35 = vld [vmem:[%s6595_s27 + $0x8] ss:$0 sm:$0xff] }
 0x25c   : > { %5929 = vmatpush3.bf16.msra.mxu1 %v6409_v37  ;;  %5934 = vmatprep.subr.bf16.mxu0 %v6532_v22  ;;  %v6433_v37 = vld [vmem:[%s7017_s16 + $0x18] sm:$0xff]  }
 0x25d   : > { %5954 = vmatprep.subr.bf16.mxu1 %v6532_v22 }
 0x25e   : > { %5911 = vmatmul.mubr.bf16.vlgmr.msra.gmra.mrb[8].mxu0 %v2813_v39  ;;  %v3324_v39 = vld [vmem:[%s6595_s27 + $0x29] ss:$0 sm:$0xff] }
 0x25f   : > { %5931 = vmatmul.mubr.bf16.vlgmr.msra.gmra.mrb[8].mxu1 %v2943_v40  ;;  %5935 = vmatpush3.bf16.msra.mxu0 %v6410_v41  ;;  %v3326_v40 = vpack.c.bf16 %v3322_v32, %v3322_v32  ;;  %v3327_v41 = vpack.c.bf16 %v3323_v34, %v3323_v34  ;;  %v3328_v47 = vpack.c.bf16 %v3324_v39, %v3324_v39  ;;  %v6452_v39 = vld [vmem:[%s7017_s16 + $0xa8] sm:$0xff]  }
 0x260   : > { %5955 = vmatpush3.bf16.msra.mxu1 %v6411_v42  ;;  %5936 = vmatprep.subr.bf16.mxu0 %v6532_v22  ;;  %v3300_v42 = vld [vmem:[%s6595_s27 + $0x28] ss:$0 sm:$0xff]  ;;  %v3554_v32 = vpack.c.bf16 %v3550_v23, %v3550_v23 }
 0x261   : > { %5956 = vmatprep.subr.bf16.mxu1 %v6532_v22  ;;  %5950 = vmatprep.mubr.msk.bf16.mxu0 %vm6533_vm4, %v6532_v22  ;;  %v3351_v49 = vunpack.c.l.b16 %v3327_v41  ;;  %v3304_v51 = vpack.c.bf16 %v3300_v42, %v3300_v42  ;;  %v3352_v57 = vunpack.c.l.b16 %v3328_v47  ;;  %v6453_v41 = vld [vmem:[%s7017_s16 + $0xe8] sm:$0xff]   ;;  %v6454_v47 = vld [vmem:[%s7017_s16 + $0xb0] sm:$0xff]  }
 0x262   : > { %5970 = vmatprep.mubr.msk.bf16.mxu1 %vm6533_vm4, %v6532_v22  ;;  %v3578_v42 = vunpack.c.l.b16 %v3554_v32  ;;  %v6470_v32 = vld [vmem:[%s7017_s16 + $0x130] sm:$0xff]  }
 0x263   : > { %5937 = vmatpush3.bf16.msra.mxu0 %v6412_v43  ;;  %v3302_v43 = vpack.c.bf16 %v3298_v35, %v3298_v35  ;;  %v3677_v35 = vld [vmem:[%s6595_s27 + $0x3b] ss:$0 sm:$0xff] }
 0x264   : > { %5957 = vmatpush3.bf16.msra.mxu1 %v6413_v44  ;;  %5938 = vmatprep.subr.bf16.mxu0 %v6532_v22  ;;  %v3303_v44 = vpack.c.bf16 %v3299_v36, %v3299_v36 }
 0x265   : > { %5958 = vmatprep.subr.bf16.mxu1 %v6532_v22 }
 0x266   : > { %v3452_v53 = vunpack.c.l.b16 %v3303_v44 }
 0x267   : > { %5939 = vmatpush3.bf16.msra.mxu0 %v6414_v45  ;;  %v6435_v45 = vld [vmem:[%s7017_s16 + $0x20] sm:$0xff]  }
 0x268   : > { %5959 = vmatpush3.bf16.msra.mxu1 %v6415_v46  ;;  %5940 = vmatprep.subr.bf16.mxu0 %v6532_v22  ;;  %v3325_v46 = vld [vmem:[%s6595_s27 + $0x39] ss:$0 sm:$0xff] }
 0x269   : > { %5960 = vmatprep.subr.bf16.mxu1 %v6532_v22  ;;  %v3329_v55 = vpack.c.bf16 %v3325_v46, %v3325_v46 }
 0x26b   : > { %5941 = vmatpush3.bf16.msra.mxu0 %v6416_v48  ;;  %v3350_v48 = vunpack.c.l.b16 %v3326_v40  ;;  %v3353_v63 = vunpack.c.l.b16 %v3329_v55  ;;  %v6457_v55 = vld [vmem:[%s7017_s16 + $0xf8] sm:$0xff]  }
 0x26c   : > { %5961 = vmatpush3.bf16.msra.mxu1 %v6417_v52  ;;  %5942 = vmatprep.subr.bf16.mxu0 %v6532_v22  ;;  %v3451_v52 = vunpack.c.l.b16 %v3302_v43  ;;  %v3681_v43 = vpack.c.bf16 %v3677_v35, %v3677_v35 }
 0x26d   : > { %5962 = vmatprep.subr.bf16.mxu1 %v6532_v22 }
 0x26e   : > { %v3455_v61 = vsel %vm2317_vm5, %v3452_v53, %v3451_v52  ;;  %v6456_v53 = vld [vmem:[%s7017_s16 + $0xb8] sm:$0xff]  }
 0x26f   : > { %5943 = vmatpush3.bf16.msra.mxu0 %v6418_v59  ;;  %v3354_v59 = vsel %vm2317_vm5, %v3351_v49, %v3350_v48  ;;  %v6455_v49 = vld [vmem:[%s7017_s16 + $0xf0] sm:$0xff]  }
 0x270   : > { %5963 = vmatpush3.bf16.msra.mxu1 %v6419_v60  ;;  %5944 = vmatprep.subr.bf16.mxu0 %v6532_v22  ;;  %v3453_v60 = vunpack.c.l.b16 %v3304_v51  ;;  %v3355_v1 = vsel %vm2319_vm6, %v3352_v57, %v3354_v59  ;;  %v3705_v51 = vunpack.c.l.b16 %v3681_v43  ;;  %v6458_v59 = vld [vmem:[%s7017_s16 + $0x100] sm:$0xff]  }
 0x271   : > { %5964 = vmatprep.subr.bf16.mxu1 %v6532_v22 }
 0x272   : > { %v3456_v3 = vsel %vm2319_vm6, %v3453_v60, %v3455_v61  ;;  %v6459_v60 = vld [vmem:[%s7017_s16 + $0x140] sm:$0xff]   ;;  %v6460_v61 = vld [vmem:[%s7017_s16 + $0x108] sm:$0xff]  }
 0x273   : > { %5945 = vmatpush3.bf16.msra.mxu0 %v6420_v5  ;;  %v3356_v5 = vsel %vm2321_vm7, %v3353_v63, %v3355_v1  ;;  %v6462_v63 = vld [vmem:[%s7017_s16 + $0x110] sm:$0xff]   ;;  %v3800_v1 = vld [vmem:[%s6595_s27 + $0xc] ss:$0 sm:$0xff] }
 0x274   : > { %5965 = vmatpush3.bf16.msra.mxu1 %v6421_v7  ;;  %5946 = vmatprep.subr.bf16.mxu0 %v6532_v22  ;;  %v3457_v7 = vsel %vm2321_vm7, %v3454_v2, %v3456_v3  ;;  %v3357_v9 = vpack.c.b16 %v3356_v5, %v3356_v5  ;;  %v3801_v2 = vld [vmem:[%s6595_s27 + $0x1c] ss:$0 sm:$0xff]  ;;  %v3927_v5 = vld [vmem:[%s6595_s27 + $0x1d] ss:$0 sm:$0xff] }
 0x275   : > { %5966 = vmatprep.subr.bf16.mxu1 %v6532_v22  ;;  %v3458_v10 = vpack.c.b16 %v3457_v7, %v3457_v7  ;;  %v6464_v3 = vld [vmem:[%s7017_s16 + $0x118] sm:$0xff]   ;;  %v3802_v7 = vld [vmem:[%s6595_s27 + $0x2c] ss:$0 sm:$0xff] }
 0x277   : > { %5947 = vmatpush3.bf16.msra.mxu0 %v6422_v14  ;;  %v6445_v14 = vld [vmem:[%s7017_s16 + $0xc8] sm:$0xff]  }
 0x278   : > { %5967 = vmatpush3.bf16.msra.mxu1 %v6423_v16  ;;  %5948 = vmatprep.subr.bf16.mxu0 %v6532_v22  ;;  %v6447_v16 = vld [vmem:[%s7017_s16 + $0xd0] sm:$0xff]  }
 0x279   : > { %5968 = vmatprep.subr.bf16.mxu1 %v6532_v22 }
 0x27b   : > { %5949 = vmatpush3.bf16.msra.mxu0 %v6424_v8  ;;  %v3674_v8 = vld [vmem:[%s6595_s27 + $0xb] ss:$0 sm:$0xff] }
 0x27c   : > { %5969 = vmatpush3.bf16.msra.mxu1 %v6425_v21  ;;  %5974 = vmatprep.subr.bf16.mxu0 %v6532_v22  ;;  %v6449_v21 = vld [vmem:[%s7017_s16 + $0xd8] sm:$0xff]  }
 0x27d   : > { %5994 = vmatprep.subr.bf16.mxu1 %v6532_v22 }
 0x27e   : > { %5951 = vmatmul.mubr.bf16.vlgmr.msra.gmra.mrb[12].mxu0 %v3073_v24  ;;  %v3552_v24 = vpack.c.bf16 %v3548_v17, %v3548_v17  ;;  %v3806_v17 = vpack.c.bf16 %v3802_v7, %v3802_v7 }
 0x27f   : > { %5971 = vmatmul.mubr.bf16.vlgmr.msra.gmra.mrb[12].mxu1 %v3203_v25  ;;  %5975 = vmatpush3.bf16.msra.mxu0 %v6426_v26  ;;  %v3553_v25 = vpack.c.bf16 %v3549_v18, %v3549_v18  ;;  %v3676_v26 = vld [vmem:[%s6595_s27 + $0x2b] ss:$0 sm:$0xff] }
 0x280   : > { %5995 = vmatpush3.bf16.msra.mxu1 %v6427_v27  ;;  %5976 = vmatprep.subr.bf16.mxu0 %v6532_v22  ;;  %v3678_v27 = vpack.c.bf16 %v3674_v8, %v3674_v8  ;;  %v3680_v36 = vpack.c.bf16 %v3676_v26, %v3676_v26  ;;  %v3929_v8 = vld [vmem:[%s6595_s27 + $0x3d] ss:$0 sm:$0xff]  ;;  %v6469_v26 = vld [vmem:[%s7017_s16 + $0x168] sm:$0xff]  }
 0x281   : > { %5996 = vmatprep.subr.bf16.mxu1 %v6532_v22  ;;  %5990 = vmatprep.mubr.msk.bf16.mxu0 %vm6533_vm4, %v6532_v22  ;;  %v3577_v34 = vunpack.c.l.b16 %v3553_v25 }
 0x282   : > { %6010 = vmatprep.mubr.msk.bf16.mxu1 %vm6533_vm4, %v6532_v22 }
 0x283   : > { %5977 = vmatpush3.bf16.msra.mxu0 %v6428_v28  ;;  %v3679_v28 = vpack.c.bf16 %v3675_v20, %v3675_v20 }
 0x284   : > { %5997 = vmatpush3.bf16.msra.mxu1 %v6429_v29  ;;  %5978 = vmatprep.subr.bf16.mxu0 %v6532_v22  ;;  %v6450_v29 = vld [vmem:[%s7017_s16 + $0xa0] sm:$0xff]  }
 0x285   : > { %5998 = vmatprep.subr.bf16.mxu1 %v6532_v22 }
 0x287   : > { %5979 = vmatpush3.bf16.msra.mxu0 %v6430_v30  ;;  %v6451_v30 = vld [vmem:[%s7017_s16 + $0xe0] sm:$0xff]  }
 0x288   : > { %5999 = vmatpush3.bf16.msra.mxu1 %v6431_v31  ;;  %5980 = vmatprep.subr.bf16.mxu0 %v6532_v22  ;;  %v3551_v31 = vld [vmem:[%s6595_s27 + $0x3a] ss:$0 sm:$0xff] }
 0x289   : > { %6000 = vmatprep.subr.bf16.mxu1 %v6532_v22  ;;  %v3555_v40 = vpack.c.bf16 %v3551_v31, %v3551_v31 }
 0x28b   : > { %5981 = vmatpush3.bf16.msra.mxu0 %v6432_v33  ;;  %v3576_v33 = vunpack.c.l.b16 %v3552_v24  ;;  %v3579_v48 = vunpack.c.l.b16 %v3555_v40  ;;  %v6468_v24 = vld [vmem:[%s7017_s16 + $0x128] sm:$0xff]   ;;  %v6473_v40 = vld [vmem:[%s7017_s16 + $0x178] sm:$0xff]  }
 0x28c   : > { %6001 = vmatpush3.bf16.msra.mxu1 %v6433_v37  ;;  %5982 = vmatprep.subr.bf16.mxu0 %v6532_v22  ;;  %v3702_v37 = vunpack.c.l.b16 %v3678_v27  ;;  %v3830_v27 = vunpack.c.l.b16 %v3806_v17 }
 0x28d   : > { %6002 = vmatprep.subr.bf16.mxu1 %v6532_v22  ;;  %v3580_v44 = vsel %vm2317_vm5, %v3577_v34, %v3576_v33  ;;  %v6471_v34 = vld [vmem:[%s7017_s16 + $0x170] sm:$0xff]  }
 0x28e   : > { %v3581_v50 = vsel %vm2319_vm6, %v3578_v42, %v3580_v44  ;;  %v6474_v44 = vld [vmem:[%s7017_s16 + $0x180] sm:$0xff]  }
 0x28f   : > { %5983 = vmatpush3.bf16.msra.mxu0 %v6434_v38  ;;  %v3703_v38 = vunpack.c.l.b16 %v3679_v28  ;;  %v3933_v28 = vpack.c.bf16 %v3929_v8, %v3929_v8 }
 0x290   : > { %6003 = vmatpush3.bf16.msra.mxu1 %v6435_v45  ;;  %5984 = vmatprep.subr.bf16.mxu0 %v6532_v22  ;;  %v3704_v45 = vunpack.c.l.b16 %v3680_v36 }
 0x291   : > { %6004 = vmatprep.subr.bf16.mxu1 %v6532_v22  ;;  %v3706_v46 = vsel %vm2317_vm5, %v3703_v38, %v3702_v37  ;;  %v3957_v36 = vunpack.c.l.b16 %v3933_v28  ;;  %v6472_v38 = vld [vmem:[%s7017_s16 + $0x138] sm:$0xff]  }
 0x292   : > { %v3707_v52 = vsel %vm2319_vm6, %v3704_v45, %v3706_v46  ;;  %v6475_v45 = vld [vmem:[%s7017_s16 + $0x1c0] sm:$0xff]   ;;  %v6476_v46 = vld [vmem:[%s7017_s16 + $0x188] sm:$0xff]  }
 0x293   : > { %5985 = vmatpush3.bf16.msra.mxu0 %v6436_v54  ;;  %v3582_v54 = vsel %vm2321_vm7, %v3579_v48, %v3581_v50  ;;  %v6478_v48 = vld [vmem:[%s7017_s16 + $0x190] sm:$0xff]   ;;  %v4052_v50 = vld [vmem:[%s6595_s27 + $0xe] ss:$0 sm:$0xff] }
 0x294   : > { %6005 = vmatpush3.bf16.msra.mxu1 %v6437_v56  ;;  %5986 = vmatprep.subr.bf16.mxu0 %v6532_v22  ;;  %v3708_v56 = vsel %vm2321_vm7, %v3705_v51, %v3707_v52  ;;  %v3583_v57 = vpack.c.b16 %v3582_v54, %v3582_v54  ;;  %v4053_v51 = vld [vmem:[%s6595_s27 + $0x1e] ss:$0 sm:$0xff]  ;;  %v4179_v54 = vld [vmem:[%s6595_s27 + $0x1f] ss:$0 sm:$0xff] }
 0x295   : > { %6006 = vmatprep.subr.bf16.mxu1 %v6532_v22  ;;  %v3709_v58 = vpack.c.b16 %v3708_v56, %v3708_v56  ;;  %v6480_v52 = vld [vmem:[%s7017_s16 + $0x198] sm:$0xff]   ;;  %v4054_v56 = vld [vmem:[%s6595_s27 + $0x2e] ss:$0 sm:$0xff] }
 0x297   : > { %5987 = vmatpush3.bf16.msra.mxu0 %v6438_v62  ;;  %v6461_v62 = vld [vmem:[%s7017_s16 + $0x148] sm:$0xff]  }
 0x298   : > { %6007 = vmatpush3.bf16.msra.mxu1 %v6439_v0  ;;  %5988 = vmatprep.subr.bf16.mxu0 %v6532_v22  ;;  %v6463_v0 = vld [vmem:[%s7017_s16 + $0x150] sm:$0xff]  }
 0x299   : > { %6008 = vmatprep.subr.bf16.mxu1 %v6532_v22 }
 0x29b   : > { %5989 = vmatpush3.bf16.msra.mxu0 %v6440_v4  ;;  %v3926_v4 = vld [vmem:[%s6595_s27 + $0xd] ss:$0 sm:$0xff] }
 0x29c   : > { %6009 = vmatpush3.bf16.msra.mxu1 %v6441_v6  ;;  %6014 = vmatprep.subr.bf16.mxu0 %v6532_v22  ;;  %v6465_v6 = vld [vmem:[%s7017_s16 + $0x158] sm:$0xff]  }
 0x29d   : > { %6034 = vmatprep.subr.bf16.mxu1 %v6532_v22 }
 0x29e   : > { %5991 = vmatmul.mubr.bf16.vlgmr.msra.gmra.mrb[16].mxu0 %v3357_v9  ;;  %v3804_v9 = vpack.c.bf16 %v3800_v1, %v3800_v1  ;;  %v4058_v1 = vpack.c.bf16 %v4054_v56, %v4054_v56 }
 0x29f   : > { %6011 = vmatmul.mubr.bf16.vlgmr.msra.gmra.mrb[16].mxu1 %v3458_v10  ;;  %6015 = vmatpush3.bf16.msra.mxu0 %v6442_v11  ;;  %v3805_v10 = vpack.c.bf16 %v3801_v2, %v3801_v2  ;;  %v3928_v11 = vld [vmem:[%s6595_s27 + $0x2d] ss:$0 sm:$0xff] }
 0x2a0   : > { %6035 = vmatpush3.bf16.msra.mxu1 %v6443_v12  ;;  %6016 = vmatprep.subr.bf16.mxu0 %v6532_v22  ;;  %v3930_v12 = vpack.c.bf16 %v3926_v4, %v3926_v4  ;;  %v3828_v18 = vunpack.c.l.b16 %v3804_v9  ;;  %v3932_v20 = vpack.c.bf16 %v3928_v11, %v3928_v11  ;;  %v4181_v4 = vld [vmem:[%s6595_s27 + $0x3f] ss:$0 sm:$0xff]  ;;  %v6484_v9 = vld [vmem:[%s7017_s16 + $0x1a8] sm:$0xff]  }
 0x2a1   : > { %6036 = vmatprep.subr.bf16.mxu1 %v6532_v22  ;;  %6030 = vmatprep.mubr.msk.bf16.mxu0 %vm6533_vm4, %v6532_v22  ;;  %v6485_v11 = vld [vmem:[%s7017_s16 + $0x1e8] sm:$0xff]  }
 0x2a2   : > { %6050 = vmatprep.mubr.msk.bf16.mxu1 %vm6533_vm4, %v6532_v22 }
 0x2a3   : > { %6017 = vmatpush3.bf16.msra.mxu0 %v6444_v13  ;;  %v3931_v13 = vpack.c.bf16 %v3927_v5, %v3927_v5 }
 0x2a4   : > { %6037 = vmatpush3.bf16.msra.mxu1 %v6445_v14  ;;  %6018 = vmatprep.subr.bf16.mxu0 %v6532_v22  ;;  %v6466_v14 = vld [vmem:[%s7017_s16 + $0x120] sm:$0xff]  }
 0x2a5   : > { %6038 = vmatprep.subr.bf16.mxu1 %v6532_v22  ;;  %v3955_v23 = vunpack.c.l.b16 %v3931_v13  ;;  %v4185_v13 = vpack.c.bf16 %v4181_v4, %v4181_v4 }
 0x2a7   : > { %6019 = vmatpush3.bf16.msra.mxu0 %v6446_v15  ;;  %v6467_v15 = vld [vmem:[%s7017_s16 + $0x160] sm:$0xff]  }
 0x2a8   : > { %6039 = vmatpush3.bf16.msra.mxu1 %v6447_v16  ;;  %6020 = vmatprep.subr.bf16.mxu0 %v6532_v22  ;;  %v3803_v16 = vld [vmem:[%s6595_s27 + $0x3c] ss:$0 sm:$0xff] }
 0x2a9   : > { %6040 = vmatprep.subr.bf16.mxu1 %v6532_v22  ;;  %v3807_v25 = vpack.c.bf16 %v3803_v16, %v3803_v16 }
 0x2ab   : > { %6021 = vmatpush3.bf16.msra.mxu0 %v6448_v19  ;;  %v3829_v19 = vunpack.c.l.b16 %v3805_v10  ;;  %v3831_v33 = vunpack.c.l.b16 %v3807_v25 }
 0x2ac   : > { %6041 = vmatpush3.bf16.msra.mxu1 %v6449_v21  ;;  %6022 = vmatprep.subr.bf16.mxu0 %v6532_v22  ;;  %v3954_v21 = vunpack.c.l.b16 %v3930_v12  ;;  %v4082_v12 = vunpack.c.l.b16 %v4058_v1 }
 0x2ad   : > { %6042 = vmatprep.subr.bf16.mxu1 %v6532_v22 }
 0x2ae   : > { %v3958_v31 = vsel %vm2317_vm5, %v3955_v23, %v3954_v21  ;;  %v6486_v23 = vld [vmem:[%s7017_s16 + $0x1b0] sm:$0xff]  }
 0x2af   : > { %6023 = vmatpush3.bf16.msra.mxu0 %v6450_v29  ;;  %v3832_v29 = vsel %vm2317_vm5, %v3829_v19, %v3828_v18 }
 0x2b0   : > { %6043 = vmatpush3.bf16.msra.mxu1 %v6451_v30  ;;  %6024 = vmatprep.subr.bf16.mxu0 %v6532_v22  ;;  %v3956_v30 = vunpack.c.l.b16 %v3932_v20  ;;  %v3833_v35 = vsel %vm2319_vm6, %v3830_v27, %v3832_v29  ;;  %v6487_v27 = vld [vmem:[%s7017_s16 + $0x1f0] sm:$0xff]   ;;  %v4209_v29 = vunpack.c.l.b16 %v4185_v13 }
 0x2b1   : > { %6044 = vmatprep.subr.bf16.mxu1 %v6532_v22 }
 0x2b2   : > { %v3959_v37 = vsel %vm2319_vm6, %v3956_v30, %v3958_v31 }
 0x2b3   : > { %6025 = vmatpush3.bf16.msra.mxu0 %v6452_v39  ;;  %v3834_v39 = vsel %vm2321_vm7, %v3831_v33, %v3833_v35 }
 0x2b4   : > { %6045 = vmatpush3.bf16.msra.mxu1 %v6453_v41  ;;  %6026 = vmatprep.subr.bf16.mxu0 %v6532_v22  ;;  %v3960_v41 = vsel %vm2321_vm7, %v3957_v36, %v3959_v37  ;;  %v3835_v42 = vpack.c.b16 %v3834_v39, %v3834_v39 }
 0x2b5   : > { %6046 = vmatprep.subr.bf16.mxu1 %v6532_v22  ;;  %v3961_v43 = vpack.c.b16 %v3960_v41, %v3960_v41 }
 0x2b7   : > { %6027 = vmatpush3.bf16.msra.mxu0 %v6454_v47  ;;  %v6477_v47 = vld [vmem:[%s7017_s16 + $0x1c8] sm:$0xff]  }
 0x2b8   : > { %6047 = vmatpush3.bf16.msra.mxu1 %v6455_v49  ;;  %6028 = vmatprep.subr.bf16.mxu0 %v6532_v22  ;;  %v6479_v49 = vld [vmem:[%s7017_s16 + $0x1d0] sm:$0xff]  }
 0x2b9   : > { %6048 = vmatprep.subr.bf16.mxu1 %v6532_v22 }
 0x2bb   : > { %6029 = vmatpush3.bf16.msra.mxu0 %v6456_v53  ;;  %v4178_v53 = vld [vmem:[%s6595_s27 + $0xf] ss:$0 sm:$0xff] }
 0x2bc   : > { %6049 = vmatpush3.bf16.msra.mxu1 %v6457_v55  ;;  %6054 = vmatprep.subr.bf16.mxu0 %v6532_v22  ;;  %v6481_v55 = vld [vmem:[%s7017_s16 + $0x1d8] sm:$0xff]  }
 0x2bd   : > { %6074 = vmatprep.subr.bf16.mxu1 %v6532_v22 }
 0x2be   : > { %6031 = vmatmul.mubr.bf16.vlgmr.msra.gmra.mrb[20].mxu0 %v3583_v57  ;;  %v4056_v57 = vpack.c.bf16 %v4052_v50, %v4052_v50 }
 0x2bf   : > { %6051 = vmatmul.mubr.bf16.vlgmr.msra.gmra.mrb[20].mxu1 %v3709_v58  ;;  %6055 = vmatpush3.bf16.msra.mxu0 %v6458_v59  ;;  %v4057_v58 = vpack.c.bf16 %v4053_v51, %v4053_v51  ;;  %v4180_v59 = vld [vmem:[%s6595_s27 + $0x2f] ss:$0 sm:$0xff] }
 0x2c0   : > { %6075 = vmatpush3.bf16.msra.mxu1 %v6459_v60  ;;  %6056 = vmatprep.subr.bf16.mxu0 %v6532_v22  ;;  %v4182_v60 = vpack.c.bf16 %v4178_v53, %v4178_v53  ;;  %v4080_v2 = vunpack.c.l.b16 %v4056_v57  ;;  %v4184_v5 = vpack.c.bf16 %v4180_v59, %v4180_v59 }
 0x2c1   : > { %6076 = vmatprep.subr.bf16.mxu1 %v6532_v22  ;;  %6070 = vmatprep.mubr.msk.bf16.mxu0 %vm6533_vm4, %v6532_v22 }
 0x2c2   : > { %6090 = vmatprep.mubr.msk.bf16.mxu1 %vm6533_vm4, %v6532_v22  ;;  %v4208_v16 = vunpack.c.l.b16 %v4184_v5 }
 0x2c3   : > { %6057 = vmatpush3.bf16.msra.mxu0 %v6460_v61  ;;  %v4183_v61 = vpack.c.bf16 %v4179_v54, %v4179_v54 }
 0x2c4   : > { %6077 = vmatpush3.bf16.msra.mxu1 %v6461_v62  ;;  %6058 = vmatprep.subr.bf16.mxu0 %v6532_v22  ;;  %v6482_v62 = vld [vmem:[%s7017_s16 + $0x1a0] sm:$0xff]  }
 0x2c5   : > { %6078 = vmatprep.subr.bf16.mxu1 %v6532_v22  ;;  %v4207_v7 = vunpack.c.l.b16 %v4183_v61  ;;  %v2253_v61 = vld [vmem:[%s7446_s2] sm:$0xf] }
 0x2c7   : > { %6059 = vmatpush3.bf16.msra.mxu0 %v6462_v63  ;;  %v6483_v63 = vld [vmem:[%s7017_s16 + $0x1e0] sm:$0xff]  }
 0x2c8   : > { %6079 = vmatpush3.bf16.msra.mxu1 %v6463_v0  ;;  %6060 = vmatprep.subr.bf16.mxu0 %v6532_v22  ;;  %v4055_v0 = vld [vmem:[%s6595_s27 + $0x3e] ss:$0 sm:$0xff] }
 0x2c9   : > { %6080 = vmatprep.subr.bf16.mxu1 %v6532_v22  ;;  %v4059_v10 = vpack.c.bf16 %v4055_v0, %v4055_v0 }
 0x2cb   : > { %6061 = vmatpush3.bf16.msra.mxu0 %v6464_v3  ;;  %v4081_v3 = vunpack.c.l.b16 %v4057_v58 }
 0x2cc   : > { %6081 = vmatpush3.bf16.msra.mxu1 %v6465_v6  ;;  %6062 = vmatprep.subr.bf16.mxu0 %v6532_v22  ;;  %v4206_v6 = vunpack.c.l.b16 %v4182_v60 }
 0x2cd   : > { %6082 = vmatprep.subr.bf16.mxu1 %v6532_v22 }
 0x2ce   : > { %v4210_v19 = vsel %vm2317_vm5, %v4207_v7, %v4206_v6 }
 0x2cf   : > { %6063 = vmatpush3.bf16.msra.mxu0 %v6466_v14  ;;  %v4211_v31 = vsel %vm2319_vm6, %v4208_v16, %v4210_v19 }
 0x2d0   : > { %6083 = vmatpush3.bf16.msra.mxu1 %v6467_v15  ;;  %6064 = vmatprep.subr.bf16.mxu0 %v6532_v22  ;;  %v4084_v15 = vsel %vm2317_vm5, %v4081_v3, %v4080_v2  ;;  %v4212_v35 = vsel %vm2321_vm7, %v4209_v29, %v4211_v31 }
 0x2d1   : > { %6084 = vmatprep.subr.bf16.mxu1 %v6532_v22  ;;  %v4085_v28 = vsel %vm2319_vm6, %v4082_v12, %v4084_v15  ;;  %v4213_v37 = vpack.c.b16 %v4212_v35, %v4212_v35 }
 0x2d3   : > { %6065 = vmatpush3.bf16.msra.mxu0 %v6468_v24  ;;  %v4083_v24 = vunpack.c.l.b16 %v4059_v10 }
 0x2d4   : > { %6085 = vmatpush3.bf16.msra.mxu1 %v6469_v26  ;;  %6066 = vmatprep.subr.bf16.mxu0 %v6532_v22 }
 0x2d5   : > { %6086 = vmatprep.subr.bf16.mxu1 %v6532_v22  ;;  %v4086_v33 = vsel %vm2321_vm7, %v4083_v24, %v4085_v28 }
 0x2d6   : > { %v4087_v36 = vpack.c.b16 %v4086_v33, %v4086_v33 }
 0x2d7   : > { %6067 = vmatpush3.bf16.msra.mxu0 %v6470_v32  ;;  %v6488_v32 = vld [vmem:[%s7017_s16 + $0x1b8] sm:$0xff]  }
 0x2d8   : > { %6087 = vmatpush3.bf16.msra.mxu1 %v6471_v34  ;;  %6068 = vmatprep.subr.bf16.mxu0 %v6532_v22  ;;  %v6489_v34 = vld [vmem:[%s7017_s16 + $0x1f8] sm:$0xff]  }
 0x2d9   : > { %6088 = vmatprep.subr.bf16.mxu1 %v6532_v22 }
 0x2db   : > { %6069 = vmatpush3.bf16.msra.mxu0 %v6472_v38 }
 0x2dc   : > { %6089 = vmatpush3.bf16.msra.mxu1 %v6473_v40  ;;  %6094 = vmatprep.subr.bf16.mxu0 %v6532_v22 }
 0x2dd   : > { %6114 = vmatprep.subr.bf16.mxu1 %v6532_v22 }
 0x2de   : > { %6071 = vmatmul.mubr.bf16.vlgmr.msra.gmra.mrb[24].mxu0 %v3835_v42 }
 0x2df   : > { %6091 = vmatmul.mubr.bf16.vlgmr.msra.gmra.mrb[24].mxu1 %v3961_v43  ;;  %6095 = vmatpush3.bf16.msra.mxu0 %v6474_v44 }
 0x2e0   : > { %6115 = vmatpush3.bf16.msra.mxu1 %v6475_v45  ;;  %6096 = vmatprep.subr.bf16.mxu0 %v6532_v22 }
 0x2e1   : > { %6116 = vmatprep.subr.bf16.mxu1 %v6532_v22  ;;  %6110 = vmatprep.mubr.msk.bf16.mxu0 %vm6533_vm4, %v6532_v22 }
 0x2e2   : > { %6130 = vmatprep.mubr.msk.bf16.mxu1 %vm6533_vm4, %v6532_v22 }
 0x2e3   : > { %6097 = vmatpush3.bf16.msra.mxu0 %v6476_v46 }
 0x2e4   : > { %6117 = vmatpush3.bf16.msra.mxu1 %v6477_v47  ;;  %6098 = vmatprep.subr.bf16.mxu0 %v6532_v22 }
 0x2e5   : > { %6118 = vmatprep.subr.bf16.mxu1 %v6532_v22 }
 0x2e7   : > { %6099 = vmatpush3.bf16.msra.mxu0 %v6478_v48 }
 0x2e8   : > { %6119 = vmatpush3.bf16.msra.mxu1 %v6479_v49  ;;  %6100 = vmatprep.subr.bf16.mxu0 %v6532_v22 }
 0x2e9   : > { %6120 = vmatprep.subr.bf16.mxu1 %v6532_v22 }
 0x2eb   : > { %6101 = vmatpush3.bf16.msra.mxu0 %v6480_v52 }
 0x2ec   : > { %6121 = vmatpush3.bf16.msra.mxu1 %v6481_v55  ;;  %6102 = vmatprep.subr.bf16.mxu0 %v6532_v22 }
 0x2ed   : > { %6122 = vmatprep.subr.bf16.mxu1 %v6532_v22 }
 0x2ef   : > { %6103 = vmatpush3.bf16.msra.mxu0 %v6482_v62 }
 0x2f0   : > { %6123 = vmatpush3.bf16.msra.mxu1 %v6483_v63  ;;  %6104 = vmatprep.subr.bf16.mxu0 %v6532_v22 }
 0x2f1   : > { %v2407_v14 = vpop.f32.mrb[0].mxu0  ;;  %6124 = vmatprep.subr.bf16.mxu1 %v6532_v22 }
 0x2f2   : > { %v2508_v17 = vpop.f32.mrb[0].mxu1  ;;  %v5832_v18 = vpop.f32.mrb[1].mxu0 }
 0x2f3   : > { %v2509_v8 = vadd.f32 %v2508_v17, %v2407_v14  ;;  %v5852_v20 = vpop.f32.mrb[1].mxu1  ;;  %v2410_v21 = vpop.f32.mrb[2].mxu0  ;;  %6105 = vmatpush3.bf16.msra.mxu0 %v6484_v9 }
 0x2f4   : > { %v2511_v25 = vpop.f32.mrb[2].mxu1  ;;  %6125 = vmatpush3.bf16.msra.mxu1 %v6485_v11  ;;  %v5833_v26 = vpop.f32.mrb[3].mxu0  ;;  %6106 = vmatprep.subr.bf16.mxu0 %v6532_v22 }
 0x2f5   : > { %v5853_v30 = vpop.f32.mrb[3].mxu1  ;;  %6126 = vmatprep.subr.bf16.mxu1 %v6532_v22 }
 0x2f7   : > { %6107 = vmatpush3.bf16.msra.mxu0 %v6486_v23 }
 0x2f8   : > { %6127 = vmatpush3.bf16.msra.mxu1 %v6487_v27  ;;  %6108 = vmatprep.subr.bf16.mxu0 %v6532_v22 }
 0x2f9   : > { %6128 = vmatprep.subr.bf16.mxu1 %v6532_v22 }
 0x2fb   : > { %6109 = vmatpush3.bf16.msra.mxu0 %v6488_v32 }
 0x2fc   : > { %6129 = vmatpush3.bf16.msra.mxu1 %v6489_v34 }
 0x2fe   : > { %6111 = vmatmul.mubr.bf16.vlgmr.msra.gmra.mrb[28].mxu0 %v4087_v36 }
 0x2ff   : > { %6131 = vmatmul.mubr.bf16.vlgmr.msra.gmra.mrb[28].mxu1 %v4213_v37 }
 0x311   : > { %v2637_v38 = vpop.f32.mrb[4].mxu0 }
 0x312   : > { %v2643_v39 = vadd.f32 %v2637_v38, %v2509_v8  ;;  %v2767_v40 = vpop.f32.mrb[4].mxu1  ;;  %v5872_v41 = vpop.f32.mrb[5].mxu0 }
 0x313   : > { %v5892_v42 = vpop.f32.mrb[5].mxu1  ;;  %v2640_v43 = vpop.f32.mrb[6].mxu0 }
 0x314   : > { %v2773_v44 = vadd.f32 %v2767_v40, %v2643_v39  ;;  %v2770_v45 = vpop.f32.mrb[6].mxu1  ;;  %v5873_v46 = vpop.f32.mrb[7].mxu0  ;;  %v5006_v39 = vld [vmem:[%s7446_s2 + $0x4] sm:$0xf] }
 0x315   : > { %v5893_v47 = vpop.f32.mrb[7].mxu1 }
 0x331   : > { %v2897_v48 = vpop.f32.mrb[8].mxu0 }
 0x332   : > { %v2903_v49 = vadd.f32 %v2897_v48, %v2773_v44  ;;  %v3027_v50 = vpop.f32.mrb[8].mxu1  ;;  %v5912_v22 = vpop.f32.mrb[9].mxu0 }
 0x333   : > { %v5932_v51 = vpop.f32.mrb[9].mxu1  ;;  %v2900_v52 = vpop.f32.mrb[10].mxu0 }
 0x334   : > { %v3033_v53 = vadd.f32 %v3027_v50, %v2903_v49  ;;  %v3030_v54 = vpop.f32.mrb[10].mxu1  ;;  %v5913_v55 = vpop.f32.mrb[11].mxu0 }
 0x335   : > { %v5933_v56 = vpop.f32.mrb[11].mxu1 }
 0x351   : > { %v3157_v57 = vpop.f32.mrb[12].mxu0 }
 0x352   : > { %v3163_v58 = vadd.f32 %v3157_v57, %v3033_v53  ;;  %v3287_v59 = vpop.f32.mrb[12].mxu1  ;;  %v5952_v60 = vpop.f32.mrb[13].mxu0 }
 0x353   : > { %v5972_v62 = vpop.f32.mrb[13].mxu1  ;;  %v3160_v63 = vpop.f32.mrb[14].mxu0 }
 0x354   : > { %v3293_v0 = vadd.f32 %v3287_v59, %v3163_v58  ;;  %v3290_v1 = vpop.f32.mrb[14].mxu1  ;;  %v5953_v2 = vpop.f32.mrb[15].mxu0 }
 0x355   : > { %v5973_v3 = vpop.f32.mrb[15].mxu1 }
 0x356   : > { %v3294_v4 = vadd.f32 %v3293_v0, %v2253_v61 }
 0x358   : > { %3295 = vst [vmem:[%s7446_s2] sm:$0xf] %v3294_v4 }
 0x371   : > { %v3441_v5 = vpop.f32.mrb[16].mxu0 }
 0x372   : > { %v3542_v6 = vpop.f32.mrb[16].mxu1  ;;  %v5992_v7 = vpop.f32.mrb[17].mxu0 }
 0x373   : > { %v3543_v9 = vadd.f32 %v3542_v6, %v3441_v5  ;;  %v6012_v10 = vpop.f32.mrb[17].mxu1  ;;  %v3444_v11 = vpop.f32.mrb[18].mxu0 }
 0x374   : > { %v3545_v12 = vpop.f32.mrb[18].mxu1  ;;  %v5993_v13 = vpop.f32.mrb[19].mxu0 }
 0x375   : > { %v6013_v14 = vpop.f32.mrb[19].mxu1 }
 0x391   : > { %v3667_v15 = vpop.f32.mrb[20].mxu0 }
 0x392   : > { %v3673_v16 = vadd.f32 %v3667_v15, %v3543_v9  ;;  %v3793_v17 = vpop.f32.mrb[20].mxu1  ;;  %v6032_v18 = vpop.f32.mrb[21].mxu0 }
 0x393   : > { %v6052_v19 = vpop.f32.mrb[21].mxu1  ;;  %v3670_v8 = vpop.f32.mrb[22].mxu0 }
 0x394   : > { %v3799_v20 = vadd.f32 %v3793_v17, %v3673_v16  ;;  %v3796_v21 = vpop.f32.mrb[22].mxu1  ;;  %v6033_v23 = vpop.f32.mrb[23].mxu0 }
 0x395   : > { %v6053_v24 = vpop.f32.mrb[23].mxu1 }
 0x3b1   : > { %v3919_v25 = vpop.f32.mrb[24].mxu0 }
 0x3b2   : > { %v3925_v26 = vadd.f32 %v3919_v25, %v3799_v20  ;;  %v4045_v27 = vpop.f32.mrb[24].mxu1  ;;  %v6072_v28 = vpop.f32.mrb[25].mxu0 }
 0x3b3   : > { %v6092_v29 = vpop.f32.mrb[25].mxu1  ;;  %v3922_v30 = vpop.f32.mrb[26].mxu0 }
 0x3b4   : > { %v4051_v31 = vadd.f32 %v4045_v27, %v3925_v26  ;;  %v4048_v32 = vpop.f32.mrb[26].mxu1  ;;  %v6073_v33 = vpop.f32.mrb[27].mxu0 }
 0x3b5   : > { %v6093_v34 = vpop.f32.mrb[27].mxu1 }
 0x3d1   : > { %v4171_v35 = vpop.f32.mrb[28].mxu0 }
 0x3d2   : > { %v4177_v36 = vadd.f32 %v4171_v35, %v4051_v31  ;;  %v4297_v37 = vpop.f32.mrb[28].mxu1  ;;  %v6112_v38 = vpop.f32.mrb[29].mxu0 }
 0x3d3   : > { %v6132_v40 = vpop.f32.mrb[29].mxu1  ;;  %v4174_v41 = vpop.f32.mrb[30].mxu0 }
 0x3d4   : > { %v4303_v42 = vadd.f32 %v4297_v37, %v4177_v36  ;;  %v4300_v43 = vpop.f32.mrb[30].mxu1  ;;  %v6113_v44 = vpop.f32.mrb[31].mxu0 }
 0x3d5   : > { %v6133_v45 = vpop.f32.mrb[31].mxu1 }
 0x3d6   : > { %v4304_v46 = vadd.f32 %v5006_v39, %v4303_v42 }
 0x3d8   : > { %5183 = vst [vmem:[%s7446_s2 + $0x4] sm:$0xf] %v4304_v46 }
 0x3d9 PF: > { %s12_s13 = sadd.s32 1, %s6528_s13   ;;  %s7447_s9 = smov %s6516_s10 }
 0x3da   : > { %p9_p11 = scmp.ge.s32.totalorder %s12_s13, 18   ;;  %s7448_s10 = smov %s6584_s17 }
 0x3db   : > { %s7449_s11 = smov %s6524_s12  ;;  %s7450_s12 = smov %s7452_s14 }
 0x3dc   :  { %11 = sbr.rel (!%p9_p11) target bundleno = 3 (0x3), region = 112 }

</bundles_post_ra>
